<compile_context>
chip_gen: v7x
topology: tpu7x:2x2x1
jax: 0.10.0
libtpu: 0.0.40
codegen_flags: <defaults>
</compile_context>

<pallas_src>
import functools

import jax
import jax.numpy as jnp
from jax.experimental import pallas as pl
from jax.experimental.pallas import tpu as pltpu


# ---------------------------------------------------------------------------
# Kernel: one grid step == Bt batch samples, everything fused in VMEM.
# ---------------------------------------------------------------------------
def _inverted_residual_kernel(
    dp_ref,                                        # (B,) f32 drop-path scale (SMEM)
    x_ref,                                         # (Bt, H, W, Cin) input block
    w_pw_ref, bn1_b_ref,                           # 1x1 expand (BN1 scale folded)
    w_dw_ref, bn2_b_ref,                           # depthwise taps (BN2 folded)
    w_ser_ref, b_ser_ref, w_see_ref, b_see_ref,    # squeeze-excite
    w_pwl_ref, bn3_b_ref,                          # 1x1 project (BN3 folded)
    o_ref,                                         # (Bt, H, W, Cout) output block
    pad_ref,                                       # (Bt, H+kh-1, W, Cmid) scratch
    h2_ref,                                        # (Bt, H, W, Cmid) scratch
    *, kh, kw, has_skip, strip_pw, strip_dw):
    Bt, H, W, Cin = x_ref.shape
    Cmid = w_pw_ref.shape[1]
    Cout = w_pwl_ref.shape[1]
    ph, pw_ = kh // 2, kw // 2
    b0 = pl.program_id(0) * Bt

    # ---- zero the H-halo rows (tiny; interior rows are overwritten below) --
    if ph > 0:
        zrow = jnp.zeros((Bt, ph, W, Cmid), jnp.float32)
        pad_ref[:, 0:ph, :, :] = zrow
        pad_ref[:, ph + H:ph + H + ph, :, :] = zrow

    # ---- stage 1: 1x1 expand (BN1 scale folded) + bias + SiLU, H strips ----
    w_pw = w_pw_ref[...].astype(jnp.float32)             # (Cin, Cmid)
    bn1_b = bn1_b_ref[...].astype(jnp.float32)           # (1, Cmid)
    for y0 in range(0, H, strip_pw):
        xs = x_ref[:, y0:y0 + strip_pw, :, :].astype(jnp.float32)
        h = jnp.dot(xs.reshape(Bt * strip_pw * W, Cin), w_pw,
                    preferred_element_type=jnp.float32)
        h = h + bn1_b
        h = h * jax.nn.sigmoid(h)
        pad_ref[:, ph + y0:ph + y0 + strip_pw, :, :] = (
            h.reshape(Bt, strip_pw, W, Cmid))

    # ---- stage 2: depthwise kh x kw conv (BN2 folded) + bias + SiLU --------
    # H shifts: free leading-dim slices of the halo'd scratch.
    # W shifts: XLU roll + edge mask (all loads/stores stay sublane-aligned).
    w_dw = w_dw_ref[...].astype(jnp.float32)              # (kh*kw, Cmid)
    bn2_b = bn2_b_ref[...].astype(jnp.float32).reshape(1, 1, 1, Cmid)
    col = jax.lax.broadcasted_iota(jnp.int32, (1, 1, W, Cmid), 2)
    pooled = jnp.zeros((Bt, Cmid), jnp.float32)           # SE pool accumulator
    for y0 in range(0, H, strip_dw):
        blk = pad_ref[:, y0:y0 + strip_dw + kh - 1, :, :]
        acc = jnp.zeros((Bt, strip_dw, W, Cmid), jnp.float32)
        for ky in range(kh):
            rows = blk[:, ky:ky + strip_dw, :, :]
            for kx in range(kw):
                dx = kx - pw_
                tap = w_dw[ky * kw + kx].reshape(1, 1, 1, Cmid)
                v = rows
                if dx != 0:
                    v = pltpu.roll(v, shift=(-dx) % W, axis=2)
                    mask = (col < W - dx) if dx > 0 else (col >= -dx)
                    v = jnp.where(mask, v, 0.0)
                acc = acc + v * tap
        acc = acc + bn2_b
        acc = acc * jax.nn.sigmoid(acc)
        h2_ref[:, y0:y0 + strip_dw, :, :] = acc
        pooled = pooled + jnp.sum(acc, axis=(1, 2))

    # ---- stage 3: squeeze-excite gate (per sample) --------------------------
    pooled = pooled * (1.0 / (H * W))                      # (Bt, Cmid)
    r = jnp.dot(pooled, w_ser_ref[...].astype(jnp.float32),
                preferred_element_type=jnp.float32) + b_ser_ref[...]
    r = r * jax.nn.sigmoid(r)
    g = jax.nn.sigmoid(
        jnp.dot(r, w_see_ref[...].astype(jnp.float32),
                preferred_element_type=jnp.float32) + b_see_ref[...])
    g4 = g.reshape(Bt, 1, 1, Cmid)

    # ---- stage 4: 1x1 project (BN3 folded) + bias + drop-path + skip -------
    w_pwl = w_pwl_ref[...].astype(jnp.float32)             # (Cmid, Cout)
    bn3_b = bn3_b_ref[...].astype(jnp.float32)             # (1, Cout)
    for y0 in range(0, H, strip_pw):
        h2 = h2_ref[:, y0:y0 + strip_pw, :, :] * g4
        y = jnp.dot(h2.reshape(Bt * strip_pw * W, Cmid), w_pwl,
                    preferred_element_type=jnp.float32) + bn3_b
        y = y.reshape(Bt, strip_pw, W, Cout)
        if has_skip:
            xs = x_ref[:, y0:y0 + strip_pw, :, :].astype(jnp.float32)
            for i in range(Bt):                            # per-sample dp scale
                o_ref[i, y0:y0 + strip_pw, :, :] = (
                    y[i] * dp_ref[b0 + i] + xs[i]).astype(o_ref.dtype)
        else:
            o_ref[:, y0:y0 + strip_pw, :, :] = y.astype(o_ref.dtype)


# ---------------------------------------------------------------------------
# Tiling helpers
# ---------------------------------------------------------------------------
def _largest_divisor_le(n, cap):
    cap = int(max(1, min(cap, n)))
    while n % cap:
        cap -= 1
    return cap


def _choose_block_batch(B, H, W, Cmid, kh, *, vmem_budget=8 << 20, min_rows=1024):
    """Samples per grid step: amortise per-step overhead, keep >= 2 grid steps
    (v7x has 2 TensorCores), and bound the VMEM scratch footprint."""
    best = 1
    for bt in range(1, B + 1):
        if B % bt:
            continue
        if B // bt < min(2, B):
            continue
        scratch = bt * ((H + kh - 1) + H) * W * Cmid * 4
        if scratch > vmem_budget:
            continue
        best = bt
        if bt * H * W >= min_rows:
            break
    return best


# ---------------------------------------------------------------------------
# pallas_call wrapper
# ---------------------------------------------------------------------------
def _inverted_residual_pallas(x_nhwc, dp_scale, fp, *, kh, kw, has_skip, out_ch):
    B, H, W, Cin = x_nhwc.shape
    Cmid = fp["w_pw"].shape[1]
    red = fp["w_se_r"].shape[1]

    bt = _choose_block_batch(B, H, W, Cmid, kh)
    strip_dw = _largest_divisor_le(H, 4)                       # bounds vreg pressure
    strip_pw = _largest_divisor_le(H, max(1, 128 // max(1, bt * W)))  # M ~ 128 rows

    kernel = functools.partial(_inverted_residual_kernel, kh=kh, kw=kw,
                               has_skip=has_skip,
                               strip_pw=strip_pw, strip_dw=strip_dw)

    def _full(arr):
        nd = arr.ndim
        return pl.BlockSpec(arr.shape, lambda i, nd=nd: (0,) * nd)

    in_specs = [
        pl.BlockSpec(memory_space=pltpu.MemorySpace.SMEM),          # dp (B,)
        pl.BlockSpec((bt, H, W, Cin), lambda i: (i, 0, 0, 0)),      # x block
        _full(fp["w_pw"]), _full(fp["bn1_b"]),
        _full(fp["w_dw"]), _full(fp["bn2_b"]),
        _full(fp["w_se_r"]), _full(fp["b_se_r"]),
        _full(fp["w_se_e"]), _full(fp["b_se_e"]),
        _full(fp["w_pwl"]), _full(fp["bn3_b"]),
    ]

    # VMEM: scratches + double-buffered x/out blocks + weights (rough, bytes).
    est = 4 * (bt * ((H + kh - 1) + H) * W * Cmid
               + 4 * bt * H * W * (Cin + out_ch)
               + 2 * (Cin * Cmid + kh * kw * Cmid + 2 * Cmid
                      + Cmid * red + red + red * Cmid + Cmid * out_ch + out_ch))
    vmem_limit = int(min(max(2 * est, 32 << 20), 64 << 20))

    flops = 2 * B * H * W * (Cin * Cmid + kh * kw * Cmid + Cmid * out_ch)
    transcendentals = 2 * B * H * W * Cmid + B * (red + Cmid)
    bytes_accessed = 4 * (B * H * W * (Cin + out_ch)
                          + Cin * Cmid + kh * kw * Cmid + Cmid * red
                          + red * Cmid + Cmid * out_ch)

    return pl.pallas_call(
        kernel,
        out_shape=jax.ShapeDtypeStruct((B, H, W, out_ch), x_nhwc.dtype),
        grid=(B // bt,),
        in_specs=in_specs,
        out_specs=pl.BlockSpec((bt, H, W, out_ch), lambda i: (i, 0, 0, 0)),
        scratch_shapes=[pltpu.VMEM((bt, H + kh - 1, W, Cmid), jnp.float32),
                        pltpu.VMEM((bt, H, W, Cmid), jnp.float32)],
        compiler_params=pltpu.CompilerParams(
            dimension_semantics=("parallel",),
            vmem_limit_bytes=vmem_limit),
        cost_estimate=pl.CostEstimate(flops=flops,
                                      transcendentals=transcendentals,
                                      bytes_accessed=bytes_accessed),
    )(dp_scale, x_nhwc,
      fp["w_pw"], fp["bn1_b"], fp["w_dw"], fp["bn2_b"],
      fp["w_se_r"], fp["b_se_r"], fp["w_se_e"], fp["b_se_e"],
      fp["w_pwl"], fp["bn3_b"])


# ---------------------------------------------------------------------------
# Parameters + module wrapper (stateless port of the PyTorch block)
# ---------------------------------------------------------------------------
def _init_params(key, in_ch, out_ch, mid_ch, red_ch, kh, kw):
    ks = jax.random.split(key, 10)

    def w(k, shape, fan_in):
        return jax.random.normal(k, shape, jnp.float32) * (fan_in ** -0.5)

    def bn(k, ch):
        k1, k2 = jax.random.split(k)
        scale = 1.0 + 0.1 * jax.random.normal(k1, (1, ch), jnp.float32)
        bias = 0.1 * jax.random.normal(k2, (1, ch), jnp.float32)
        return scale, bias

    bn1_s, bn1_b = bn(ks[5], mid_ch)
    bn2_s, bn2_b = bn(ks[6], mid_ch)
    bn3_s, bn3_b = bn(ks[7], out_ch)
    return dict(
        w_pw=w(ks[0], (in_ch, mid_ch), in_ch),
        w_dw=w(ks[1], (kh * kw, mid_ch), kh * kw),
        w_se_r=w(ks[2], (mid_ch, red_ch), mid_ch),
        b_se_r=0.1 * jax.random.normal(ks[8], (1, red_ch), jnp.float32),
        w_se_e=w(ks[3], (red_ch, mid_ch), red_ch),
        b_se_e=0.1 * jax.random.normal(ks[9], (1, mid_ch), jnp.float32),
        w_pwl=w(ks[4], (mid_ch, out_ch), mid_ch),
        bn1_s=bn1_s, bn1_b=bn1_b,
        bn2_s=bn2_s, bn2_b=bn2_b,
        bn3_s=bn3_s, bn3_b=bn3_b,
    )


def _fold_bn(p):
    """Fold BN scales into the conv weights host-side (perf: removes three
    full-tensor VPU multiplies per grid step); biases stay separate."""
    return dict(
        w_pw=p["w_pw"] * p["bn1_s"], bn1_b=p["bn1_b"],
        w_dw=p["w_dw"] * p["bn2_s"], bn2_b=p["bn2_b"],
        w_se_r=p["w_se_r"], b_se_r=p["b_se_r"],
        w_se_e=p["w_se_e"], b_se_e=p["b_se_e"],
        w_pwl=p["w_pwl"] * p["bn3_s"], bn3_b=p["bn3_b"],
    )


class InvertedResidual2D:
    """JAX/Pallas port of the PyTorch InvertedResidual2D (MBConv) block."""

    def __init__(self, in_ch, out_ch, dw_kernel_size=3, stride=1, dilation=1,
                 noskip=False, exp_ratio=1.0, exp_kernel_size=1,
                 pw_kernel_size=1, se_ratio=1.0 / 24, dprate=0.0,
                 scale_by_keep=True, *, key):
        if stride != 1 or dilation != 1:
            raise NotImplementedError("stride/dilation > 1 not implemented")
        if exp_kernel_size != 1 or pw_kernel_size != 1:
            raise NotImplementedError("only 1x1 pointwise convs implemented")
        if dw_kernel_size % 2 != 1:
            raise NotImplementedError("only odd depthwise kernel sizes")
        self.in_ch, self.out_ch = in_ch, out_ch
        self.mid_ch = int(in_ch * exp_ratio)
        self.red_ch = max(1, int(self.mid_ch * se_ratio))
        self.kh = self.kw = dw_kernel_size
        self.has_skip = (in_ch == out_ch and stride == 1) and (not noskip)
        self.dprate = float(dprate)
        self.scale_by_keep = scale_by_keep
        self.training = True
        self.params = _init_params(key, in_ch, out_ch, self.mid_ch,
                                   self.red_ch, self.kh, self.kw)
        self.folded = _fold_bn(self.params)

    def drop_path_scale(self, batch, rng):
        """Per-sample stochastic-depth scale, drawn host-side (no in-kernel PRNG)."""
        if self.dprate == 0.0 or not self.training or not self.has_skip:
            return jnp.ones((batch,), jnp.float32)
        keep = 1.0 - self.dprate
        mask = jax.random.bernoulli(rng, keep, (batch,)).astype(jnp.float32)
        return mask / keep if self.scale_by_keep else mask

    def __call__(self, x_nchw, *, rng=None):
        b = x_nchw.shape[0]
        x_nhwc = jnp.transpose(x_nchw, (0, 2, 3, 1))   # channels -> lane axis
        dp_scale = self.drop_path_scale(b, rng)
        out_nhwc = _inverted_residual_pallas(
            x_nhwc, dp_scale, self.folded, kh=self.kh, kw=self.kw,
            has_skip=self.has_skip, out_ch=self.out_ch)
        return jnp.transpose(out_nhwc, (0, 3, 1, 2))


# ---------------------------------------------------------------------------
# Pure-JAX reference (same raw params / same drop-path mask) for validation
# ---------------------------------------------------------------------------
def _inverted_residual_reference(x_nhwc, dp_scale, p, *, kh, kw, has_skip):
    hi = jax.lax.Precision.HIGHEST
    Cmid = p["w_pw"].shape[1]
    x = x_nhwc.astype(jnp.float32)

    h = jnp.einsum("bhwc,cm->bhwm", x, p["w_pw"], precision=hi)
    h = h * p["bn1_s"] + p["bn1_b"]
    h = h * jax.nn.sigmoid(h)

    w_dw = p["w_dw"].reshape(kh, kw, 1, Cmid)
    h = jax.lax.conv_general_dilated(
        h, w_dw, window_strides=(1, 1),
        padding=((kh // 2, kh // 2), (kw // 2, kw // 2)),
        dimension_numbers=("NHWC", "HWIO", "NHWC"),
        feature_group_count=Cmid, precision=hi)
    h = h * p["bn2_s"] + p["bn2_b"]
    h = h * jax.nn.sigmoid(h)

    pooled = h.mean(axis=(1, 2))                                # (B, Cmid)
    r = pooled @ p["w_se_r"] + p["b_se_r"]
    r = r * jax.nn.sigmoid(r)
    g = jax.nn.sigmoid(r @ p["w_se_e"] + p["b_se_e"])
    h = h * g[:, None, None, :]

    h = jnp.einsum("bhwc,cm->bhwm", h, p["w_pwl"], precision=hi)
    h = h * p["bn3_s"] + p["bn3_b"]
    if has_skip:
        h = h * dp_scale[:, None, None, None] + x
    return h


# ---------------------------------------------------------------------------
# Self-test
# ---------------------------------------------------------------------------
if __name__ == "__main__":
    root = jax.random.PRNGKey(0)
    k_param, k_x, k_dp = jax.random.split(root, 3)

    B, in_ch, H, W = 2, 32, 16, 16
    out_ch = 32
    block = InvertedResidual2D(in_ch, out_ch, dw_kernel_size=3, exp_ratio=4.0,
                               se_ratio=1.0 / 24, dprate=0.2, key=k_param)

    x = jax.random.normal(k_x, (B, in_ch, H, W), dtype=jnp.float32)
    out = jax.block_until_ready(block(x, rng=k_dp))
    assert out.shape == (B, out_ch, H, W)
    assert bool(jnp.all(jnp.isfinite(out)))

    # Validate against a pure-JAX reference using the same raw params and the
    # same (host-side) drop-path mask.  Tolerance: the in-kernel f32 matmuls
    # use the MXU's default f32 strategy, so allow ~5e-3 max relative error
    # (structural halo / tap / shift bugs produce errors orders of magnitude
    # larger and are still caught).
    x_nhwc = jnp.transpose(x, (0, 2, 3, 1))
    dp_scale = block.drop_path_scale(B, k_dp)
    ref = jnp.transpose(
        _inverted_residual_reference(x_nhwc, dp_scale, block.params,
                                     kh=block.kh, kw=block.kw,
                                     has_skip=block.has_skip),
        (0, 3, 1, 2))
    rel_err = float(jnp.max(jnp.abs(out - ref)) / (jnp.max(jnp.abs(ref)) + 1e-6))
    assert rel_err < 5e-3, f"kernel mismatch vs reference: rel_err={rel_err:.3e}"

    print("KERNEL_OK")
</pallas_src>

<mosaic_0001>
module attributes {stable_mosaic.version = 11 : i64} {
  func.func @_inverted_residual_kernel(%arg0: i32, %arg1: memref<2xf32, #tpu.memory_space<smem>>, %arg2: memref<1x16x16x32xf32, #tpu.memory_space<vmem>>, %arg3: memref<32x128xf32, #tpu.memory_space<vmem>>, %arg4: memref<1x128xf32, #tpu.memory_space<vmem>>, %arg5: memref<9x128xf32, #tpu.memory_space<vmem>>, %arg6: memref<1x128xf32, #tpu.memory_space<vmem>>, %arg7: memref<128x5xf32, #tpu.memory_space<vmem>>, %arg8: memref<1x5xf32, #tpu.memory_space<vmem>>, %arg9: memref<5x128xf32, #tpu.memory_space<vmem>>, %arg10: memref<1x128xf32, #tpu.memory_space<vmem>>, %arg11: memref<128x32xf32, #tpu.memory_space<vmem>>, %arg12: memref<1x32xf32, #tpu.memory_space<vmem>>, %arg13: memref<1x16x16x32xf32, #tpu.memory_space<vmem>>, %arg14: memref<1x18x16x128xf32, #tpu.memory_space<vmem>>, %arg15: memref<1x16x16x128xf32, #tpu.memory_space<vmem>>) attributes {dimension_semantics = [#tpu.dimension_semantics<parallel>], iteration_bounds = array<i64: 2>, scalar_prefetch = 0 : i64, scratch_operands = 2 : i64, tpu.core_type = #tpu.core_type<tc>, window_params = [{transform_indices = @transform_0, window_bounds = array<i64: 2>}, {transform_indices = @transform_1, window_bounds = array<i64: 1, 16, 16, 32>}, {pipeline_mode = #tpu.pipeline_mode<synchronous>, transform_indices = @transform_2, window_bounds = array<i64: 32, 128>}, {pipeline_mode = #tpu.pipeline_mode<synchronous>, transform_indices = @transform_3, window_bounds = array<i64: 1, 128>}, {pipeline_mode = #tpu.pipeline_mode<synchronous>, transform_indices = @transform_4, window_bounds = array<i64: 9, 128>}, {pipeline_mode = #tpu.pipeline_mode<synchronous>, transform_indices = @transform_5, window_bounds = array<i64: 1, 128>}, {pipeline_mode = #tpu.pipeline_mode<synchronous>, transform_indices = @transform_6, window_bounds = array<i64: 128, 5>}, {pipeline_mode = #tpu.pipeline_mode<synchronous>, transform_indices = @transform_7, window_bounds = array<i64: 1, 5>}, {pipeline_mode = #tpu.pipeline_mode<synchronous>, transform_indices = @transform_8, window_bounds = array<i64: 5, 128>}, {pipeline_mode = #tpu.pipeline_mode<synchronous>, transform_indices = @transform_9, window_bounds = array<i64: 1, 128>}, {pipeline_mode = #tpu.pipeline_mode<synchronous>, transform_indices = @transform_10, window_bounds = array<i64: 128, 32>}, {pipeline_mode = #tpu.pipeline_mode<synchronous>, transform_indices = @transform_11, window_bounds = array<i64: 1, 32>}, {transform_indices = @transform_12, window_bounds = array<i64: 1, 16, 16, 32>}]} {
    %c1_i32 = arith.constant 1 : i32
    %0 = arith.muli %arg0, %c1_i32 : i32
    %cst = arith.constant 0.000000e+00 : f32
    %1 = vector.broadcast %cst : f32 to vector<1x1x16x128xf32>
    %c0 = arith.constant 0 : index
    %c0_0 = arith.constant 0 : index
    %c0_1 = arith.constant 0 : index
    %c0_2 = arith.constant 0 : index
    %2 = vector.load %arg14[%c0, %c0_0, %c0_1, %c0_2] : memref<1x18x16x128xf32, #tpu.memory_space<vmem>>, vector<1x1x16x128xf32>
    tpu.vector_store %arg14[%c0, %c0_0, %c0_1, %c0_2], %1 {strides = array<i32>} : memref<1x18x16x128xf32, #tpu.memory_space<vmem>>, vector<1x1x16x128xf32>,
    %c0_3 = arith.constant 0 : index
    %c17 = arith.constant 17 : index
    %c0_4 = arith.constant 0 : index
    %c0_5 = arith.constant 0 : index
    %3 = vector.load %arg14[%c0_3, %c17, %c0_4, %c0_5] : memref<1x18x16x128xf32, #tpu.memory_space<vmem>>, vector<1x1x16x128xf32>
    tpu.vector_store %arg14[%c0_3, %c17, %c0_4, %c0_5], %1 {strides = array<i32>} : memref<1x18x16x128xf32, #tpu.memory_space<vmem>>, vector<1x1x16x128xf32>,
    %c0_6 = arith.constant 0 : index
    %c0_7 = arith.constant 0 : index
    %4 = vector.load %arg3[%c0_6, %c0_7] : memref<32x128xf32, #tpu.memory_space<vmem>>, vector<32x128xf32>
    %c0_8 = arith.constant 0 : index
    %c0_9 = arith.constant 0 : index
    %5 = vector.load %arg4[%c0_8, %c0_9] : memref<1x128xf32, #tpu.memory_space<vmem>>, vector<1x128xf32>
    %c0_10 = arith.constant 0 : index
    %c0_11 = arith.constant 0 : index
    %c0_12 = arith.constant 0 : index
    %c0_13 = arith.constant 0 : index
    %6 = vector.load %arg2[%c0_10, %c0_11, %c0_12, %c0_13] : memref<1x16x16x32xf32, #tpu.memory_space<vmem>>, vector<1x8x16x32xf32>
    %7 = vector.shape_cast %6 : vector<1x8x16x32xf32> to vector<128x32xf32>
    %cst_14 = arith.constant dense<0.000000e+00> : vector<128x128xf32>
    %8 = tpu.matmul %7, %4, %cst_14 {dimension_numbers = #tpu.dot_dimension_numbers<[1], [0], [0], [1], [0, 0, 1, 1], [], []>} : vector<128x32xf32>, vector<32x128xf32>, vector<128x128xf32> -> vector<128x128xf32>
    %9 = vector.broadcast %5 : vector<1x128xf32> to vector<128x128xf32>
    %10 = arith.addf %8, %9 : vector<128x128xf32>
    %11 = arith.negf %10 : vector<128x128xf32>
    %12 = math.exp %11 : vector<128x128xf32>
    %cst_15 = arith.constant 1.000000e+00 : f32
    %13 = vector.broadcast %cst_15 : f32 to vector<128x128xf32>
    %14 = arith.addf %13, %12 : vector<128x128xf32>
    %15 = arith.divf %13, %14 : vector<128x128xf32>
    %16 = arith.mulf %10, %15 : vector<128x128xf32>
    %17 = vector.shape_cast %16 : vector<128x128xf32> to vector<1x8x16x128xf32>
    %c0_16 = arith.constant 0 : index
    %c1 = arith.constant 1 : index
    %c0_17 = arith.constant 0 : index
    %c0_18 = arith.constant 0 : index
    %18 = vector.load %arg14[%c0_16, %c1, %c0_17, %c0_18] : memref<1x18x16x128xf32, #tpu.memory_space<vmem>>, vector<1x8x16x128xf32>
    tpu.vector_store %arg14[%c0_16, %c1, %c0_17, %c0_18], %17 {strides = array<i32>} : memref<1x18x16x128xf32, #tpu.memory_space<vmem>>, vector<1x8x16x128xf32>,
    %c0_19 = arith.constant 0 : index
    %c8 = arith.constant 8 : index
    %c0_20 = arith.constant 0 : index
    %c0_21 = arith.constant 0 : index
    %19 = vector.load %arg2[%c0_19, %c8, %c0_20, %c0_21] : memref<1x16x16x32xf32, #tpu.memory_space<vmem>>, vector<1x8x16x32xf32>
    %20 = vector.shape_cast %19 : vector<1x8x16x32xf32> to vector<128x32xf32>
    %cst_22 = arith.constant dense<0.000000e+00> : vector<128x128xf32>
    %21 = tpu.matmul %20, %4, %cst_22 {dimension_numbers = #tpu.dot_dimension_numbers<[1], [0], [0], [1], [0, 0, 1, 1], [], []>} : vector<128x32xf32>, vector<32x128xf32>, vector<128x128xf32> -> vector<128x128xf32>
    %22 = vector.broadcast %5 : vector<1x128xf32> to vector<128x128xf32>
    %23 = arith.addf %21, %22 : vector<128x128xf32>
    %24 = arith.negf %23 : vector<128x128xf32>
    %25 = math.exp %24 : vector<128x128xf32>
    %cst_23 = arith.constant 1.000000e+00 : f32
    %26 = vector.broadcast %cst_23 : f32 to vector<128x128xf32>
    %27 = arith.addf %26, %25 : vector<128x128xf32>
    %28 = arith.divf %26, %27 : vector<128x128xf32>
    %29 = arith.mulf %23, %28 : vector<128x128xf32>
    %30 = vector.shape_cast %29 : vector<128x128xf32> to vector<1x8x16x128xf32>
    %c0_24 = arith.constant 0 : index
    %c9 = arith.constant 9 : index
    %c0_25 = arith.constant 0 : index
    %c0_26 = arith.constant 0 : index
    %31 = vector.load %arg14[%c0_24, %c9, %c0_25, %c0_26] : memref<1x18x16x128xf32, #tpu.memory_space<vmem>>, vector<1x8x16x128xf32>
    tpu.vector_store %arg14[%c0_24, %c9, %c0_25, %c0_26], %30 {strides = array<i32>} : memref<1x18x16x128xf32, #tpu.memory_space<vmem>>, vector<1x8x16x128xf32>,
    %c0_27 = arith.constant 0 : index
    %c0_28 = arith.constant 0 : index
    %32 = vector.load %arg5[%c0_27, %c0_28] : memref<9x128xf32, #tpu.memory_space<vmem>>, vector<9x128xf32>
    %c0_29 = arith.constant 0 : index
    %c0_30 = arith.constant 0 : index
    %33 = vector.load %arg6[%c0_29, %c0_30] : memref<1x128xf32, #tpu.memory_space<vmem>>, vector<1x128xf32>
    %34 = vector.shape_cast %33 : vector<1x128xf32> to vector<1x1x1x128xf32>
    %35 = tpu.iota {dimensions = array<i32: 2>} : vector<1x1x16x128xi32>
    %cst_31 = arith.constant 0.000000e+00 : f32
    %36 = vector.broadcast %cst_31 : f32 to vector<1x128xf32>
    %c0_32 = arith.constant 0 : index
    %c0_33 = arith.constant 0 : index
    %c0_34 = arith.constant 0 : index
    %c0_35 = arith.constant 0 : index
    %37 = vector.load %arg14[%c0_32, %c0_33, %c0_34, %c0_35] : memref<1x18x16x128xf32, #tpu.memory_space<vmem>>, vector<1x6x16x128xf32>
    %cst_36 = arith.constant 0.000000e+00 : f32
    %38 = vector.broadcast %cst_36 : f32 to vector<1x4x16x128xf32>
    %39 = vector.extract_strided_slice %37 {offsets = [0, 0, 0, 0], sizes = [1, 4, 16, 128], strides = [1, 1, 1, 1]} : vector<1x6x16x128xf32> to vector<1x4x16x128xf32>
    %40 = vector.extract_strided_slice %32 {offsets = [0, 0], sizes = [1, 128], strides = [1, 1]} : vector<9x128xf32> to vector<1x128xf32>
    %41 = vector.shape_cast %40 : vector<1x128xf32> to vector<128xf32>
    %42 = vector.shape_cast %41 : vector<128xf32> to vector<1x1x1x128xf32>
    %c1_i32_37 = arith.constant 1 : i32
    %43 = tpu.dynamic_rotate %39 by %c1_i32_37 dim 2 : vector<1x4x16x128xf32>, i32 -> vector<1x4x16x128xf32>
    %c1_i32_38 = arith.constant 1 : i32
    %44 = vector.broadcast %c1_i32_38 : i32 to vector<1x1x16x128xi32>
    %45 = arith.cmpi sge, %35, %44 : vector<1x1x16x128xi32>
    %cst_39 = arith.constant 0.000000e+00 : f32
    %46 = vector.shape_cast %45 : vector<1x1x16x128xi1> to vector<1x1x16x128xi1>
    %47 = vector.broadcast %46 : vector<1x1x16x128xi1> to vector<1x4x16x128xi1>
    %48 = vector.broadcast %cst_39 : f32 to vector<1x4x16x128xf32>
    %49 = arith.select %47, %43, %48 : vector<1x4x16x128xi1>, vector<1x4x16x128xf32>
    %50 = vector.broadcast %42 : vector<1x1x1x128xf32> to vector<1x4x16x128xf32>
    %51 = arith.mulf %49, %50 : vector<1x4x16x128xf32>
    %52 = arith.addf %38, %51 : vector<1x4x16x128xf32>
    %53 = vector.extract_strided_slice %32 {offsets = [1, 0], sizes = [1, 128], strides = [1, 1]} : vector<9x128xf32> to vector<1x128xf32>
    %54 = vector.shape_cast %53 : vector<1x128xf32> to vector<128xf32>
    %55 = vector.shape_cast %54 : vector<128xf32> to vector<1x1x1x128xf32>
    %56 = vector.broadcast %55 : vector<1x1x1x128xf32> to vector<1x4x16x128xf32>
    %57 = arith.mulf %39, %56 : vector<1x4x16x128xf32>
    %58 = arith.addf %52, %57 : vector<1x4x16x128xf32>
    %59 = vector.extract_strided_slice %32 {offsets = [2, 0], sizes = [1, 128], strides = [1, 1]} : vector<9x128xf32> to vector<1x128xf32>
    %60 = vector.shape_cast %59 : vector<1x128xf32> to vector<128xf32>
    %61 = vector.shape_cast %60 : vector<128xf32> to vector<1x1x1x128xf32>
    %c15_i32 = arith.constant 15 : i32
    %62 = tpu.dynamic_rotate %39 by %c15_i32 dim 2 : vector<1x4x16x128xf32>, i32 -> vector<1x4x16x128xf32>
    %c15_i32_40 = arith.constant 15 : i32
    %63 = vector.broadcast %c15_i32_40 : i32 to vector<1x1x16x128xi32>
    %64 = arith.cmpi slt, %35, %63 : vector<1x1x16x128xi32>
    %cst_41 = arith.constant 0.000000e+00 : f32
    %65 = vector.shape_cast %64 : vector<1x1x16x128xi1> to vector<1x1x16x128xi1>
    %66 = vector.broadcast %65 : vector<1x1x16x128xi1> to vector<1x4x16x128xi1>
    %67 = vector.broadcast %cst_41 : f32 to vector<1x4x16x128xf32>
    %68 = arith.select %66, %62, %67 : vector<1x4x16x128xi1>, vector<1x4x16x128xf32>
    %69 = vector.broadcast %61 : vector<1x1x1x128xf32> to vector<1x4x16x128xf32>
    %70 = arith.mulf %68, %69 : vector<1x4x16x128xf32>
    %71 = arith.addf %58, %70 : vector<1x4x16x128xf32>
    %72 = vector.extract_strided_slice %37 {offsets = [0, 1, 0, 0], sizes = [1, 4, 16, 128], strides = [1, 1, 1, 1]} : vector<1x6x16x128xf32> to vector<1x4x16x128xf32>
    %73 = vector.extract_strided_slice %32 {offsets = [3, 0], sizes = [1, 128], strides = [1, 1]} : vector<9x128xf32> to vector<1x128xf32>
    %74 = vector.shape_cast %73 : vector<1x128xf32> to vector<128xf32>
    %75 = vector.shape_cast %74 : vector<128xf32> to vector<1x1x1x128xf32>
    %c1_i32_42 = arith.constant 1 : i32
    %76 = tpu.dynamic_rotate %72 by %c1_i32_42 dim 2 : vector<1x4x16x128xf32>, i32 -> vector<1x4x16x128xf32>
    %c1_i32_43 = arith.constant 1 : i32
    %77 = vector.broadcast %c1_i32_43 : i32 to vector<1x1x16x128xi32>
    %78 = arith.cmpi sge, %35, %77 : vector<1x1x16x128xi32>
    %cst_44 = arith.constant 0.000000e+00 : f32
    %79 = vector.shape_cast %78 : vector<1x1x16x128xi1> to vector<1x1x16x128xi1>
    %80 = vector.broadcast %79 : vector<1x1x16x128xi1> to vector<1x4x16x128xi1>
    %81 = vector.broadcast %cst_44 : f32 to vector<1x4x16x128xf32>
    %82 = arith.select %80, %76, %81 : vector<1x4x16x128xi1>, vector<1x4x16x128xf32>
    %83 = vector.broadcast %75 : vector<1x1x1x128xf32> to vector<1x4x16x128xf32>
    %84 = arith.mulf %82, %83 : vector<1x4x16x128xf32>
    %85 = arith.addf %71, %84 : vector<1x4x16x128xf32>
    %86 = vector.extract_strided_slice %32 {offsets = [4, 0], sizes = [1, 128], strides = [1, 1]} : vector<9x128xf32> to vector<1x128xf32>
    %87 = vector.shape_cast %86 : vector<1x128xf32> to vector<128xf32>
    %88 = vector.shape_cast %87 : vector<128xf32> to vector<1x1x1x128xf32>
    %89 = vector.broadcast %88 : vector<1x1x1x128xf32> to vector<1x4x16x128xf32>
    %90 = arith.mulf %72, %89 : vector<1x4x16x128xf32>
    %91 = arith.addf %85, %90 : vector<1x4x16x128xf32>
    %92 = vector.extract_strided_slice %32 {offsets = [5, 0], sizes = [1, 128], strides = [1, 1]} : vector<9x128xf32> to vector<1x128xf32>
    %93 = vector.shape_cast %92 : vector<1x128xf32> to vector<128xf32>
    %94 = vector.shape_cast %93 : vector<128xf32> to vector<1x1x1x128xf32>
    %c15_i32_45 = arith.constant 15 : i32
    %95 = tpu.dynamic_rotate %72 by %c15_i32_45 dim 2 : vector<1x4x16x128xf32>, i32 -> vector<1x4x16x128xf32>
    %c15_i32_46 = arith.constant 15 : i32
    %96 = vector.broadcast %c15_i32_46 : i32 to vector<1x1x16x128xi32>
    %97 = arith.cmpi slt, %35, %96 : vector<1x1x16x128xi32>
    %cst_47 = arith.constant 0.000000e+00 : f32
    %98 = vector.shape_cast %97 : vector<1x1x16x128xi1> to vector<1x1x16x128xi1>
    %99 = vector.broadcast %98 : vector<1x1x16x128xi1> to vector<1x4x16x128xi1>
    %100 = vector.broadcast %cst_47 : f32 to vector<1x4x16x128xf32>
    %101 = arith.select %99, %95, %100 : vector<1x4x16x128xi1>, vector<1x4x16x128xf32>
    %102 = vector.broadcast %94 : vector<1x1x1x128xf32> to vector<1x4x16x128xf32>
    %103 = arith.mulf %101, %102 : vector<1x4x16x128xf32>
    %104 = arith.addf %91, %103 : vector<1x4x16x128xf32>
    %105 = vector.extract_strided_slice %37 {offsets = [0, 2, 0, 0], sizes = [1, 4, 16, 128], strides = [1, 1, 1, 1]} : vector<1x6x16x128xf32> to vector<1x4x16x128xf32>
    %106 = vector.extract_strided_slice %32 {offsets = [6, 0], sizes = [1, 128], strides = [1, 1]} : vector<9x128xf32> to vector<1x128xf32>
    %107 = vector.shape_cast %106 : vector<1x128xf32> to vector<128xf32>
    %108 = vector.shape_cast %107 : vector<128xf32> to vector<1x1x1x128xf32>
    %c1_i32_48 = arith.constant 1 : i32
    %109 = tpu.dynamic_rotate %105 by %c1_i32_48 dim 2 : vector<1x4x16x128xf32>, i32 -> vector<1x4x16x128xf32>
    %c1_i32_49 = arith.constant 1 : i32
    %110 = vector.broadcast %c1_i32_49 : i32 to vector<1x1x16x128xi32>
    %111 = arith.cmpi sge, %35, %110 : vector<1x1x16x128xi32>
    %cst_50 = arith.constant 0.000000e+00 : f32
    %112 = vector.shape_cast %111 : vector<1x1x16x128xi1> to vector<1x1x16x128xi1>
    %113 = vector.broadcast %112 : vector<1x1x16x128xi1> to vector<1x4x16x128xi1>
    %114 = vector.broadcast %cst_50 : f32 to vector<1x4x16x128xf32>
    %115 = arith.select %113, %109, %114 : vector<1x4x16x128xi1>, vector<1x4x16x128xf32>
    %116 = vector.broadcast %108 : vector<1x1x1x128xf32> to vector<1x4x16x128xf32>
    %117 = arith.mulf %115, %116 : vector<1x4x16x128xf32>
    %118 = arith.addf %104, %117 : vector<1x4x16x128xf32>
    %119 = vector.extract_strided_slice %32 {offsets = [7, 0], sizes = [1, 128], strides = [1, 1]} : vector<9x128xf32> to vector<1x128xf32>
    %120 = vector.shape_cast %119 : vector<1x128xf32> to vector<128xf32>
    %121 = vector.shape_cast %120 : vector<128xf32> to vector<1x1x1x128xf32>
    %122 = vector.broadcast %121 : vector<1x1x1x128xf32> to vector<1x4x16x128xf32>
    %123 = arith.mulf %105, %122 : vector<1x4x16x128xf32>
    %124 = arith.addf %118, %123 : vector<1x4x16x128xf32>
    %125 = vector.extract_strided_slice %32 {offsets = [8, 0], sizes = [1, 128], strides = [1, 1]} : vector<9x128xf32> to vector<1x128xf32>
    %126 = vector.shape_cast %125 : vector<1x128xf32> to vector<128xf32>
    %127 = vector.shape_cast %126 : vector<128xf32> to vector<1x1x1x128xf32>
    %c15_i32_51 = arith.constant 15 : i32
    %128 = tpu.dynamic_rotate %105 by %c15_i32_51 dim 2 : vector<1x4x16x128xf32>, i32 -> vector<1x4x16x128xf32>
    %c15_i32_52 = arith.constant 15 : i32
    %129 = vector.broadcast %c15_i32_52 : i32 to vector<1x1x16x128xi32>
    %130 = arith.cmpi slt, %35, %129 : vector<1x1x16x128xi32>
    %cst_53 = arith.constant 0.000000e+00 : f32
    %131 = vector.shape_cast %130 : vector<1x1x16x128xi1> to vector<1x1x16x128xi1>
    %132 = vector.broadcast %131 : vector<1x1x16x128xi1> to vector<1x4x16x128xi1>
    %133 = vector.broadcast %cst_53 : f32 to vector<1x4x16x128xf32>
    %134 = arith.select %132, %128, %133 : vector<1x4x16x128xi1>, vector<1x4x16x128xf32>
    %135 = vector.broadcast %127 : vector<1x1x1x128xf32> to vector<1x4x16x128xf32>
    %136 = arith.mulf %134, %135 : vector<1x4x16x128xf32>
    %137 = arith.addf %124, %136 : vector<1x4x16x128xf32>
    %138 = vector.broadcast %34 : vector<1x1x1x128xf32> to vector<1x4x16x128xf32>
    %139 = arith.addf %137, %138 : vector<1x4x16x128xf32>
    %140 = arith.negf %139 : vector<1x4x16x128xf32>
    %141 = math.exp %140 : vector<1x4x16x128xf32>
    %cst_54 = arith.constant 1.000000e+00 : f32
    %142 = vector.broadcast %cst_54 : f32 to vector<1x4x16x128xf32>
    %143 = arith.addf %142, %141 : vector<1x4x16x128xf32>
    %144 = arith.divf %142, %143 : vector<1x4x16x128xf32>
    %145 = arith.mulf %139, %144 : vector<1x4x16x128xf32>
    %c0_55 = arith.constant 0 : index
    %c0_56 = arith.constant 0 : index
    %c0_57 = arith.constant 0 : index
    %c0_58 = arith.constant 0 : index
    %146 = vector.load %arg15[%c0_55, %c0_56, %c0_57, %c0_58] : memref<1x16x16x128xf32, #tpu.memory_space<vmem>>, vector<1x4x16x128xf32>
    tpu.vector_store %arg15[%c0_55, %c0_56, %c0_57, %c0_58], %145 {strides = array<i32>} : memref<1x16x16x128xf32, #tpu.memory_space<vmem>>, vector<1x4x16x128xf32>,
    %cst_59 = arith.constant dense<0.000000e+00> : vector<1x128xf32>
    %147 = vector.multi_reduction <add>, %145, %cst_59 [1, 2] : vector<1x4x16x128xf32> to vector<1x128xf32>
    %148 = arith.addf %36, %147 : vector<1x128xf32>
    %c0_60 = arith.constant 0 : index
    %c4 = arith.constant 4 : index
    %c0_61 = arith.constant 0 : index
    %c0_62 = arith.constant 0 : index
    %149 = vector.load %arg14[%c0_60, %c4, %c0_61, %c0_62] : memref<1x18x16x128xf32, #tpu.memory_space<vmem>>, vector<1x6x16x128xf32>
    %cst_63 = arith.constant 0.000000e+00 : f32
    %150 = vector.broadcast %cst_63 : f32 to vector<1x4x16x128xf32>
    %151 = vector.extract_strided_slice %149 {offsets = [0, 0, 0, 0], sizes = [1, 4, 16, 128], strides = [1, 1, 1, 1]} : vector<1x6x16x128xf32> to vector<1x4x16x128xf32>
    %152 = vector.extract_strided_slice %32 {offsets = [0, 0], sizes = [1, 128], strides = [1, 1]} : vector<9x128xf32> to vector<1x128xf32>
    %153 = vector.shape_cast %152 : vector<1x128xf32> to vector<128xf32>
    %154 = vector.shape_cast %153 : vector<128xf32> to vector<1x1x1x128xf32>
    %c1_i32_64 = arith.constant 1 : i32
    %155 = tpu.dynamic_rotate %151 by %c1_i32_64 dim 2 : vector<1x4x16x128xf32>, i32 -> vector<1x4x16x128xf32>
    %c1_i32_65 = arith.constant 1 : i32
    %156 = vector.broadcast %c1_i32_65 : i32 to vector<1x1x16x128xi32>
    %157 = arith.cmpi sge, %35, %156 : vector<1x1x16x128xi32>
    %cst_66 = arith.constant 0.000000e+00 : f32
    %158 = vector.shape_cast %157 : vector<1x1x16x128xi1> to vector<1x1x16x128xi1>
    %159 = vector.broadcast %158 : vector<1x1x16x128xi1> to vector<1x4x16x128xi1>
    %160 = vector.broadcast %cst_66 : f32 to vector<1x4x16x128xf32>
    %161 = arith.select %159, %155, %160 : vector<1x4x16x128xi1>, vector<1x4x16x128xf32>
    %162 = vector.broadcast %154 : vector<1x1x1x128xf32> to vector<1x4x16x128xf32>
    %163 = arith.mulf %161, %162 : vector<1x4x16x128xf32>
    %164 = arith.addf %150, %163 : vector<1x4x16x128xf32>
    %165 = vector.extract_strided_slice %32 {offsets = [1, 0], sizes = [1, 128], strides = [1, 1]} : vector<9x128xf32> to vector<1x128xf32>
    %166 = vector.shape_cast %165 : vector<1x128xf32> to vector<128xf32>
    %167 = vector.shape_cast %166 : vector<128xf32> to vector<1x1x1x128xf32>
    %168 = vector.broadcast %167 : vector<1x1x1x128xf32> to vector<1x4x16x128xf32>
    %169 = arith.mulf %151, %168 : vector<1x4x16x128xf32>
    %170 = arith.addf %164, %169 : vector<1x4x16x128xf32>
    %171 = vector.extract_strided_slice %32 {offsets = [2, 0], sizes = [1, 128], strides = [1, 1]} : vector<9x128xf32> to vector<1x128xf32>
    %172 = vector.shape_cast %171 : vector<1x128xf32> to vector<128xf32>
    %173 = vector.shape_cast %172 : vector<128xf32> to vector<1x1x1x128xf32>
    %c15_i32_67 = arith.constant 15 : i32
    %174 = tpu.dynamic_rotate %151 by %c15_i32_67 dim 2 : vector<1x4x16x128xf32>, i32 -> vector<1x4x16x128xf32>
    %c15_i32_68 = arith.constant 15 : i32
    %175 = vector.broadcast %c15_i32_68 : i32 to vector<1x1x16x128xi32>
    %176 = arith.cmpi slt, %35, %175 : vector<1x1x16x128xi32>
    %cst_69 = arith.constant 0.000000e+00 : f32
    %177 = vector.shape_cast %176 : vector<1x1x16x128xi1> to vector<1x1x16x128xi1>
    %178 = vector.broadcast %177 : vector<1x1x16x128xi1> to vector<1x4x16x128xi1>
    %179 = vector.broadcast %cst_69 : f32 to vector<1x4x16x128xf32>
    %180 = arith.select %178, %174, %179 : vector<1x4x16x128xi1>, vector<1x4x16x128xf32>
    %181 = vector.broadcast %173 : vector<1x1x1x128xf32> to vector<1x4x16x128xf32>
    %182 = arith.mulf %180, %181 : vector<1x4x16x128xf32>
    %183 = arith.addf %170, %182 : vector<1x4x16x128xf32>
    %184 = vector.extract_strided_slice %149 {offsets = [0, 1, 0, 0], sizes = [1, 4, 16, 128], strides = [1, 1, 1, 1]} : vector<1x6x16x128xf32> to vector<1x4x16x128xf32>
    %185 = vector.extract_strided_slice %32 {offsets = [3, 0], sizes = [1, 128], strides = [1, 1]} : vector<9x128xf32> to vector<1x128xf32>
    %186 = vector.shape_cast %185 : vector<1x128xf32> to vector<128xf32>
    %187 = vector.shape_cast %186 : vector<128xf32> to vector<1x1x1x128xf32>
    %c1_i32_70 = arith.constant 1 : i32
    %188 = tpu.dynamic_rotate %184 by %c1_i32_70 dim 2 : vector<1x4x16x128xf32>, i32 -> vector<1x4x16x128xf32>
    %c1_i32_71 = arith.constant 1 : i32
    %189 = vector.broadcast %c1_i32_71 : i32 to vector<1x1x16x128xi32>
    %190 = arith.cmpi sge, %35, %189 : vector<1x1x16x128xi32>
    %cst_72 = arith.constant 0.000000e+00 : f32
    %191 = vector.shape_cast %190 : vector<1x1x16x128xi1> to vector<1x1x16x128xi1>
    %192 = vector.broadcast %191 : vector<1x1x16x128xi1> to vector<1x4x16x128xi1>
    %193 = vector.broadcast %cst_72 : f32 to vector<1x4x16x128xf32>
    %194 = arith.select %192, %188, %193 : vector<1x4x16x128xi1>, vector<1x4x16x128xf32>
    %195 = vector.broadcast %187 : vector<1x1x1x128xf32> to vector<1x4x16x128xf32>
    %196 = arith.mulf %194, %195 : vector<1x4x16x128xf32>
    %197 = arith.addf %183, %196 : vector<1x4x16x128xf32>
    %198 = vector.extract_strided_slice %32 {offsets = [4, 0], sizes = [1, 128], strides = [1, 1]} : vector<9x128xf32> to vector<1x128xf32>
    %199 = vector.shape_cast %198 : vector<1x128xf32> to vector<128xf32>
    %200 = vector.shape_cast %199 : vector<128xf32> to vector<1x1x1x128xf32>
    %201 = vector.broadcast %200 : vector<1x1x1x128xf32> to vector<1x4x16x128xf32>
    %202 = arith.mulf %184, %201 : vector<1x4x16x128xf32>
    %203 = arith.addf %197, %202 : vector<1x4x16x128xf32>
    %204 = vector.extract_strided_slice %32 {offsets = [5, 0], sizes = [1, 128], strides = [1, 1]} : vector<9x128xf32> to vector<1x128xf32>
    %205 = vector.shape_cast %204 : vector<1x128xf32> to vector<128xf32>
    %206 = vector.shape_cast %205 : vector<128xf32> to vector<1x1x1x128xf32>
    %c15_i32_73 = arith.constant 15 : i32
    %207 = tpu.dynamic_rotate %184 by %c15_i32_73 dim 2 : vector<1x4x16x128xf32>, i32 -> vector<1x4x16x128xf32>
    %c15_i32_74 = arith.constant 15 : i32
    %208 = vector.broadcast %c15_i32_74 : i32 to vector<1x1x16x128xi32>
    %209 = arith.cmpi slt, %35, %208 : vector<1x1x16x128xi32>
    %cst_75 = arith.constant 0.000000e+00 : f32
    %210 = vector.shape_cast %209 : vector<1x1x16x128xi1> to vector<1x1x16x128xi1>
    %211 = vector.broadcast %210 : vector<1x1x16x128xi1> to vector<1x4x16x128xi1>
    %212 = vector.broadcast %cst_75 : f32 to vector<1x4x16x128xf32>
    %213 = arith.select %211, %207, %212 : vector<1x4x16x128xi1>, vector<1x4x16x128xf32>
    %214 = vector.broadcast %206 : vector<1x1x1x128xf32> to vector<1x4x16x128xf32>
    %215 = arith.mulf %213, %214 : vector<1x4x16x128xf32>
    %216 = arith.addf %203, %215 : vector<1x4x16x128xf32>
    %217 = vector.extract_strided_slice %149 {offsets = [0, 2, 0, 0], sizes = [1, 4, 16, 128], strides = [1, 1, 1, 1]} : vector<1x6x16x128xf32> to vector<1x4x16x128xf32>
    %218 = vector.extract_strided_slice %32 {offsets = [6, 0], sizes = [1, 128], strides = [1, 1]} : vector<9x128xf32> to vector<1x128xf32>
    %219 = vector.shape_cast %218 : vector<1x128xf32> to vector<128xf32>
    %220 = vector.shape_cast %219 : vector<128xf32> to vector<1x1x1x128xf32>
    %c1_i32_76 = arith.constant 1 : i32
    %221 = tpu.dynamic_rotate %217 by %c1_i32_76 dim 2 : vector<1x4x16x128xf32>, i32 -> vector<1x4x16x128xf32>
    %c1_i32_77 = arith.constant 1 : i32
    %222 = vector.broadcast %c1_i32_77 : i32 to vector<1x1x16x128xi32>
    %223 = arith.cmpi sge, %35, %222 : vector<1x1x16x128xi32>
    %cst_78 = arith.constant 0.000000e+00 : f32
    %224 = vector.shape_cast %223 : vector<1x1x16x128xi1> to vector<1x1x16x128xi1>
    %225 = vector.broadcast %224 : vector<1x1x16x128xi1> to vector<1x4x16x128xi1>
    %226 = vector.broadcast %cst_78 : f32 to vector<1x4x16x128xf32>
    %227 = arith.select %225, %221, %226 : vector<1x4x16x128xi1>, vector<1x4x16x128xf32>
    %228 = vector.broadcast %220 : vector<1x1x1x128xf32> to vector<1x4x16x128xf32>
    %229 = arith.mulf %227, %228 : vector<1x4x16x128xf32>
    %230 = arith.addf %216, %229 : vector<1x4x16x128xf32>
    %231 = vector.extract_strided_slice %32 {offsets = [7, 0], sizes = [1, 128], strides = [1, 1]} : vector<9x128xf32> to vector<1x128xf32>
    %232 = vector.shape_cast %231 : vector<1x128xf32> to vector<128xf32>
    %233 = vector.shape_cast %232 : vector<128xf32> to vector<1x1x1x128xf32>
    %234 = vector.broadcast %233 : vector<1x1x1x128xf32> to vector<1x4x16x128xf32>
    %235 = arith.mulf %217, %234 : vector<1x4x16x128xf32>
    %236 = arith.addf %230, %235 : vector<1x4x16x128xf32>
    %237 = vector.extract_strided_slice %32 {offsets = [8, 0], sizes = [1, 128], strides = [1, 1]} : vector<9x128xf32> to vector<1x128xf32>
    %238 = vector.shape_cast %237 : vector<1x128xf32> to vector<128xf32>
    %239 = vector.shape_cast %238 : vector<128xf32> to vector<1x1x1x128xf32>
    %c15_i32_79 = arith.constant 15 : i32
    %240 = tpu.dynamic_rotate %217 by %c15_i32_79 dim 2 : vector<1x4x16x128xf32>, i32 -> vector<1x4x16x128xf32>
    %c15_i32_80 = arith.constant 15 : i32
    %241 = vector.broadcast %c15_i32_80 : i32 to vector<1x1x16x128xi32>
    %242 = arith.cmpi slt, %35, %241 : vector<1x1x16x128xi32>
    %cst_81 = arith.constant 0.000000e+00 : f32
    %243 = vector.shape_cast %242 : vector<1x1x16x128xi1> to vector<1x1x16x128xi1>
    %244 = vector.broadcast %243 : vector<1x1x16x128xi1> to vector<1x4x16x128xi1>
    %245 = vector.broadcast %cst_81 : f32 to vector<1x4x16x128xf32>
    %246 = arith.select %244, %240, %245 : vector<1x4x16x128xi1>, vector<1x4x16x128xf32>
    %247 = vector.broadcast %239 : vector<1x1x1x128xf32> to vector<1x4x16x128xf32>
    %248 = arith.mulf %246, %247 : vector<1x4x16x128xf32>
    %249 = arith.addf %236, %248 : vector<1x4x16x128xf32>
    %250 = vector.broadcast %34 : vector<1x1x1x128xf32> to vector<1x4x16x128xf32>
    %251 = arith.addf %249, %250 : vector<1x4x16x128xf32>
    %252 = arith.negf %251 : vector<1x4x16x128xf32>
    %253 = math.exp %252 : vector<1x4x16x128xf32>
    %cst_82 = arith.constant 1.000000e+00 : f32
    %254 = vector.broadcast %cst_82 : f32 to vector<1x4x16x128xf32>
    %255 = arith.addf %254, %253 : vector<1x4x16x128xf32>
    %256 = arith.divf %254, %255 : vector<1x4x16x128xf32>
    %257 = arith.mulf %251, %256 : vector<1x4x16x128xf32>
    %c0_83 = arith.constant 0 : index
    %c4_84 = arith.constant 4 : index
    %c0_85 = arith.constant 0 : index
    %c0_86 = arith.constant 0 : index
    %258 = vector.load %arg15[%c0_83, %c4_84, %c0_85, %c0_86] : memref<1x16x16x128xf32, #tpu.memory_space<vmem>>, vector<1x4x16x128xf32>
    tpu.vector_store %arg15[%c0_83, %c4_84, %c0_85, %c0_86], %257 {strides = array<i32>} : memref<1x16x16x128xf32, #tpu.memory_space<vmem>>, vector<1x4x16x128xf32>,
    %cst_87 = arith.constant dense<0.000000e+00> : vector<1x128xf32>
    %259 = vector.multi_reduction <add>, %257, %cst_87 [1, 2] : vector<1x4x16x128xf32> to vector<1x128xf32>
    %260 = arith.addf %148, %259 : vector<1x128xf32>
    %c0_88 = arith.constant 0 : index
    %c8_89 = arith.constant 8 : index
    %c0_90 = arith.constant 0 : index
    %c0_91 = arith.constant 0 : index
    %261 = vector.load %arg14[%c0_88, %c8_89, %c0_90, %c0_91] : memref<1x18x16x128xf32, #tpu.memory_space<vmem>>, vector<1x6x16x128xf32>
    %cst_92 = arith.constant 0.000000e+00 : f32
    %262 = vector.broadcast %cst_92 : f32 to vector<1x4x16x128xf32>
    %263 = vector.extract_strided_slice %261 {offsets = [0, 0, 0, 0], sizes = [1, 4, 16, 128], strides = [1, 1, 1, 1]} : vector<1x6x16x128xf32> to vector<1x4x16x128xf32>
    %264 = vector.extract_strided_slice %32 {offsets = [0, 0], sizes = [1, 128], strides = [1, 1]} : vector<9x128xf32> to vector<1x128xf32>
    %265 = vector.shape_cast %264 : vector<1x128xf32> to vector<128xf32>
    %266 = vector.shape_cast %265 : vector<128xf32> to vector<1x1x1x128xf32>
    %c1_i32_93 = arith.constant 1 : i32
    %267 = tpu.dynamic_rotate %263 by %c1_i32_93 dim 2 : vector<1x4x16x128xf32>, i32 -> vector<1x4x16x128xf32>
    %c1_i32_94 = arith.constant 1 : i32
    %268 = vector.broadcast %c1_i32_94 : i32 to vector<1x1x16x128xi32>
    %269 = arith.cmpi sge, %35, %268 : vector<1x1x16x128xi32>
    %cst_95 = arith.constant 0.000000e+00 : f32
    %270 = vector.shape_cast %269 : vector<1x1x16x128xi1> to vector<1x1x16x128xi1>
    %271 = vector.broadcast %270 : vector<1x1x16x128xi1> to vector<1x4x16x128xi1>
    %272 = vector.broadcast %cst_95 : f32 to vector<1x4x16x128xf32>
    %273 = arith.select %271, %267, %272 : vector<1x4x16x128xi1>, vector<1x4x16x128xf32>
    %274 = vector.broadcast %266 : vector<1x1x1x128xf32> to vector<1x4x16x128xf32>
    %275 = arith.mulf %273, %274 : vector<1x4x16x128xf32>
    %276 = arith.addf %262, %275 : vector<1x4x16x128xf32>
    %277 = vector.extract_strided_slice %32 {offsets = [1, 0], sizes = [1, 128], strides = [1, 1]} : vector<9x128xf32> to vector<1x128xf32>
    %278 = vector.shape_cast %277 : vector<1x128xf32> to vector<128xf32>
    %279 = vector.shape_cast %278 : vector<128xf32> to vector<1x1x1x128xf32>
    %280 = vector.broadcast %279 : vector<1x1x1x128xf32> to vector<1x4x16x128xf32>
    %281 = arith.mulf %263, %280 : vector<1x4x16x128xf32>
    %282 = arith.addf %276, %281 : vector<1x4x16x128xf32>
    %283 = vector.extract_strided_slice %32 {offsets = [2, 0], sizes = [1, 128], strides = [1, 1]} : vector<9x128xf32> to vector<1x128xf32>
    %284 = vector.shape_cast %283 : vector<1x128xf32> to vector<128xf32>
    %285 = vector.shape_cast %284 : vector<128xf32> to vector<1x1x1x128xf32>
    %c15_i32_96 = arith.constant 15 : i32
    %286 = tpu.dynamic_rotate %263 by %c15_i32_96 dim 2 : vector<1x4x16x128xf32>, i32 -> vector<1x4x16x128xf32>
    %c15_i32_97 = arith.constant 15 : i32
    %287 = vector.broadcast %c15_i32_97 : i32 to vector<1x1x16x128xi32>
    %288 = arith.cmpi slt, %35, %287 : vector<1x1x16x128xi32>
    %cst_98 = arith.constant 0.000000e+00 : f32
    %289 = vector.shape_cast %288 : vector<1x1x16x128xi1> to vector<1x1x16x128xi1>
    %290 = vector.broadcast %289 : vector<1x1x16x128xi1> to vector<1x4x16x128xi1>
    %291 = vector.broadcast %cst_98 : f32 to vector<1x4x16x128xf32>
    %292 = arith.select %290, %286, %291 : vector<1x4x16x128xi1>, vector<1x4x16x128xf32>
    %293 = vector.broadcast %285 : vector<1x1x1x128xf32> to vector<1x4x16x128xf32>
    %294 = arith.mulf %292, %293 : vector<1x4x16x128xf32>
    %295 = arith.addf %282, %294 : vector<1x4x16x128xf32>
    %296 = vector.extract_strided_slice %261 {offsets = [0, 1, 0, 0], sizes = [1, 4, 16, 128], strides = [1, 1, 1, 1]} : vector<1x6x16x128xf32> to vector<1x4x16x128xf32>
    %297 = vector.extract_strided_slice %32 {offsets = [3, 0], sizes = [1, 128], strides = [1, 1]} : vector<9x128xf32> to vector<1x128xf32>
    %298 = vector.shape_cast %297 : vector<1x128xf32> to vector<128xf32>
    %299 = vector.shape_cast %298 : vector<128xf32> to vector<1x1x1x128xf32>
    %c1_i32_99 = arith.constant 1 : i32
    %300 = tpu.dynamic_rotate %296 by %c1_i32_99 dim 2 : vector<1x4x16x128xf32>, i32 -> vector<1x4x16x128xf32>
    %c1_i32_100 = arith.constant 1 : i32
    %301 = vector.broadcast %c1_i32_100 : i32 to vector<1x1x16x128xi32>
    %302 = arith.cmpi sge, %35, %301 : vector<1x1x16x128xi32>
    %cst_101 = arith.constant 0.000000e+00 : f32
    %303 = vector.shape_cast %302 : vector<1x1x16x128xi1> to vector<1x1x16x128xi1>
    %304 = vector.broadcast %303 : vector<1x1x16x128xi1> to vector<1x4x16x128xi1>
    %305 = vector.broadcast %cst_101 : f32 to vector<1x4x16x128xf32>
    %306 = arith.select %304, %300, %305 : vector<1x4x16x128xi1>, vector<1x4x16x128xf32>
    %307 = vector.broadcast %299 : vector<1x1x1x128xf32> to vector<1x4x16x128xf32>
    %308 = arith.mulf %306, %307 : vector<1x4x16x128xf32>
    %309 = arith.addf %295, %308 : vector<1x4x16x128xf32>
    %310 = vector.extract_strided_slice %32 {offsets = [4, 0], sizes = [1, 128], strides = [1, 1]} : vector<9x128xf32> to vector<1x128xf32>
    %311 = vector.shape_cast %310 : vector<1x128xf32> to vector<128xf32>
    %312 = vector.shape_cast %311 : vector<128xf32> to vector<1x1x1x128xf32>
    %313 = vector.broadcast %312 : vector<1x1x1x128xf32> to vector<1x4x16x128xf32>
    %314 = arith.mulf %296, %313 : vector<1x4x16x128xf32>
    %315 = arith.addf %309, %314 : vector<1x4x16x128xf32>
    %316 = vector.extract_strided_slice %32 {offsets = [5, 0], sizes = [1, 128], strides = [1, 1]} : vector<9x128xf32> to vector<1x128xf32>
    %317 = vector.shape_cast %316 : vector<1x128xf32> to vector<128xf32>
    %318 = vector.shape_cast %317 : vector<128xf32> to vector<1x1x1x128xf32>
    %c15_i32_102 = arith.constant 15 : i32
    %319 = tpu.dynamic_rotate %296 by %c15_i32_102 dim 2 : vector<1x4x16x128xf32>, i32 -> vector<1x4x16x128xf32>
    %c15_i32_103 = arith.constant 15 : i32
    %320 = vector.broadcast %c15_i32_103 : i32 to vector<1x1x16x128xi32>
    %321 = arith.cmpi slt, %35, %320 : vector<1x1x16x128xi32>
    %cst_104 = arith.constant 0.000000e+00 : f32
    %322 = vector.shape_cast %321 : vector<1x1x16x128xi1> to vector<1x1x16x128xi1>
    %323 = vector.broadcast %322 : vector<1x1x16x128xi1> to vector<1x4x16x128xi1>
    %324 = vector.broadcast %cst_104 : f32 to vector<1x4x16x128xf32>
    %325 = arith.select %323, %319, %324 : vector<1x4x16x128xi1>, vector<1x4x16x128xf32>
    %326 = vector.broadcast %318 : vector<1x1x1x128xf32> to vector<1x4x16x128xf32>
    %327 = arith.mulf %325, %326 : vector<1x4x16x128xf32>
    %328 = arith.addf %315, %327 : vector<1x4x16x128xf32>
    %329 = vector.extract_strided_slice %261 {offsets = [0, 2, 0, 0], sizes = [1, 4, 16, 128], strides = [1, 1, 1, 1]} : vector<1x6x16x128xf32> to vector<1x4x16x128xf32>
    %330 = vector.extract_strided_slice %32 {offsets = [6, 0], sizes = [1, 128], strides = [1, 1]} : vector<9x128xf32> to vector<1x128xf32>
    %331 = vector.shape_cast %330 : vector<1x128xf32> to vector<128xf32>
    %332 = vector.shape_cast %331 : vector<128xf32> to vector<1x1x1x128xf32>
    %c1_i32_105 = arith.constant 1 : i32
    %333 = tpu.dynamic_rotate %329 by %c1_i32_105 dim 2 : vector<1x4x16x128xf32>, i32 -> vector<1x4x16x128xf32>
    %c1_i32_106 = arith.constant 1 : i32
    %334 = vector.broadcast %c1_i32_106 : i32 to vector<1x1x16x128xi32>
    %335 = arith.cmpi sge, %35, %334 : vector<1x1x16x128xi32>
    %cst_107 = arith.constant 0.000000e+00 : f32
    %336 = vector.shape_cast %335 : vector<1x1x16x128xi1> to vector<1x1x16x128xi1>
    %337 = vector.broadcast %336 : vector<1x1x16x128xi1> to vector<1x4x16x128xi1>
    %338 = vector.broadcast %cst_107 : f32 to vector<1x4x16x128xf32>
    %339 = arith.select %337, %333, %338 : vector<1x4x16x128xi1>, vector<1x4x16x128xf32>
    %340 = vector.broadcast %332 : vector<1x1x1x128xf32> to vector<1x4x16x128xf32>
    %341 = arith.mulf %339, %340 : vector<1x4x16x128xf32>
    %342 = arith.addf %328, %341 : vector<1x4x16x128xf32>
    %343 = vector.extract_strided_slice %32 {offsets = [7, 0], sizes = [1, 128], strides = [1, 1]} : vector<9x128xf32> to vector<1x128xf32>
    %344 = vector.shape_cast %343 : vector<1x128xf32> to vector<128xf32>
    %345 = vector.shape_cast %344 : vector<128xf32> to vector<1x1x1x128xf32>
    %346 = vector.broadcast %345 : vector<1x1x1x128xf32> to vector<1x4x16x128xf32>
    %347 = arith.mulf %329, %346 : vector<1x4x16x128xf32>
    %348 = arith.addf %342, %347 : vector<1x4x16x128xf32>
    %349 = vector.extract_strided_slice %32 {offsets = [8, 0], sizes = [1, 128], strides = [1, 1]} : vector<9x128xf32> to vector<1x128xf32>
    %350 = vector.shape_cast %349 : vector<1x128xf32> to vector<128xf32>
    %351 = vector.shape_cast %350 : vector<128xf32> to vector<1x1x1x128xf32>
    %c15_i32_108 = arith.constant 15 : i32
    %352 = tpu.dynamic_rotate %329 by %c15_i32_108 dim 2 : vector<1x4x16x128xf32>, i32 -> vector<1x4x16x128xf32>
    %c15_i32_109 = arith.constant 15 : i32
    %353 = vector.broadcast %c15_i32_109 : i32 to vector<1x1x16x128xi32>
    %354 = arith.cmpi slt, %35, %353 : vector<1x1x16x128xi32>
    %cst_110 = arith.constant 0.000000e+00 : f32
    %355 = vector.shape_cast %354 : vector<1x1x16x128xi1> to vector<1x1x16x128xi1>
    %356 = vector.broadcast %355 : vector<1x1x16x128xi1> to vector<1x4x16x128xi1>
    %357 = vector.broadcast %cst_110 : f32 to vector<1x4x16x128xf32>
    %358 = arith.select %356, %352, %357 : vector<1x4x16x128xi1>, vector<1x4x16x128xf32>
    %359 = vector.broadcast %351 : vector<1x1x1x128xf32> to vector<1x4x16x128xf32>
    %360 = arith.mulf %358, %359 : vector<1x4x16x128xf32>
    %361 = arith.addf %348, %360 : vector<1x4x16x128xf32>
    %362 = vector.broadcast %34 : vector<1x1x1x128xf32> to vector<1x4x16x128xf32>
    %363 = arith.addf %361, %362 : vector<1x4x16x128xf32>
    %364 = arith.negf %363 : vector<1x4x16x128xf32>
    %365 = math.exp %364 : vector<1x4x16x128xf32>
    %cst_111 = arith.constant 1.000000e+00 : f32
    %366 = vector.broadcast %cst_111 : f32 to vector<1x4x16x128xf32>
    %367 = arith.addf %366, %365 : vector<1x4x16x128xf32>
    %368 = arith.divf %366, %367 : vector<1x4x16x128xf32>
    %369 = arith.mulf %363, %368 : vector<1x4x16x128xf32>
    %c0_112 = arith.constant 0 : index
    %c8_113 = arith.constant 8 : index
    %c0_114 = arith.constant 0 : index
    %c0_115 = arith.constant 0 : index
    %370 = vector.load %arg15[%c0_112, %c8_113, %c0_114, %c0_115] : memref<1x16x16x128xf32, #tpu.memory_space<vmem>>, vector<1x4x16x128xf32>
    tpu.vector_store %arg15[%c0_112, %c8_113, %c0_114, %c0_115], %369 {strides = array<i32>} : memref<1x16x16x128xf32, #tpu.memory_space<vmem>>, vector<1x4x16x128xf32>,
    %cst_116 = arith.constant dense<0.000000e+00> : vector<1x128xf32>
    %371 = vector.multi_reduction <add>, %369, %cst_116 [1, 2] : vector<1x4x16x128xf32> to vector<1x128xf32>
    %372 = arith.addf %260, %371 : vector<1x128xf32>
    %c0_117 = arith.constant 0 : index
    %c12 = arith.constant 12 : index
    %c0_118 = arith.constant 0 : index
    %c0_119 = arith.constant 0 : index
    %373 = vector.load %arg14[%c0_117, %c12, %c0_118, %c0_119] : memref<1x18x16x128xf32, #tpu.memory_space<vmem>>, vector<1x6x16x128xf32>
    %cst_120 = arith.constant 0.000000e+00 : f32
    %374 = vector.broadcast %cst_120 : f32 to vector<1x4x16x128xf32>
    %375 = vector.extract_strided_slice %373 {offsets = [0, 0, 0, 0], sizes = [1, 4, 16, 128], strides = [1, 1, 1, 1]} : vector<1x6x16x128xf32> to vector<1x4x16x128xf32>
    %376 = vector.extract_strided_slice %32 {offsets = [0, 0], sizes = [1, 128], strides = [1, 1]} : vector<9x128xf32> to vector<1x128xf32>
    %377 = vector.shape_cast %376 : vector<1x128xf32> to vector<128xf32>
    %378 = vector.shape_cast %377 : vector<128xf32> to vector<1x1x1x128xf32>
    %c1_i32_121 = arith.constant 1 : i32
    %379 = tpu.dynamic_rotate %375 by %c1_i32_121 dim 2 : vector<1x4x16x128xf32>, i32 -> vector<1x4x16x128xf32>
    %c1_i32_122 = arith.constant 1 : i32
    %380 = vector.broadcast %c1_i32_122 : i32 to vector<1x1x16x128xi32>
    %381 = arith.cmpi sge, %35, %380 : vector<1x1x16x128xi32>
    %cst_123 = arith.constant 0.000000e+00 : f32
    %382 = vector.shape_cast %381 : vector<1x1x16x128xi1> to vector<1x1x16x128xi1>
    %383 = vector.broadcast %382 : vector<1x1x16x128xi1> to vector<1x4x16x128xi1>
    %384 = vector.broadcast %cst_123 : f32 to vector<1x4x16x128xf32>
    %385 = arith.select %383, %379, %384 : vector<1x4x16x128xi1>, vector<1x4x16x128xf32>
    %386 = vector.broadcast %378 : vector<1x1x1x128xf32> to vector<1x4x16x128xf32>
    %387 = arith.mulf %385, %386 : vector<1x4x16x128xf32>
    %388 = arith.addf %374, %387 : vector<1x4x16x128xf32>
    %389 = vector.extract_strided_slice %32 {offsets = [1, 0], sizes = [1, 128], strides = [1, 1]} : vector<9x128xf32> to vector<1x128xf32>
    %390 = vector.shape_cast %389 : vector<1x128xf32> to vector<128xf32>
    %391 = vector.shape_cast %390 : vector<128xf32> to vector<1x1x1x128xf32>
    %392 = vector.broadcast %391 : vector<1x1x1x128xf32> to vector<1x4x16x128xf32>
    %393 = arith.mulf %375, %392 : vector<1x4x16x128xf32>
    %394 = arith.addf %388, %393 : vector<1x4x16x128xf32>
    %395 = vector.extract_strided_slice %32 {offsets = [2, 0], sizes = [1, 128], strides = [1, 1]} : vector<9x128xf32> to vector<1x128xf32>
    %396 = vector.shape_cast %395 : vector<1x128xf32> to vector<128xf32>
    %397 = vector.shape_cast %396 : vector<128xf32> to vector<1x1x1x128xf32>
    %c15_i32_124 = arith.constant 15 : i32
    %398 = tpu.dynamic_rotate %375 by %c15_i32_124 dim 2 : vector<1x4x16x128xf32>, i32 -> vector<1x4x16x128xf32>
    %c15_i32_125 = arith.constant 15 : i32
    %399 = vector.broadcast %c15_i32_125 : i32 to vector<1x1x16x128xi32>
    %400 = arith.cmpi slt, %35, %399 : vector<1x1x16x128xi32>
    %cst_126 = arith.constant 0.000000e+00 : f32
    %401 = vector.shape_cast %400 : vector<1x1x16x128xi1> to vector<1x1x16x128xi1>
    %402 = vector.broadcast %401 : vector<1x1x16x128xi1> to vector<1x4x16x128xi1>
    %403 = vector.broadcast %cst_126 : f32 to vector<1x4x16x128xf32>
    %404 = arith.select %402, %398, %403 : vector<1x4x16x128xi1>, vector<1x4x16x128xf32>
    %405 = vector.broadcast %397 : vector<1x1x1x128xf32> to vector<1x4x16x128xf32>
    %406 = arith.mulf %404, %405 : vector<1x4x16x128xf32>
    %407 = arith.addf %394, %406 : vector<1x4x16x128xf32>
    %408 = vector.extract_strided_slice %373 {offsets = [0, 1, 0, 0], sizes = [1, 4, 16, 128], strides = [1, 1, 1, 1]} : vector<1x6x16x128xf32> to vector<1x4x16x128xf32>
    %409 = vector.extract_strided_slice %32 {offsets = [3, 0], sizes = [1, 128], strides = [1, 1]} : vector<9x128xf32> to vector<1x128xf32>
    %410 = vector.shape_cast %409 : vector<1x128xf32> to vector<128xf32>
    %411 = vector.shape_cast %410 : vector<128xf32> to vector<1x1x1x128xf32>
    %c1_i32_127 = arith.constant 1 : i32
    %412 = tpu.dynamic_rotate %408 by %c1_i32_127 dim 2 : vector<1x4x16x128xf32>, i32 -> vector<1x4x16x128xf32>
    %c1_i32_128 = arith.constant 1 : i32
    %413 = vector.broadcast %c1_i32_128 : i32 to vector<1x1x16x128xi32>
    %414 = arith.cmpi sge, %35, %413 : vector<1x1x16x128xi32>
    %cst_129 = arith.constant 0.000000e+00 : f32
    %415 = vector.shape_cast %414 : vector<1x1x16x128xi1> to vector<1x1x16x128xi1>
    %416 = vector.broadcast %415 : vector<1x1x16x128xi1> to vector<1x4x16x128xi1>
    %417 = vector.broadcast %cst_129 : f32 to vector<1x4x16x128xf32>
    %418 = arith.select %416, %412, %417 : vector<1x4x16x128xi1>, vector<1x4x16x128xf32>
    %419 = vector.broadcast %411 : vector<1x1x1x128xf32> to vector<1x4x16x128xf32>
    %420 = arith.mulf %418, %419 : vector<1x4x16x128xf32>
    %421 = arith.addf %407, %420 : vector<1x4x16x128xf32>
    %422 = vector.extract_strided_slice %32 {offsets = [4, 0], sizes = [1, 128], strides = [1, 1]} : vector<9x128xf32> to vector<1x128xf32>
    %423 = vector.shape_cast %422 : vector<1x128xf32> to vector<128xf32>
    %424 = vector.shape_cast %423 : vector<128xf32> to vector<1x1x1x128xf32>
    %425 = vector.broadcast %424 : vector<1x1x1x128xf32> to vector<1x4x16x128xf32>
    %426 = arith.mulf %408, %425 : vector<1x4x16x128xf32>
    %427 = arith.addf %421, %426 : vector<1x4x16x128xf32>
    %428 = vector.extract_strided_slice %32 {offsets = [5, 0], sizes = [1, 128], strides = [1, 1]} : vector<9x128xf32> to vector<1x128xf32>
    %429 = vector.shape_cast %428 : vector<1x128xf32> to vector<128xf32>
    %430 = vector.shape_cast %429 : vector<128xf32> to vector<1x1x1x128xf32>
    %c15_i32_130 = arith.constant 15 : i32
    %431 = tpu.dynamic_rotate %408 by %c15_i32_130 dim 2 : vector<1x4x16x128xf32>, i32 -> vector<1x4x16x128xf32>
    %c15_i32_131 = arith.constant 15 : i32
    %432 = vector.broadcast %c15_i32_131 : i32 to vector<1x1x16x128xi32>
    %433 = arith.cmpi slt, %35, %432 : vector<1x1x16x128xi32>
    %cst_132 = arith.constant 0.000000e+00 : f32
    %434 = vector.shape_cast %433 : vector<1x1x16x128xi1> to vector<1x1x16x128xi1>
    %435 = vector.broadcast %434 : vector<1x1x16x128xi1> to vector<1x4x16x128xi1>
    %436 = vector.broadcast %cst_132 : f32 to vector<1x4x16x128xf32>
    %437 = arith.select %435, %431, %436 : vector<1x4x16x128xi1>, vector<1x4x16x128xf32>
    %438 = vector.broadcast %430 : vector<1x1x1x128xf32> to vector<1x4x16x128xf32>
    %439 = arith.mulf %437, %438 : vector<1x4x16x128xf32>
    %440 = arith.addf %427, %439 : vector<1x4x16x128xf32>
    %441 = vector.extract_strided_slice %373 {offsets = [0, 2, 0, 0], sizes = [1, 4, 16, 128], strides = [1, 1, 1, 1]} : vector<1x6x16x128xf32> to vector<1x4x16x128xf32>
    %442 = vector.extract_strided_slice %32 {offsets = [6, 0], sizes = [1, 128], strides = [1, 1]} : vector<9x128xf32> to vector<1x128xf32>
    %443 = vector.shape_cast %442 : vector<1x128xf32> to vector<128xf32>
    %444 = vector.shape_cast %443 : vector<128xf32> to vector<1x1x1x128xf32>
    %c1_i32_133 = arith.constant 1 : i32
    %445 = tpu.dynamic_rotate %441 by %c1_i32_133 dim 2 : vector<1x4x16x128xf32>, i32 -> vector<1x4x16x128xf32>
    %c1_i32_134 = arith.constant 1 : i32
    %446 = vector.broadcast %c1_i32_134 : i32 to vector<1x1x16x128xi32>
    %447 = arith.cmpi sge, %35, %446 : vector<1x1x16x128xi32>
    %cst_135 = arith.constant 0.000000e+00 : f32
    %448 = vector.shape_cast %447 : vector<1x1x16x128xi1> to vector<1x1x16x128xi1>
    %449 = vector.broadcast %448 : vector<1x1x16x128xi1> to vector<1x4x16x128xi1>
    %450 = vector.broadcast %cst_135 : f32 to vector<1x4x16x128xf32>
    %451 = arith.select %449, %445, %450 : vector<1x4x16x128xi1>, vector<1x4x16x128xf32>
    %452 = vector.broadcast %444 : vector<1x1x1x128xf32> to vector<1x4x16x128xf32>
    %453 = arith.mulf %451, %452 : vector<1x4x16x128xf32>
    %454 = arith.addf %440, %453 : vector<1x4x16x128xf32>
    %455 = vector.extract_strided_slice %32 {offsets = [7, 0], sizes = [1, 128], strides = [1, 1]} : vector<9x128xf32> to vector<1x128xf32>
    %456 = vector.shape_cast %455 : vector<1x128xf32> to vector<128xf32>
    %457 = vector.shape_cast %456 : vector<128xf32> to vector<1x1x1x128xf32>
    %458 = vector.broadcast %457 : vector<1x1x1x128xf32> to vector<1x4x16x128xf32>
    %459 = arith.mulf %441, %458 : vector<1x4x16x128xf32>
    %460 = arith.addf %454, %459 : vector<1x4x16x128xf32>
    %461 = vector.extract_strided_slice %32 {offsets = [8, 0], sizes = [1, 128], strides = [1, 1]} : vector<9x128xf32> to vector<1x128xf32>
    %462 = vector.shape_cast %461 : vector<1x128xf32> to vector<128xf32>
    %463 = vector.shape_cast %462 : vector<128xf32> to vector<1x1x1x128xf32>
    %c15_i32_136 = arith.constant 15 : i32
    %464 = tpu.dynamic_rotate %441 by %c15_i32_136 dim 2 : vector<1x4x16x128xf32>, i32 -> vector<1x4x16x128xf32>
    %c15_i32_137 = arith.constant 15 : i32
    %465 = vector.broadcast %c15_i32_137 : i32 to vector<1x1x16x128xi32>
    %466 = arith.cmpi slt, %35, %465 : vector<1x1x16x128xi32>
    %cst_138 = arith.constant 0.000000e+00 : f32
    %467 = vector.shape_cast %466 : vector<1x1x16x128xi1> to vector<1x1x16x128xi1>
    %468 = vector.broadcast %467 : vector<1x1x16x128xi1> to vector<1x4x16x128xi1>
    %469 = vector.broadcast %cst_138 : f32 to vector<1x4x16x128xf32>
    %470 = arith.select %468, %464, %469 : vector<1x4x16x128xi1>, vector<1x4x16x128xf32>
    %471 = vector.broadcast %463 : vector<1x1x1x128xf32> to vector<1x4x16x128xf32>
    %472 = arith.mulf %470, %471 : vector<1x4x16x128xf32>
    %473 = arith.addf %460, %472 : vector<1x4x16x128xf32>
    %474 = vector.broadcast %34 : vector<1x1x1x128xf32> to vector<1x4x16x128xf32>
    %475 = arith.addf %473, %474 : vector<1x4x16x128xf32>
    %476 = arith.negf %475 : vector<1x4x16x128xf32>
    %477 = math.exp %476 : vector<1x4x16x128xf32>
    %cst_139 = arith.constant 1.000000e+00 : f32
    %478 = vector.broadcast %cst_139 : f32 to vector<1x4x16x128xf32>
    %479 = arith.addf %478, %477 : vector<1x4x16x128xf32>
    %480 = arith.divf %478, %479 : vector<1x4x16x128xf32>
    %481 = arith.mulf %475, %480 : vector<1x4x16x128xf32>
    %c0_140 = arith.constant 0 : index
    %c12_141 = arith.constant 12 : index
    %c0_142 = arith.constant 0 : index
    %c0_143 = arith.constant 0 : index
    %482 = vector.load %arg15[%c0_140, %c12_141, %c0_142, %c0_143] : memref<1x16x16x128xf32, #tpu.memory_space<vmem>>, vector<1x4x16x128xf32>
    tpu.vector_store %arg15[%c0_140, %c12_141, %c0_142, %c0_143], %481 {strides = array<i32>} : memref<1x16x16x128xf32, #tpu.memory_space<vmem>>, vector<1x4x16x128xf32>,
    %cst_144 = arith.constant dense<0.000000e+00> : vector<1x128xf32>
    %483 = vector.multi_reduction <add>, %481, %cst_144 [1, 2] : vector<1x4x16x128xf32> to vector<1x128xf32>
    %484 = arith.addf %372, %483 : vector<1x128xf32>
    %cst_145 = arith.constant 3.906250e-03 : f32
    %485 = vector.broadcast %cst_145 : f32 to vector<1x128xf32>
    %486 = arith.mulf %484, %485 : vector<1x128xf32>
    %c0_146 = arith.constant 0 : index
    %c0_147 = arith.constant 0 : index
    %487 = vector.load %arg7[%c0_146, %c0_147] : memref<128x5xf32, #tpu.memory_space<vmem>>, vector<128x5xf32>
    %cst_148 = arith.constant dense<0.000000e+00> : vector<1x5xf32>
    %488 = tpu.matmul %486, %487, %cst_148 {dimension_numbers = #tpu.dot_dimension_numbers<[1], [0], [0], [1], [0, 0, 1, 1], [], []>} : vector<1x128xf32>, vector<128x5xf32>, vector<1x5xf32> -> vector<1x5xf32>
    %c0_149 = arith.constant 0 : index
    %c0_150 = arith.constant 0 : index
    %489 = vector.load %arg8[%c0_149, %c0_150] : memref<1x5xf32, #tpu.memory_space<vmem>>, vector<1x5xf32>
    %490 = arith.addf %488, %489 : vector<1x5xf32>
    %491 = arith.negf %490 : vector<1x5xf32>
    %492 = math.exp %491 : vector<1x5xf32>
    %cst_151 = arith.constant 1.000000e+00 : f32
    %493 = vector.broadcast %cst_151 : f32 to vector<1x5xf32>
    %494 = arith.addf %493, %492 : vector<1x5xf32>
    %495 = arith.divf %493, %494 : vector<1x5xf32>
    %496 = arith.mulf %490, %495 : vector<1x5xf32>
    %c0_152 = arith.constant 0 : index
    %c0_153 = arith.constant 0 : index
    %497 = vector.load %arg9[%c0_152, %c0_153] : memref<5x128xf32, #tpu.memory_space<vmem>>, vector<5x128xf32>
    %cst_154 = arith.constant dense<0.000000e+00> : vector<1x128xf32>
    %498 = tpu.matmul %496, %497, %cst_154 {dimension_numbers = #tpu.dot_dimension_numbers<[1], [0], [0], [1], [0, 0, 1, 1], [], []>} : vector<1x5xf32>, vector<5x128xf32>, vector<1x128xf32> -> vector<1x128xf32>
    %c0_155 = arith.constant 0 : index
    %c0_156 = arith.constant 0 : index
    %499 = vector.load %arg10[%c0_155, %c0_156] : memref<1x128xf32, #tpu.memory_space<vmem>>, vector<1x128xf32>
    %500 = arith.addf %498, %499 : vector<1x128xf32>
    %501 = arith.negf %500 : vector<1x128xf32>
    %502 = math.exp %501 : vector<1x128xf32>
    %cst_157 = arith.constant 1.000000e+00 : f32
    %503 = vector.broadcast %cst_157 : f32 to vector<1x128xf32>
    %504 = arith.addf %503, %502 : vector<1x128xf32>
    %505 = arith.divf %503, %504 : vector<1x128xf32>
    %506 = vector.shape_cast %505 : vector<1x128xf32> to vector<1x1x1x128xf32>
    %c0_158 = arith.constant 0 : index
    %c0_159 = arith.constant 0 : index
    %507 = vector.load %arg11[%c0_158, %c0_159] : memref<128x32xf32, #tpu.memory_space<vmem>>, vector<128x32xf32>
    %c0_160 = arith.constant 0 : index
    %c0_161 = arith.constant 0 : index
    %508 = vector.load %arg12[%c0_160, %c0_161] : memref<1x32xf32, #tpu.memory_space<vmem>>, vector<1x32xf32>
    %c0_162 = arith.constant 0 : index
    %c0_163 = arith.constant 0 : index
    %c0_164 = arith.constant 0 : index
    %c0_165 = arith.constant 0 : index
    %509 = vector.load %arg15[%c0_162, %c0_163, %c0_164, %c0_165] : memref<1x16x16x128xf32, #tpu.memory_space<vmem>>, vector<1x8x16x128xf32>
    %510 = vector.broadcast %506 : vector<1x1x1x128xf32> to vector<1x8x16x128xf32>
    %511 = arith.mulf %509, %510 : vector<1x8x16x128xf32>
    %512 = vector.shape_cast %511 : vector<1x8x16x128xf32> to vector<128x128xf32>
    %cst_166 = arith.constant dense<0.000000e+00> : vector<128x32xf32>
    %513 = tpu.matmul %512, %507, %cst_166 {dimension_numbers = #tpu.dot_dimension_numbers<[1], [0], [0], [1], [0, 0, 1, 1], [], []>} : vector<128x128xf32>, vector<128x32xf32>, vector<128x32xf32> -> vector<128x32xf32>
    %514 = vector.broadcast %508 : vector<1x32xf32> to vector<128x32xf32>
    %515 = arith.addf %513, %514 : vector<128x32xf32>
    %516 = vector.shape_cast %515 : vector<128x32xf32> to vector<1x8x16x32xf32>
    %c0_167 = arith.constant 0 : index
    %c0_168 = arith.constant 0 : index
    %c0_169 = arith.constant 0 : index
    %c0_170 = arith.constant 0 : index
    %517 = vector.load %arg2[%c0_167, %c0_168, %c0_169, %c0_170] : memref<1x16x16x32xf32, #tpu.memory_space<vmem>>, vector<1x8x16x32xf32>
    %518 = vector.shape_cast %516 : vector<1x8x16x32xf32> to vector<8x16x32xf32>
    %c0_i32 = arith.constant 0 : i32
    %519 = arith.addi %0, %c0_i32 : i32
    %520 = arith.index_cast %519 : i32 to index
    %521 = memref.load %arg1[%520] : memref<2xf32, #tpu.memory_space<smem>>
    %522 = vector.broadcast %521 : f32 to vector<8x16x32xf32>
    %523 = arith.mulf %518, %522 : vector<8x16x32xf32>
    %524 = vector.shape_cast %517 : vector<1x8x16x32xf32> to vector<8x16x32xf32>
    %525 = arith.addf %523, %524 : vector<8x16x32xf32>
    %c0_171 = arith.constant 0 : index
    %c0_172 = arith.constant 0 : index
    %c0_173 = arith.constant 0 : index
    %c0_174 = arith.constant 0 : index
    %526 = vector.load %arg13[%c0_171, %c0_172, %c0_173, %c0_174] : memref<1x16x16x32xf32, #tpu.memory_space<vmem>>, vector<1x8x16x32xf32>
    %527 = vector.shape_cast %526 : vector<1x8x16x32xf32> to vector<8x16x32xf32>
    %528 = vector.shape_cast %525 : vector<8x16x32xf32> to vector<1x8x16x32xf32>
    tpu.vector_store %arg13[%c0_171, %c0_172, %c0_173, %c0_174], %528 {strides = array<i32>} : memref<1x16x16x32xf32, #tpu.memory_space<vmem>>, vector<1x8x16x32xf32>,
    %c0_175 = arith.constant 0 : index
    %c8_176 = arith.constant 8 : index
    %c0_177 = arith.constant 0 : index
    %c0_178 = arith.constant 0 : index
    %529 = vector.load %arg15[%c0_175, %c8_176, %c0_177, %c0_178] : memref<1x16x16x128xf32, #tpu.memory_space<vmem>>, vector<1x8x16x128xf32>
    %530 = vector.broadcast %506 : vector<1x1x1x128xf32> to vector<1x8x16x128xf32>
    %531 = arith.mulf %529, %530 : vector<1x8x16x128xf32>
    %532 = vector.shape_cast %531 : vector<1x8x16x128xf32> to vector<128x128xf32>
    %cst_179 = arith.constant dense<0.000000e+00> : vector<128x32xf32>
    %533 = tpu.matmul %532, %507, %cst_179 {dimension_numbers = #tpu.dot_dimension_numbers<[1], [0], [0], [1], [0, 0, 1, 1], [], []>} : vector<128x128xf32>, vector<128x32xf32>, vector<128x32xf32> -> vector<128x32xf32>
    %534 = vector.broadcast %508 : vector<1x32xf32> to vector<128x32xf32>
    %535 = arith.addf %533, %534 : vector<128x32xf32>
    %536 = vector.shape_cast %535 : vector<128x32xf32> to vector<1x8x16x32xf32>
    %c0_180 = arith.constant 0 : index
    %c8_181 = arith.constant 8 : index
    %c0_182 = arith.constant 0 : index
    %c0_183 = arith.constant 0 : index
    %537 = vector.load %arg2[%c0_180, %c8_181, %c0_182, %c0_183] : memref<1x16x16x32xf32, #tpu.memory_space<vmem>>, vector<1x8x16x32xf32>
    %538 = vector.shape_cast %536 : vector<1x8x16x32xf32> to vector<8x16x32xf32>
    %c0_i32_184 = arith.constant 0 : i32
    %539 = arith.addi %0, %c0_i32_184 : i32
    %540 = arith.index_cast %539 : i32 to index
    %541 = memref.load %arg1[%540] : memref<2xf32, #tpu.memory_space<smem>>
    %542 = vector.broadcast %541 : f32 to vector<8x16x32xf32>
    %543 = arith.mulf %538, %542 : vector<8x16x32xf32>
    %544 = vector.shape_cast %537 : vector<1x8x16x32xf32> to vector<8x16x32xf32>
    %545 = arith.addf %543, %544 : vector<8x16x32xf32>
    %c0_185 = arith.constant 0 : index
    %c8_186 = arith.constant 8 : index
    %c0_187 = arith.constant 0 : index
    %c0_188 = arith.constant 0 : index
    %546 = vector.load %arg13[%c0_185, %c8_186, %c0_187, %c0_188] : memref<1x16x16x32xf32, #tpu.memory_space<vmem>>, vector<1x8x16x32xf32>
    %547 = vector.shape_cast %546 : vector<1x8x16x32xf32> to vector<8x16x32xf32>
    %548 = vector.shape_cast %545 : vector<8x16x32xf32> to vector<1x8x16x32xf32>
    tpu.vector_store %arg13[%c0_185, %c8_186, %c0_187, %c0_188], %548 {strides = array<i32>} : memref<1x16x16x32xf32, #tpu.memory_space<vmem>>, vector<1x8x16x32xf32>,
    return
  }
  func.func @transform_0(%arg0: i32) -> i32 {
    %c0_i32 = arith.constant 0 : i32
    %c0_i32_0 = arith.constant 0 : i32
    return %c0_i32 : i32
  }
  func.func @transform_1(%arg0: i32) -> (i32, i32, i32, i32) {
    %c0_i32 = arith.constant 0 : i32
    %c0_i32_0 = arith.constant 0 : i32
    %c0_i32_1 = arith.constant 0 : i32
    %c0_i32_2 = arith.constant 0 : i32
    return %arg0, %c0_i32, %c0_i32_0, %c0_i32_1 : i32, i32, i32, i32
  }
  func.func @transform_2(%arg0: i32) -> (i32, i32) {
    %c0_i32 = arith.constant 0 : i32
    %c0_i32_0 = arith.constant 0 : i32
    %c0_i32_1 = arith.constant 0 : i32
    return %c0_i32, %c0_i32_0 : i32, i32
  }
  func.func @transform_3(%arg0: i32) -> (i32, i32) {
    %c0_i32 = arith.constant 0 : i32
    %c0_i32_0 = arith.constant 0 : i32
    %c0_i32_1 = arith.constant 0 : i32
    return %c0_i32, %c0_i32_0 : i32, i32
  }
  func.func @transform_4(%arg0: i32) -> (i32, i32) {
    %c0_i32 = arith.constant 0 : i32
    %c0_i32_0 = arith.constant 0 : i32
    %c0_i32_1 = arith.constant 0 : i32
    return %c0_i32, %c0_i32_0 : i32, i32
  }
  func.func @transform_5(%arg0: i32) -> (i32, i32) {
    %c0_i32 = arith.constant 0 : i32
    %c0_i32_0 = arith.constant 0 : i32
    %c0_i32_1 = arith.constant 0 : i32
    return %c0_i32, %c0_i32_0 : i32, i32
  }
  func.func @transform_6(%arg0: i32) -> (i32, i32) {
    %c0_i32 = arith.constant 0 : i32
    %c0_i32_0 = arith.constant 0 : i32
    %c0_i32_1 = arith.constant 0 : i32
    return %c0_i32, %c0_i32_0 : i32, i32
  }
  func.func @transform_7(%arg0: i32) -> (i32, i32) {
    %c0_i32 = arith.constant 0 : i32
    %c0_i32_0 = arith.constant 0 : i32
    %c0_i32_1 = arith.constant 0 : i32
    return %c0_i32, %c0_i32_0 : i32, i32
  }
  func.func @transform_8(%arg0: i32) -> (i32, i32) {
    %c0_i32 = arith.constant 0 : i32
    %c0_i32_0 = arith.constant 0 : i32
    %c0_i32_1 = arith.constant 0 : i32
    return %c0_i32, %c0_i32_0 : i32, i32
  }
  func.func @transform_9(%arg0: i32) -> (i32, i32) {
    %c0_i32 = arith.constant 0 : i32
    %c0_i32_0 = arith.constant 0 : i32
    %c0_i32_1 = arith.constant 0 : i32
    return %c0_i32, %c0_i32_0 : i32, i32
  }
  func.func @transform_10(%arg0: i32) -> (i32, i32) {
    %c0_i32 = arith.constant 0 : i32
    %c0_i32_0 = arith.constant 0 : i32
    %c0_i32_1 = arith.constant 0 : i32
    return %c0_i32, %c0_i32_0 : i32, i32
  }
  func.func @transform_11(%arg0: i32) -> (i32, i32) {
    %c0_i32 = arith.constant 0 : i32
    %c0_i32_0 = arith.constant 0 : i32
    %c0_i32_1 = arith.constant 0 : i32
    return %c0_i32, %c0_i32_0 : i32, i32
  }
  func.func @transform_12(%arg0: i32) -> (i32, i32, i32, i32) {
    %c0_i32 = arith.constant 0 : i32
    %c0_i32_0 = arith.constant 0 : i32
    %c0_i32_1 = arith.constant 0 : i32
    %c0_i32_2 = arith.constant 0 : i32
    return %arg0, %c0_i32, %c0_i32_0, %c0_i32_1 : i32, i32, i32, i32
  }
}

</mosaic_0001>

<bundles_post_ra>
// kernel: tpu_custom_call.1
= control target key start
LH: loop header
LB: loop body
LE: loop exit
PB: predicated region body
PF: predicated region fallthrough
CT: control target
= control target key end

     0   :  { %s6725_s0 = inlined_call_operand.vmem [shape: f32[2], index: 0, kind: input, shape index: {}]   ;;  %s6726_s1 = inlined_call_operand.hbm [shape: f32[2,16,16,32], index: 1, kind: input, shape index: {}]   ;;  %s6727_s2 = inlined_call_operand.vmem [shape: f32[32,128], index: 2, kind: input, shape index: {}]   ;;  %s6728_s3 = inlined_call_operand.vmem [shape: f32[1,128], index: 3, kind: input, shape index: {}]   ;;  %s6729_s4 = inlined_call_operand.vmem [shape: f32[9,128], index: 4, kind: input, shape index: {}]   ;;  %s6730_s5 = inlined_call_operand.vmem [shape: f32[1,128], index: 5, kind: input, shape index: {}]   ;;  %s6731_s6 = inlined_call_operand.vmem [shape: f32[128,5], index: 6, kind: input, shape index: {}]   ;;  %s6732_s7 = inlined_call_operand.vmem [shape: f32[1,5], index: 7, kind: input, shape index: {}]   ;;  %s6733_s8 = inlined_call_operand.vmem [shape: f32[5,128], index: 8, kind: input, shape index: {}]   ;;  %s6734_s9 = inlined_call_operand.vmem [shape: f32[1,128], index: 9, kind: input, shape index: {}]   ;;  %s6735_s10 = inlined_call_operand.vmem [shape: f32[128,32], index: 10, kind: input, shape index: {}]   ;;  %s6736_s11 = inlined_call_operand.vmem [shape: f32[1,32], index: 11, kind: input, shape index: {}]   ;;  %s6737_s12 = inlined_call_operand.hbm [shape: f32[2,16,16,32], index: 12, kind: output, shape index: {}]  }
   0x1   :  { %6814 = sst [smem:[#allocation76_spill]] %s6725_s0 }
   0x2   :  { %17 = vsyncpa [#allocation7], 0 }
   0x3   :  { %18 = vsyncpa [#allocation5], 0 }
   0x4   :  { %20 = vsyncpa [#allocation5 + $0x1], 0 }
   0x5   :  { %21 = vsyncpa [#allocation6], 0 }
   0x6   :  { %23 = vsyncpa [#allocation6 + $0x1], 0  ;;  %s4394_s21 = smov 0   ;;  %s4396_s22 = smov 0  }
   0x7   :  { %s4398_s23 = smov 0   ;;  %s4400_s24 = smov 0  }
   0x8 LB: > { %6815 = sst [smem:[#allocation13_spill]] %s4305_s21  ;;  %s4415_s25 = sadd.s32 4294967295, %s4317_s24   ;;  %s4317_s24 = sphi %s4400_s24, %s7076_s24   ;;  %s4313_s23 = sphi %s4398_s23, %s7078_s23   ;;  %s4309_s22 = sphi %s4396_s22, %s7080_s22   ;;  %s4305_s21 = sphi %s4394_s21, %s7079_s21  }
   0x9   : > { %6816 = sst [smem:[#allocation14_spill]] %s4313_s23  ;;  %s3258_s26 = sadd.s32 4294967294, %s4317_s24  }
   0xa   : > { %s4419_s27 = sadd.s32 1, %s4317_s24   ;;  %s57_s28 = sadd.s32 1, %s4313_s23 }
   0xb   : > { %6817 = sst [smem:[#allocation15_spill]] %s4419_s27  ;;  %s54_s29 = ssub.s32 %s4317_s24, %s4419_s27 }
   0xc   : > { %p64_p0 = scmp.ne.s32.totalorder %s4313_s23, %s4309_s22  ;;  %p55_p1 = scmp.eq.s32.totalorder %s54_s29, 0 }
   0xd   : > { %p65_p2 = scmp.eq.s32.totalorder %s4317_s24, 0  ;;  %p70_p3 = scmp.ne.s32.totalorder %s4309_s22, %s4305_s21 }
   0xe   : > { %p6739_p4 = scmp.eq.s32.totalorder %s4415_s25, 0  ;;  %p304_p7 = scmp.eq.s32.totalorder %s4415_s25, 1 }
   0xf   : > { %s4431_s30 = scalar_select %p55_p1, %s4313_s23, %s57_s28  }
  0x10   : > { %p4433_p5 = por %p65_p2, %p64_p0  ;;  %p4439_p6 = por %p6739_p4, %p70_p3 }
  0x11   : > { %6818 = sst [smem:[#allocation16_spill]] %s4431_s30  ;;  %p310_p8 = scmp.eq.s32.totalorder %s3258_s26, 1 }
  0x12   : > { %s6820_s14 = scalar_select %p4439_p6, 1, 0 }
  0x13   : > { %p3259_p9 = scmp.ge.s32.totalorder %s4317_s24, 1  ;;  %p317_p10 = scmp.lt.s32.totalorder %s4317_s24, 3 }
  0x14   : > { %p4446_p11 = por %p304_p7, %p64_p0  ;;  %p4450_p12 = por %p310_p8, %p70_p3 }
  0x15   : > { %p4454_p13 = pnand %p3259_p9, %p317_p10  ;;  %s6825_s0 = sld [smem:[#allocation76_spill]] }
  0x16   : > { %s6821_s15 = scalar_select %p4446_p11, 1, 0 }
  0x17   : > { %s6822_s16 = scalar_select %p4450_p12, 1, 0 }
  0x18   : > { %p3879_p1 = pneg %p4454_p13  ;;  %p3892_p2 = scmp.lt.s32.totalorder %s4317_s24, 2 }
  0x19   : > { %6823 = sst [smem:[#allocation17_spill]] %s6822_s16  ;;  %s371_s28 = sand.u32 1, %s4313_s23  }
  0x1a   : > { %p4467_p7 = pnand %p3879_p1, %p6739_p4  ;;  %p4474_p3 = pnand %p3892_p2, %p4433_p5 }
  0x1b   : > { %s330_s20 = sshll.u32 %s6825_s0, 4  ;;  %s3262_s18 = sshll.u32 %s371_s28, 8  ;;  %s331_s20 = int_to_ptr.vmem [resolvable:$true] %s330_s20 }
  0x1c   : > { %s4202_s19 = scalar_lea.vmem %s331_s20, 16  ;;  %p4204_p9 = pneg %p4467_p7 }
  0x1d   : > { %p4203_p8 = scmp.ne.s32.totalorder %s331_s20, %s4202_s19  ;;  %p4210_p12 = scmp.lt.s32.totalorder %s331_s20, %s331_s20 }
  0x1e   : > { %p4211_p11 = scmp.lt.s32.totalorder %s4202_s19, %s4202_s19 }
  0x1f   : > { %p4205_p10 = pnand %p4204_p9, %p4203_p8 }
  0x20   : > { %p4212_p1 = por %p4211_p11, %p4210_p12 }
  0x21   : > { %p4206_p0 = pneg %p4205_p10 }
  0x23   : > { %p4213_p4 = pnand %p4212_p1, %p4206_p0 }
  0x25   : > { %4216 = shalt.err (!%p4213_p4)
}
  0x26   : > { %s4319_s0 = smov [#allocation4]   ;;  %s3426_s13 = sshll.u32 %s4317_s24, 12 }
  0x27   : > { %3882 = dma.vmem_to_smem (!%p4467_p7), %s331_s20, 16, %s4319_s0, [#allocation7]  }
  0x28   : > { %s375_s30 = scalar_lea.vmem [#allocation8], %s3262_s18  ;;  %s4486_s21 = scalar_lea.hbm %s6726_s1, %s3426_s13 }
  0x29   : > { %s382_s23 = sshll.u32 %s375_s30, 4  ;;  %s4490_s19 = scalar_lea.sflag [#allocation5], %s371_s28  ;;  %s4488_s23 = int_to_ptr.vmem [resolvable:$true] %s382_s23 }
  0x2a   : > { %s4217_s26 = scalar_lea.hbm %s4486_s21, 4096  ;;  %p4219_p5 = pneg %p4474_p3 }
  0x2b   : > { %p4218_p4 = scmp.ne.s32.totalorder %s4486_s21, %s4217_s26  ;;  %s4222_s30 = scalar_lea.hbm %s6726_s1, 8192 }
  0x2c   : > { %p4223_p0 = scmp.lt.u32.totalorder %s4486_s21, %s6726_s1  ;;  %p4224_p2 = scmp.lt.u32.totalorder %s4222_s30, %s4217_s26 }
  0x2d   : > { %p4220_p11 = pnand %p4219_p5, %p4218_p4  ;;  %p4226_p8 = scmp.lt.u32.totalorder %s4217_s26, %s4486_s21 }
  0x2e   : > { %p4225_p7 = por %p4224_p2, %p4223_p0 }
  0x2f   : > { %p4221_p12 = pneg %p4220_p11 }
  0x30   : > { %p4227_p9 = por %p4226_p8, %p4225_p7 }
  0x32   : > { %p4228_p10 = pnand %p4227_p9, %p4221_p12 }
  0x34   : > { %4231 = shalt.err (!%p4228_p10)
}
  0x35   : > { %s4232_s28 = scalar_lea.vmem %s4488_s23, 4096  ;;  %s4320_s18 = smov [#allocation8]  }
  0x36   : > { %p4233_p1 = scmp.ne.s32.totalorder %s4488_s23, %s4232_s28  ;;  %s4237_s13 = sshll.u32 %s4320_s18, 4  ;;  %s4238_s13 = int_to_ptr.vmem [resolvable:$false] %s4237_s13 }
  0x37   : > { %s4239_s0 = scalar_lea.vmem %s4238_s13, 8192  ;;  %p4240_p6 = scmp.lt.s32.totalorder %s4488_s23, %s4238_s13 }
  0x38   : > { %p4235_p4 = pnand %p4233_p1, %p4219_p5  ;;  %p4241_p0 = scmp.lt.s32.totalorder %s4239_s0, %s4232_s28 }
  0x3a   : > { %p4236_p11 = pneg %p4235_p4  ;;  %p4242_p2 = por %p4241_p0, %p4240_p6 }
  0x3c   : > { %p4243_p7 = pnand %p4242_p2, %p4236_p11 }
  0x3e   : > { %4246 = shalt.err (!%p4243_p7)
}
  0x3f   : > { %s4321_s26 = smov 128   ;;  %s4322_s27 = smov 8  }
  0x40   : > { %3886 = dma.hbm_to_vmem [thread:$0]  (!%p4474_p3), %s4486_s21, 4096, %s4488_s23, %s4490_s19, %s4321_s26, %s4321_s26, %s4322_s27  }
  0x41   : > { %394 = sbr.rel (%p4454_p13) target bundleno = 1392 (0x570), region = 68 }
  0x48   : > { %p6828_p5 = scmp.eq.s32.totalorder %s4415_s25, 0 }
  0x4a   : > { %4292 = dma.done.wait (%p6828_p5), [#allocation7], 16   ;;  %p6829_p12 = pmov %p6828_p5 }
  0x4b   : > { %s4525_s30 = sand.u32 1, %s4309_s22   ;;  %p6830_p6 = scmp.ne.s32.totalorder %s6820_s14, 0 }
  0x4c   : > { %4294 = vsyncadd (%p6829_p12), [#allocation7], 4294967280  ;;  %s3267_s16 = sshll.u32 %s4525_s30, 8  ;;  %s401_s20 = scalar_lea.sflag [#allocation5], %s4525_s30 }
  0x4d   : > { %s4531_s21 = scalar_lea.vmem [#allocation8], %s3267_s16 }
  0x4e   : > { %4296 = dma.done.wait (%p6830_p6), %s401_s20, 4096  }
  0x4f   : > { %4298 = vsyncadd (%p6830_p6), %s401_s20, 4294963200 }
  0x50   : > { %409 = sfence }
  0x51   : > { %v451_v0 = vld [vmem:[%s6727_s2] sm:$0xff]  ;;  %v452_v1 = vld [vmem:[%s6727_s2 + $0x8] sm:$0xff]  ;;  %v453_v2 = vld [vmem:[%s6727_s2 + $0x10] sm:$0xff]  ;;  %vm478_vm0 = vcmask 261120   ;;  %vm4325_vm5 = vmmov 0   ;;  %vm2565_vm6 = vcmask 1044480  }
  0x52   : > { %v3767_v3 = vpack.c.bf16 %v452_v1, %v451_v0  ;;  %v454_v4 = vld [vmem:[%s6727_s2 + $0x18] sm:$0xff]  ;;  %v456_v5 = vld [vmem:[%s4531_s21] sm:$0xff]  ;;  %v457_v8 = vld [vmem:[%s4531_s21 + $0x8] sm:$0xff]  ;;  %vm2561_vm7 = vcmask 39936   ;;  %s2865_s0 = sld [smem:[#allocation4 + %s4415_s25]]  ;;  %s6530_s23 = scalar_lea.vmem [#allocation9], %s3267_s16 }
  0x53   : > { %v3302_v6 = vld [vmem:[%s4531_s21 + $0x80] sm:$0xff]  ;;  %v3771_v7 = vpack.c.bf16 %v454_v4, %v453_v2  ;;  %3559 = vmatprep.mubr.msk.f32.mxu0 %vm478_vm0, %v456_v5  ;;  %v3303_v9 = vld [vmem:[%s4531_s21 + $0x88] sm:$0xff]  ;;  %v458_v10 = vld [vmem:[%s4531_s21 + $0x10] sm:$0xff]  ;;  %s3108_s26 = sld [smem:[#allocation4 + %s4415_s25]]  ;;  %s3427_s16 = sshll.u32 %s4415_s25, 12 }
  0x54   : > { %3591 = vmatprep.mubr.msk.f32.mxu1 %vm478_vm0, %v3302_v6  ;;  %3768 = vmatprep.subr.bf16.mxu0 %v3767_v3  ;;  %v3304_v11 = vld [vmem:[%s4531_s21 + $0x90] sm:$0xff]  ;;  %v459_v12 = vld [vmem:[%s4531_s21 + $0x18] sm:$0xff]  ;;  %v460_v14 = vld [vmem:[%s4531_s21 + $0x20] sm:$0xff]  ;;  %s3173_s17 = sshll.u32 %s6530_s23, 4  ;;  %s6671_s19 = scalar_lea.hbm %s6737_s12, %s3427_s16  ;;  %s6673_s17 = int_to_ptr.vmem [resolvable:$true] %s3173_s17 }
  0x55   : > { %3776 = vmatprep.subr.bf16.mxu1 %v3767_v3  ;;  %3770 = vmatpush3.bf16.msra.mxu0 %v3767_v3  ;;  %v3305_v13 = vld [vmem:[%s4531_s21 + $0x98] sm:$0xff]  ;;  %v3306_v15 = vld [vmem:[%s4531_s21 + $0xa0] sm:$0xff]  ;;  %v461_v16 = vld [vmem:[%s4531_s21 + $0x28] sm:$0xff]  ;;  %s4247_s28 = scalar_lea.vmem %s6673_s17, 4096  ;;  %p7071_p3 = scmp.ne.s32.totalorder %s6821_s15, 0 }
  0x56   : > { %3778 = vmatpush3.bf16.msra.mxu1 %v3767_v3  ;;  %3772 = vmatprep.subr.bf16.mxu0 %v3771_v7  ;;  %v3307_v17 = vld [vmem:[%s4531_s21 + $0xa8] sm:$0xff]  ;;  %v462_v18 = vld [vmem:[%s4531_s21 + $0x30] sm:$0xff]  ;;  %v463_v20 = vld [vmem:[%s4531_s21 + $0x38] sm:$0xff]  ;;  %p4248_p13 = scmp.ne.s32.totalorder %s6673_s17, %s4247_s28  ;;  %s4326_s18 = smov [#allocation9]  }
  0x57   : > { %3780 = vmatprep.subr.bf16.mxu1 %v3771_v7  ;;  %v3308_v19 = vld [vmem:[%s4531_s21 + $0xb0] sm:$0xff]  ;;  %v3309_v21 = vld [vmem:[%s4531_s21 + $0xb8] sm:$0xff]  ;;  %v464_v22 = vld [vmem:[%s4531_s21 + $0x40] sm:$0xff]  ;;  %s4251_s14 = sshll.u32 %s4326_s18, 4  ;;  %s4252_s14 = int_to_ptr.vmem [resolvable:$false] %s4251_s14 }
  0x58   : > { %v3310_v23 = vld [vmem:[%s4531_s21 + $0xc0] sm:$0xff]  ;;  %v465_v24 = vld [vmem:[%s4531_s21 + $0x48] sm:$0xff]  ;;  %v466_v26 = vld [vmem:[%s4531_s21 + $0x50] sm:$0xff]  ;;  %p4249_p8 = pnand %p4248_p13, %p7071_p3  ;;  %s4253_s13 = scalar_lea.vmem %s4252_s14, 8192 }
  0x59   : > { %3774 = vmatpush3.bf16.msra.mxu0 %v3771_v7  ;;  %v3311_v25 = vld [vmem:[%s4531_s21 + $0xc8] sm:$0xff]  ;;  %v3312_v27 = vld [vmem:[%s4531_s21 + $0xd0] sm:$0xff]  ;;  %v467_v28 = vld [vmem:[%s4531_s21 + $0x58] sm:$0xff]  ;;  %p4254_p10 = scmp.lt.s32.totalorder %s6673_s17, %s4252_s14  ;;  %p4255_p1 = scmp.lt.s32.totalorder %s4253_s13, %s4247_s28 }
  0x5a   : > { %3782 = vmatpush3.bf16.msra.mxu1 %v3771_v7  ;;  %v3313_v29 = vld [vmem:[%s4531_s21 + $0xd8] sm:$0xff]  ;;  %v468_v30 = vld [vmem:[%s4531_s21 + $0x60] sm:$0xff]  ;;  %v469_v32 = vld [vmem:[%s4531_s21 + $0x68] sm:$0xff]  ;;  %p4250_p9 = pneg %p4249_p8 }
  0x5b   : > { %v3314_v31 = vld [vmem:[%s4531_s21 + $0xe0] sm:$0xff]  ;;  %v3315_v33 = vld [vmem:[%s4531_s21 + $0xe8] sm:$0xff]  ;;  %v470_v34 = vld [vmem:[%s4531_s21 + $0x70] sm:$0xff]  ;;  %p4256_p4 = por %p4255_p1, %p4254_p10 }
  0x5c   : > { %3560 = vmatmul.mubr.msk.f32.vlgmr.msra.gmra.mrb[0].mxu0 %vm478_vm0, %v457_v8  ;;  %v3316_v35 = vld [vmem:[%s4531_s21 + $0xf0] sm:$0xff]  ;;  %v471_v36 = vld [vmem:[%s4531_s21 + $0x78] sm:$0xff]  ;;  %v4616_v38 = vld [vmem:[%s6728_s3] ss:$0 sm:$0xff] }
  0x5d   : > { %3592 = vmatmul.mubr.msk.f32.vlgmr.msra.gmra.mrb[0].mxu1 %vm478_vm0, %v3303_v9  ;;  %3562 = vmatprep.mubr.msk.f32.mxu0 %vm478_vm0, %v458_v10  ;;  %v3317_v37 = vld [vmem:[%s4531_s21 + $0xf8] sm:$0xff]  ;;  %p4257_p11 = pnand %p4256_p4, %p4250_p9 }
  0x5e   : > { %3594 = vmatprep.mubr.msk.f32.mxu1 %vm478_vm0, %v3304_v11 }
  0x60   : > { %3563 = vmatmul.mubr.msk.f32.gmra.mrb[2].mxu0 %vm478_vm0, %v459_v12 }
  0x61   : > { %3595 = vmatmul.mubr.msk.f32.gmra.mrb[2].mxu1 %vm478_vm0, %v3305_v13  ;;  %3565 = vmatprep.mubr.msk.f32.mxu0 %vm478_vm0, %v460_v14 }
  0x62   : > { %3597 = vmatprep.mubr.msk.f32.mxu1 %vm478_vm0, %v3306_v15 }
  0x64   : > { %3566 = vmatmul.mubr.msk.f32.gmra.mrb[4].mxu0 %vm478_vm0, %v461_v16 }
  0x65   : > { %3598 = vmatmul.mubr.msk.f32.gmra.mrb[4].mxu1 %vm478_vm0, %v3307_v17  ;;  %3568 = vmatprep.mubr.msk.f32.mxu0 %vm478_vm0, %v462_v18  ;;  %v1143_v18 = vlaneseq }
  0x66   : > { %3600 = vmatprep.mubr.msk.f32.mxu1 %vm478_vm0, %v3308_v19 }
  0x68   : > { %3569 = vmatmul.mubr.msk.f32.gmra.mrb[6].mxu0 %vm478_vm0, %v463_v20 }
  0x69   : > { %3601 = vmatmul.mubr.msk.f32.gmra.mrb[6].mxu1 %vm478_vm0, %v3309_v21  ;;  %3571 = vmatprep.mubr.msk.f32.mxu0 %vm478_vm0, %v464_v22 }
  0x6a   : > { %3603 = vmatprep.mubr.msk.f32.mxu1 %vm478_vm0, %v3310_v23 }
  0x6c   : > { %3572 = vmatmul.mubr.msk.f32.gmra.mrb[8].mxu0 %vm478_vm0, %v465_v24 }
  0x6d   : > { %3604 = vmatmul.mubr.msk.f32.gmra.mrb[8].mxu1 %vm478_vm0, %v3311_v25  ;;  %3574 = vmatprep.mubr.msk.f32.mxu0 %vm478_vm0, %v466_v26 }
  0x6e   : > { %3606 = vmatprep.mubr.msk.f32.mxu1 %vm478_vm0, %v3312_v27 }
  0x70   : > { %3575 = vmatmul.mubr.msk.f32.gmra.mrb[10].mxu0 %vm478_vm0, %v467_v28  ;;  %v4686_v28 = vshrl.u32 %v1143_v18, 7 }
  0x71   : > { %3607 = vmatmul.mubr.msk.f32.gmra.mrb[10].mxu1 %vm478_vm0, %v3313_v29  ;;  %3577 = vmatprep.mubr.msk.f32.mxu0 %vm478_vm0, %v468_v30 }
  0x72   : > { %3609 = vmatprep.mubr.msk.f32.mxu1 %vm478_vm0, %v3314_v31  ;;  %vm1166_vm1 = vcmp.lt.s32.totalorder %v4686_v28, 1  ;;  %vm1175_vm2 = vcmp.ge.s32.totalorder %v4686_v28, 1  ;;  %vm1237_vm3 = vcmp.lt.s32.totalorder %v4686_v28, 7 }
  0x74   : > { %3578 = vmatmul.mubr.msk.f32.gmra.mrb[12].mxu0 %vm478_vm0, %v469_v32 }
  0x75   : > { %3610 = vmatmul.mubr.msk.f32.gmra.mrb[12].mxu1 %vm478_vm0, %v3315_v33  ;;  %3580 = vmatprep.mubr.msk.f32.mxu0 %vm478_vm0, %v470_v34 }
  0x76   : > { %3612 = vmatprep.mubr.msk.f32.mxu1 %vm478_vm0, %v3316_v35 }
  0x78   : > { %3581 = vmatmul.mubr.msk.f32.gmra.mrb[14].mxu0 %vm478_vm0, %v471_v36 }
  0x79   : > { %3613 = vmatmul.mubr.msk.f32.gmra.mrb[14].mxu1 %vm478_vm0, %v3317_v37  ;;  %v6746_v37 = vsub.s32 0, %v4686_v28 }
 0x12f   : > { %v3561_v39 = vpop.f32.mrb[0].mxu0 }
 0x130   : > { %v3593_v40 = vpop.f32.mrb[0].mxu1  ;;  %v4619_v41 = vadd.f32 %v3561_v39, %v4616_v38  ;;  %v593_v43 = vpop.f32.mrb[1].mxu0 }
 0x131   : > { %v4622_v42 = vadd.f32 %v3593_v40, %v4616_v38  ;;  %v932_v44 = vpop.f32.mrb[1].mxu1  ;;  %v4625_v45 = vadd.f32 %v4616_v38, %v593_v43  ;;  %v4696_v43 = vld [vmem:[%s6729_s4] sm:$0xff] }
 0x132   : > { %v4628_v46 = vadd.f32 %v4616_v38, %v932_v44  ;;  %v3287_v47 = vmul.f32 -1.442695, %v4619_v41  ;;  %v1211_v44 = vsub.s32 1, %v4686_v28 }
 0x133   : > { %v3335_v48 = vmul.f32 -1.442695, %v4622_v42  ;;  %v3286_v49 = vmul.f32 -1.442695, %v4625_v45  ;;  %v3564_v51 = vpop.f32.mrb[2].mxu0 }
 0x134   : > { %v3334_v50 = vmul.f32 -1.442695, %v4628_v46  ;;  %v3596_v52 = vpop.f32.mrb[2].mxu1  ;;  %3935 = vpow2.f32 %v3287_v47  ;;  %v603_v53 = vpop.f32.mrb[3].mxu0  ;;  %v4635_v55 = vadd.f32 %v3564_v51, %v4616_v38  ;;  %v1262_v47 = vsub.s32 2, %v4686_v28 }
 0x135   : > { %v942_v54 = vpop.f32.mrb[3].mxu1  ;;  %3937 = vpow2.f32 %v3335_v48  ;;  %v4638_v56 = vadd.f32 %v3596_v52, %v4616_v38  ;;  %v4641_v57 = vadd.f32 %v4616_v38, %v603_v53 }
 0x136   : > { %3939 = vpow2.f32 %v3286_v49  ;;  %v4644_v60 = vadd.f32 %v4616_v38, %v942_v54  ;;  %v3289_v63 = vmul.f32 -1.442695, %v4635_v55  ;;  %v4706_v54 = vrot.slane %v4696_v43, %v6746_v37 }
 0x137   : > { %3941 = vpow2.f32 %v3334_v50  ;;  %v3567_v58 = vpop.f32.mrb[4].mxu0  ;;  %v3337_v0 = vmul.f32 -1.442695, %v4638_v56  ;;  %v3288_v1 = vmul.f32 -1.442695, %v4641_v57 }
 0x138   : > { %v3599_v59 = vpop.f32.mrb[4].mxu1  ;;  %v613_v61 = vpop.f32.mrb[5].mxu0  ;;  %v3336_v4 = vmul.f32 -1.442695, %v4644_v60  ;;  %3943 = vpow2.f32 %v3289_v63  ;;  %v4667_v20 = vadd.f32 %v3567_v58, %v4616_v38  ;;  %v4709_v58 = vadd.s32 8, %v4686_v28 }
 0x139   : > { %v952_v62 = vpop.f32.mrb[5].mxu1  ;;  %3945 = vpow2.f32 %v3337_v0  ;;  %v4670_v21 = vadd.f32 %v3599_v59, %v4616_v38  ;;  %v4675_v23 = vadd.f32 %v4616_v38, %v613_v61  ;;  %v4712_v61 = vrot.slane %v4696_v43, %v1211_v44 }
 0x13a   : > { %3947 = vpow2.f32 %v3288_v1  ;;  %v4682_v26 = vadd.f32 %v4616_v38, %v952_v62  ;;  %v3291_v29 = vmul.f32 -1.442695, %v4667_v20  ;;  %vm1247_vm4 = vcmp.lt.s32.totalorder %v4709_v58, 15 }
 0x13b   : > { %v4649_v2 = vpop.f32.mrb[6].mxu0  ;;  %3949 = vpow2.f32 %v3336_v4  ;;  %v3339_v31 = vmul.f32 -1.442695, %v4670_v21  ;;  %v3290_v33 = vmul.f32 -1.442695, %v4675_v23  ;;  %v1308_v44 = vsub.s32 4, %v4686_v28 }
 0x13c   : > { %v4651_v3 = vpop.f32.mrb[6].mxu1  ;;  %v4654_v5 = vpop.f32.mrb[7].mxu0  ;;  %v3338_v35 = vmul.f32 -1.442695, %v4682_v26 }
 0x13d   : > { %v4656_v6 = vpop.f32.mrb[7].mxu1 }
 0x13e   : > { %v3936_v7 = vpop.eup %3935 }
 0x13f   : > { %v3938_v8 = vpop.eup %3937  ;;  %v721_v9 = vadd.f32 1.0, %v3936_v7  ;;  %v4658_v10 = vpop.f32.mrb[8].mxu0 }
 0x140   : > { %v3940_v11 = vpop.eup %3939  ;;  %v1060_v12 = vadd.f32 1.0, %v3938_v8  ;;  %v4660_v13 = vpop.f32.mrb[8].mxu1 }
 0x141   : > { %v4662_v14 = vpop.f32.mrb[9].mxu0  ;;  %v3942_v15 = vpop.eup %3941  ;;  %3951 = vrcp.f32 %v721_v9  ;;  %v720_v16 = vadd.f32 1.0, %v3940_v11 }
 0x142   : > { %v4664_v17 = vpop.f32.mrb[9].mxu1  ;;  %3953 = vrcp.f32 %v1060_v12  ;;  %v1059_v19 = vadd.f32 1.0, %v3942_v15  ;;  %v3944_v30 = vpop.eup %3943 }
 0x143   : > { %3955 = vrcp.f32 %v720_v16  ;;  %v4672_v22 = vpop.f32.mrb[10].mxu0  ;;  %v3946_v32 = vpop.eup %3945  ;;  %v723_v39 = vadd.f32 1.0, %v3944_v30 }
 0x144   : > { %3957 = vrcp.f32 %v1059_v19  ;;  %v4677_v24 = vpop.f32.mrb[10].mxu1  ;;  %v4679_v25 = vpop.f32.mrb[11].mxu0  ;;  %v1062_v48 = vadd.f32 1.0, %v3946_v32 }
 0x145   : > { %v4684_v27 = vpop.f32.mrb[11].mxu1  ;;  %v3948_v34 = vpop.eup %3947  ;;  %3959 = vpow2.f32 %v3291_v29 }
 0x146   : > { %v3950_v36 = vpop.eup %3949  ;;  %3961 = vpow2.f32 %v3339_v31  ;;  %v722_v52 = vadd.f32 1.0, %v3948_v34 }
 0x147   : > { %3963 = vpow2.f32 %v3290_v33  ;;  %v1061_v59 = vadd.f32 1.0, %v3950_v36 }
 0x148   : > { %3965 = vpow2.f32 %v3338_v35 }
 0x149   : > { %3967 = vrcp.f32 %v723_v39 }
 0x14a   : > { %3969 = vrcp.f32 %v1062_v48 }
 0x14b   : > { %v3952_v40 = vpop.eup %3951  ;;  %3971 = vrcp.f32 %v722_v52 }
 0x14c   : > { %v3954_v49 = vpop.eup %3953  ;;  %v4701_v50 = vmul.f32 %v3952_v40, %v4619_v41  ;;  %v4715_v41 = vrot.slane %v4696_v43, %v1262_v47  ;;  %3973 = vrcp.f32 %v1061_v59  ;;  %v1288_v40 = vsub.s32 3, %v4686_v28 }
 0x14d   : > { %v3956_v51 = vpop.eup %3955  ;;  %v4718_v62 = vmul.f32 %v3954_v49, %v4622_v42 }
 0x14e   : > { %v3958_v53 = vpop.eup %3957  ;;  %v1163_v63 = vrot.slane %v4701_v50, 7  ;;  %v1234_v0 = vrot.slane %v4701_v50, 1  ;;  %v4723_v1 = vmul.f32 %v3956_v51, %v4625_v45  ;;  %v1216_v29 = vmul.f32 %v4712_v61, %v4701_v50 }
 0x14f   : > { %v4726_v4 = vmul.f32 %v3958_v53, %v4628_v46  ;;  %v1686_v45 = vrot.slane %v4718_v62, 7  ;;  %v1724_v8 = vrot.slane %v4718_v62, 1  ;;  %v3960_v11 = vpop.eup %3959 }
 0x150   : > { %6831 = vst [vmem:[#allocation18_spill] sm:$0xff] %v4723_v1  ;;  %v1159_v42 = vrot.slane %v4723_v1, 7  ;;  %v1230_v7 = vrot.slane %v4723_v1, 1  ;;  %v3962_v19 = vpop.eup %3961  ;;  %v1215_v35 = vmul.f32 %v4712_v61, %v4723_v1 }
 0x151   : > { %6832 = vst [vmem:[#allocation19_spill] sm:$0xff] %v4726_v4  ;;  %v1685_v46 = vrot.slane %v4726_v4, 7  ;;  %v1723_v9 = vrot.slane %v4726_v4, 1  ;;  %v3964_v33 = vpop.eup %3963 }
 0x152   : > { %v4740_v12 = vsel %vm1166_vm1, %v1159_v42, %v1163_v63  ;;  %v1172_v15 = vsel %vm1166_vm1, %v1163_v63, %v1159_v42  ;;  %v4746_v16 = vsel %vm1237_vm3, %v1230_v7, %v1234_v0  ;;  %v1243_v18 = vsel %vm1237_vm3, %v1234_v0, %v1230_v7  ;;  %v3966_v39 = vpop.eup %3965 }
 0x153   : > { %6833 = vst [vmem:[#allocation20_spill] sm:$0xff] %v4740_v12  ;;  %6834 = vst [vmem:[#allocation21_spill] sm:$0xff] %v4746_v16  ;;  %v4754_v30 = vsel %vm1175_vm2, %v1172_v15, 0.0  ;;  %v1196_v31 = vmul.f32 %v4706_v54, %v4740_v12  ;;  %v4760_v32 = vsel %vm1247_vm4, %v1243_v18, 0.0  ;;  %v4772_v48 = vsel %vm1166_vm1, %v1685_v46, %v1686_v45  ;;  %v3968_v49 = vpop.eup %3967 }
 0x154   : > { %6835 = vst [vmem:[#allocation22_spill] sm:$0xff] %v4754_v30  ;;  %6836 = vst [vmem:[#allocation23_spill] sm:$0xff] %v4760_v32  ;;  %v1195_v34 = vmul.f32 %v4706_v54, %v4754_v30  ;;  %v1267_v36 = vmul.f32 %v4715_v41, %v4760_v32  ;;  %v1266_v52 = vmul.f32 %v4715_v41, %v4746_v16  ;;  %v3970_v63 = vpop.eup %3969  ;;  %v1334_v0 = vsub.s32 5, %v4686_v28 }
 0x155   : > { %v1224_v47 = vadd.f32 %v1216_v29, %v1196_v31  ;;  %6837 = vst [vmem:[#allocation24_spill] sm:$0xff] %v4772_v48  ;;  %v1688_v53 = vsel %vm1166_vm1, %v1686_v45, %v1685_v46  ;;  %v4780_v59 = vsel %vm1237_vm3, %v1723_v9, %v1724_v8  ;;  %v1726_v15 = vsel %vm1237_vm3, %v1724_v8, %v1723_v9  ;;  %v3972_v31 = vpop.eup %3971 }
 0x156   : > { %v1223_v51 = vadd.f32 %v1215_v35, %v1195_v34  ;;  %6838 = vst [vmem:[#allocation25_spill] sm:$0xff] %v4780_v59  ;;  %v4787_v7 = vsel %vm1175_vm2, %v1688_v53, 0.0  ;;  %v4793_v45 = vsel %vm1247_vm4, %v1726_v15, 0.0  ;;  %v1887_v29 = vmul.f32 %v4712_v61, %v4726_v4  ;;  %v4810_v15 = vpop.f32.mrb[12].mxu0 }
 0x157   : > { %v4783_v42 = vadd.f32 %v1267_v36, %v1224_v47  ;;  %6839 = vst [vmem:[#allocation26_spill] sm:$0xff] %v4787_v7  ;;  %6840 = vst [vmem:[#allocation27_spill] sm:$0xff] %v4793_v45  ;;  %v1871_v46 = vmul.f32 %v4787_v7, %v4706_v54  ;;  %v1888_v34 = vmul.f32 %v4712_v61, %v4718_v62  ;;  %v725_v9 = vadd.f32 1.0, %v3960_v11  ;;  %v3974_v36 = vpop.eup %3973 }
 0x158   : > { %v1274_v18 = vadd.f32 %v1266_v52, %v1223_v51  ;;  %v1872_v35 = vmul.f32 %v4772_v48, %v4706_v54  ;;  %v1928_v8 = vmul.f32 %v4793_v45, %v4715_v41  ;;  %v1927_v51 = vmul.f32 %v4780_v59, %v4715_v41  ;;  %6842 = vst [vmem:[#allocation29_spill] sm:$0xff] %v4810_v15 }
 0x159   : > { %v1895_v47 = vadd.f32 %v1887_v29, %v1871_v46  ;;  %v4808_v52 = vmul.f32 %v3968_v49, %v4635_v55  ;;  %v1064_v53 = vadd.f32 1.0, %v3962_v19  ;;  %v724_v32 = vadd.f32 1.0, %v3964_v33  ;;  %v4830_v33 = vpop.f32.mrb[12].mxu1 }
 0x15a   : > { %v1896_v7 = vadd.f32 %v1888_v34, %v1872_v35  ;;  %v4814_v48 = vrot.slane %v4696_v43, %v1288_v40  ;;  %v4817_v11 = vrot.slane %v4696_v43, %v1308_v44  ;;  %v4823_v55 = vrot.slane %v4696_v43, %v1334_v0  ;;  %6844 = vst [vmem:[#allocation31_spill] sm:$0xff] %v4830_v33 }
 0x15b   : > { %6841 = vst [vmem:[#allocation28_spill] sm:$0xff] %v4808_v52  ;;  %v4820_v29 = vadd.f32 %v1927_v51, %v1895_v47  ;;  %v4828_v49 = vmul.f32 %v3970_v63, %v4638_v56  ;;  %3975 = vrcp.f32 %v725_v9  ;;  %v1164_v40 = vrot.slane %v4808_v52, 7 }
 0x15c   : > { %v4825_v19 = vadd.f32 %v1928_v8, %v1896_v7  ;;  %v1235_v44 = vrot.slane %v4808_v52, 1  ;;  %v4835_v34 = vmul.f32 %v3972_v31, %v4641_v57  ;;  %3977 = vrcp.f32 %v1064_v53 }
 0x15d   : > { %6843 = vst [vmem:[#allocation30_spill] sm:$0xff] %v4828_v49  ;;  %v4838_v35 = vmul.f32 %v3974_v36, %v4644_v60  ;;  %3979 = vrcp.f32 %v724_v32  ;;  %v1063_v0 = vadd.f32 1.0, %v3966_v39  ;;  %v4842_v56 = vadd.f32 %v4649_v2, %v4616_v38 }
 0x15e   : > { %6845 = vst [vmem:[#allocation32_spill] sm:$0xff] %v4835_v34  ;;  %v1218_v63 = vmul.f32 %v4712_v61, %v4808_v52  ;;  %v1313_v7 = vmul.f32 %v4817_v11, %v4808_v52  ;;  %v1160_v8 = vrot.slane %v4835_v34, 7  ;;  %v1231_v57 = vrot.slane %v4835_v34, 1 }
 0x15f   : > { %6846 = vst [vmem:[#allocation33_spill] sm:$0xff] %v4838_v35  ;;  %6847 = vst [vmem:[#allocation34_spill] sm:$0xff] %v4842_v56  ;;  %v1851_v31 = vrot.slane %v4828_v49, 7  ;;  %v1890_v60 = vmul.f32 %v4712_v61, %v4828_v49  ;;  %v1907_v32 = vrot.slane %v4828_v49, 1  ;;  %v1217_v2 = vmul.f32 %v4712_v61, %v4835_v34 }
 0x160   : > { %v4858_v39 = vsel %vm1166_vm1, %v1160_v8, %v1164_v40  ;;  %v1173_v9 = vsel %vm1166_vm1, %v1164_v40, %v1160_v8  ;;  %v4864_v36 = vsel %vm1237_vm3, %v1231_v57, %v1235_v44  ;;  %v1244_v47 = vsel %vm1237_vm3, %v1235_v44, %v1231_v57 }
 0x161   : > { %6848 = vst [vmem:[#allocation35_spill] sm:$0xff] %v4858_v39  ;;  %6849 = vst [vmem:[#allocation36_spill] sm:$0xff] %v4864_v36  ;;  %v4870_v51 = vsel %vm1175_vm2, %v1173_v9, 0.0  ;;  %v1198_v53 = vmul.f32 %v4706_v54, %v4858_v39  ;;  %v4876_v37 = vsel %vm1247_vm4, %v1244_v47, 0.0  ;;  %v1847_v40 = vrot.slane %v4838_v35, 7 }
 0x162   : > { %6850 = vst [vmem:[#allocation37_spill] sm:$0xff] %v4870_v51  ;;  %6851 = vst [vmem:[#allocation38_spill] sm:$0xff] %v4876_v37  ;;  %v1197_v8 = vmul.f32 %v4706_v54, %v4870_v51  ;;  %v1269_v46 = vmul.f32 %v4715_v41, %v4876_v37  ;;  %v1292_v44 = vmul.f32 %v4814_v48, %v4870_v51  ;;  %v1903_v15 = vrot.slane %v4838_v35, 1 }
 0x163   : > { %v1293_v57 = vmul.f32 %v4814_v48, %v4858_v39  ;;  %v1226_v9 = vadd.f32 %v1218_v63, %v1198_v53  ;;  %v1312_v33 = vmul.f32 %v4817_v11, %v4835_v34  ;;  %v1889_v47 = vmul.f32 %v4712_v61, %v4838_v35 }
 0x164   : > { %v1225_v52 = vadd.f32 %v1217_v2, %v1197_v8  ;;  %v1268_v45 = vmul.f32 %v4715_v41, %v4864_v36  ;;  %v1300_v59 = vadd.f32 %v1292_v44, %v1274_v18  ;;  %v1338_v63 = vmul.f32 %v4823_v55, %v4864_v36 }
 0x165   : > { %v1301_v16 = vadd.f32 %v1293_v57, %v4783_v42  ;;  %v3976_v51 = vpop.eup %3975  ;;  %v4895_v12 = vadd.f32 %v1269_v46, %v1226_v9  ;;  %v1339_v53 = vmul.f32 %v4823_v55, %v4876_v37  ;;  %v4903_v34 = vsel %vm1166_vm1, %v1847_v40, %v1851_v31 }
 0x166   : > { %6852 = vst [vmem:[#allocation39_spill] sm:$0xff] %v4903_v34  ;;  %v3978_v2 = vpop.eup %3977  ;;  %v4905_v8 = vadd.f32 %v1268_v45, %v1225_v52  ;;  %v1320_v39 = vadd.f32 %v1312_v33, %v1300_v59  ;;  %v1859_v42 = vsel %vm1166_vm1, %v1851_v31, %v1847_v40  ;;  %v1874_v57 = vmul.f32 %v4903_v34, %v4706_v54 }
 0x167   : > { %v1321_v18 = vadd.f32 %v1313_v7, %v1301_v16  ;;  %v3980_v46 = vpop.eup %3979  ;;  %v4911_v44 = vsel %vm1175_vm2, %v1859_v42, 0.0  ;;  %v4917_v9 = vsel %vm1237_vm3, %v1903_v15, %v1907_v32  ;;  %v1915_v45 = vsel %vm1237_vm3, %v1907_v32, %v1903_v15 }
 0x168   : > { %6853 = vst [vmem:[#allocation40_spill] sm:$0xff] %v4911_v44  ;;  %6854 = vst [vmem:[#allocation41_spill] sm:$0xff] %v4917_v9  ;;  %v4921_v59 = vadd.f32 %v1338_v63, %v1320_v39  ;;  %v1873_v52 = vmul.f32 %v4911_v44, %v4706_v54  ;;  %v4929_v33 = vsel %vm1247_vm4, %v1915_v45, 0.0  ;;  %v1898_v7 = vadd.f32 %v1890_v60, %v1874_v57 }
 0x169   : > { %v4923_v16 = vadd.f32 %v1339_v53, %v1321_v18  ;;  %6855 = vst [vmem:[#allocation42_spill] sm:$0xff] %v4929_v33  ;;  %v1930_v31 = vmul.f32 %v4929_v33, %v4715_v41  ;;  %v1949_v40 = vmul.f32 %v4911_v44, %v4814_v48  ;;  %3981 = vrcp.f32 %v1063_v0 }
 0x16a   : > { %v1897_v15 = vadd.f32 %v1889_v47, %v1873_v52  ;;  %v1929_v32 = vmul.f32 %v4917_v9, %v4715_v41  ;;  %v1950_v39 = vmul.f32 %v4903_v34, %v4814_v48  ;;  %v4941_v63 = vadd.f32 %v4651_v3, %v4616_v38  ;;  %v4955_v3 = vpop.f32.mrb[13].mxu0 }
 0x16b   : > { %v4943_v53 = vadd.f32 %v1930_v31, %v1898_v7  ;;  %v1957_v60 = vadd.f32 %v1949_v40, %v4820_v29  ;;  %v1965_v18 = vmul.f32 %v4817_v11, %v4838_v35  ;;  %v773_v0 = vmul.f32 %v3976_v51, %v4667_v20  ;;  %6857 = vst [vmem:[#allocation44_spill] sm:$0xff] %v4955_v3 }
 0x16c   : > { %6856 = vst [vmem:[#allocation43_spill] sm:$0xff] %v4941_v63  ;;  %v1966_v47 = vmul.f32 %v4817_v11, %v4828_v49  ;;  %v4951_v42 = vadd.f32 %v1929_v32, %v1897_v15  ;;  %v1958_v57 = vadd.f32 %v1950_v39, %v4825_v19  ;;  %v3293_v45 = vmul.f32 -1.442695, %v4842_v56 }
 0x16d   : > { %v1973_v52 = vadd.f32 %v1965_v18, %v1957_v60  ;;  %v1987_v29 = vmul.f32 %v4917_v9, %v4823_v55  ;;  %v4960_v7 = vmul.f32 %v3978_v2, %v4670_v21  ;;  %v772_v20 = vmul.f32 %v3980_v46, %v4675_v23 }
 0x16e   : > { %v6858_v51 = vsub.s32 6, %v4686_v28  ;;  %v6859_v19 = vsub.s32 7, %v4686_v28  ;;  %v1974_v15 = vadd.f32 %v1966_v47, %v1958_v57  ;;  %v1988_v32 = vmul.f32 %v4929_v33, %v4823_v55 }
 0x16f   : > { %v4975_v39 = vadd.f32 %v1987_v29, %v1973_v52  ;;  %v1165_v21 = vrot.slane %v773_v0, 7  ;;  %v1236_v2 = vrot.slane %v773_v0, 1  ;;  %v4978_v23 = vmul.f32 -1.442695, %v4941_v63 }
 0x170   : > { %v4966_v31 = vrot.slane %v4696_v43, %v6858_v51  ;;  %v4971_v40 = vrot.slane %v4696_v43, %v6859_v19  ;;  %v4980_v46 = vadd.f32 %v1988_v32, %v1974_v15  ;;  %v1220_v60 = vmul.f32 %v4712_v61, %v773_v0  ;;  %v4984_v43 = vpop.f32.mrb[13].mxu1 }
 0x171   : > { %v1315_v18 = vmul.f32 %v4817_v11, %v773_v0  ;;  %3983 = vpow2.f32 %v3293_v45  ;;  %6860 = vst [vmem:[#allocation45_spill] sm:$0xff] %v4984_v43  ;;  %v1852_v57 = vrot.slane %v4960_v7, 7  ;;  %v1161_v52 = vrot.slane %v772_v20, 7 }
 0x172   : > { %v1385_v47 = vmul.f32 %v4971_v40, %v773_v0  ;;  %v1232_v29 = vrot.slane %v772_v20, 1  ;;  %v1892_v51 = vmul.f32 %v4712_v61, %v4960_v7  ;;  %v1908_v19 = vrot.slane %v4960_v7, 1 }
 0x173   : > { %v1219_v15 = vmul.f32 %v4712_v61, %v772_v20  ;;  %v1314_v32 = vmul.f32 %v4817_v11, %v772_v20  ;;  %v3982_v33 = vpop.eup %3981  ;;  %v1170_v45 = vsel %vm1166_vm1, %v1161_v52, %v1165_v21  ;;  %v1174_v0 = vsel %vm1166_vm1, %v1165_v21, %v1161_v52 }
 0x174   : > { %v1241_v9 = vsel %vm1237_vm3, %v1232_v29, %v1236_v2  ;;  %v1245_v35 = vsel %vm1237_vm3, %v1236_v2, %v1232_v29  ;;  %v1187_v34 = vsel %vm1175_vm2, %v1174_v0, 0.0  ;;  %v1200_v43 = vmul.f32 %v4706_v54, %v1170_v45 }
 0x175   : > { %v1259_v63 = vsel %vm1247_vm4, %v1245_v35, 0.0  ;;  %v1384_v3 = vmul.f32 %v4971_v40, %v772_v20  ;;  %v1199_v44 = vmul.f32 %v4706_v54, %v1187_v34  ;;  %v1294_v52 = vmul.f32 %v4814_v48, %v1187_v34 }
 0x176   : > { %v1271_v21 = vmul.f32 %v4715_v41, %v1259_v63  ;;  %v1295_v37 = vmul.f32 %v4814_v48, %v1170_v45  ;;  %v1228_v36 = vadd.f32 %v1220_v60, %v1200_v43  ;;  %v1270_v2 = vmul.f32 %v4715_v41, %v1241_v9 }
 0x177   : > { %v1364_v29 = vmul.f32 %v4966_v31, %v1187_v34  ;;  %v1111_v0 = vmul.f32 %v3982_v33, %v4682_v26  ;;  %v1227_v49 = vadd.f32 %v1219_v15, %v1199_v44  ;;  %v1302_v35 = vadd.f32 %v1294_v52, %v4905_v8  ;;  %v5025_v34 = vld [vmem:[%s6729_s4 + $0x8] ss:$0 sm:$0xff] }
 0x178   : > { %v1303_v20 = vadd.f32 %v1295_v37, %v4895_v12  ;;  %v1365_v56 = vmul.f32 %v4966_v31, %v1170_v45  ;;  %v5017_v30 = vadd.f32 %v1271_v21, %v1228_v36  ;;  %v1340_v4 = vmul.f32 %v4823_v55, %v1241_v9 }
 0x179   : > { %v1341_v1 = vmul.f32 %v4823_v55, %v1259_v63  ;;  %v1372_v60 = vadd.f32 %v1364_v29, %v4921_v59  ;;  %v5027_v26 = vadd.f32 %v1270_v2, %v1227_v49  ;;  %v1322_v8 = vadd.f32 %v1314_v32, %v1302_v35 }
 0x17a   : > { %v1323_v44 = vadd.f32 %v1315_v18, %v1303_v20  ;;  %v1373_v37 = vadd.f32 %v1365_v56, %v4923_v16  ;;  %v1410_v33 = vmul.f32 %v5025_v34, %v1241_v9  ;;  %v1848_v43 = vrot.slane %v1111_v0, 7 }
 0x17b   : > { %v3984_v12 = vpop.eup %3983  ;;  %v1392_v36 = vadd.f32 %v1384_v3, %v1372_v60  ;;  %v1904_v15 = vrot.slane %v1111_v0, 1  ;;  %v5031_v45 = vadd.f32 %v1340_v4, %v1322_v8  ;;  %v1411_v52 = vmul.f32 %v5025_v34, %v1259_v63  ;;  %v5064_v8 = vpop.f32.mrb[14].mxu0 }
 0x17c   : > { %v5033_v59 = vadd.f32 %v1341_v1, %v1323_v44  ;;  %v1393_v21 = vadd.f32 %v1385_v47, %v1373_v37  ;;  %v1856_v49 = vsel %vm1166_vm1, %v1848_v43, %v1852_v57  ;;  %v1860_v56 = vsel %vm1166_vm1, %v1852_v57, %v1848_v43  ;;  %v5066_v44 = vpop.f32.mrb[14].mxu1 }
 0x17d   : > { %v5036_v29 = vadd.f32 %v1410_v33, %v1392_v36  ;;  %v1912_v9 = vsel %vm1237_vm3, %v1904_v15, %v1908_v19  ;;  %v1867_v1 = vsel %vm1175_vm2, %v1860_v56, 0.0  ;;  %v1876_v4 = vmul.f32 %v1856_v49, %v4706_v54  ;;  %6861 = vst [vmem:[#allocation46_spill] sm:$0xff] %v5066_v44 }
 0x17e   : > { %v5044_v16 = vadd.f32 %v1411_v52, %v1393_v21  ;;  %v1916_v63 = vsel %vm1237_vm3, %v1908_v19, %v1904_v15  ;;  %v1875_v3 = vmul.f32 %v1867_v1, %v4706_v54  ;;  %v1891_v18 = vmul.f32 %v4712_v61, %v1111_v0 }
 0x17f   : > { %v1924_v47 = vsel %vm1247_vm4, %v1916_v63, 0.0  ;;  %v5057_v57 = vadd.f32 %v4616_v38, %v4654_v5  ;;  %v1900_v32 = vadd.f32 %v1892_v51, %v1876_v4  ;;  %v1951_v35 = vmul.f32 %v1867_v1, %v4814_v48 }
 0x180   : > { %v1932_v2 = vmul.f32 %v1924_v47, %v4715_v41  ;;  %3985 = vpow2.f32 %v4978_v23  ;;  %v1899_v20 = vadd.f32 %v1891_v18, %v1875_v3  ;;  %v1931_v19 = vmul.f32 %v1912_v9, %v4715_v41  ;;  %v5088_v18 = vpop.f32.mrb[15].mxu0 }
 0x181   : > { %v1952_v60 = vmul.f32 %v1856_v49, %v4814_v48  ;;  %v1959_v5 = vadd.f32 %v1951_v35, %v4951_v42  ;;  %v1967_v51 = vmul.f32 %v4817_v11, %v1111_v0  ;;  %v5074_v36 = vadd.f32 %v4616_v38, %v4656_v6  ;;  %6862 = vst [vmem:[#allocation47_spill] sm:$0xff] %v5088_v18 }
 0x182   : > { %v5068_v37 = vadd.f32 %v1932_v2, %v1900_v32  ;;  %v1968_v23 = vmul.f32 %v4817_v11, %v4960_v7  ;;  %v5078_v33 = vadd.f32 %v1931_v19, %v1899_v20  ;;  %v2009_v15 = vmul.f32 %v1867_v1, %v4966_v31 }
 0x183   : > { %v1960_v43 = vadd.f32 %v1952_v60, %v4943_v53  ;;  %v1975_v21 = vadd.f32 %v1967_v51, %v1959_v5  ;;  %v1989_v52 = vmul.f32 %v1912_v9, %v4823_v55  ;;  %v2010_v42 = vmul.f32 %v1856_v49, %v4966_v31  ;;  %v5108_v51 = vpop.f32.mrb[15].mxu1 }
 0x184   : > { %v3292_v56 = vmul.f32 -1.442695, %v5057_v57  ;;  %v1990_v6 = vmul.f32 %v1924_v47, %v4823_v55  ;;  %v2017_v63 = vadd.f32 %v2009_v15, %v4975_v39  ;;  %v2025_v3 = vmul.f32 %v4971_v40, %v1111_v0  ;;  %6863 = vst [vmem:[#allocation48_spill] sm:$0xff] %v5108_v51 }
 0x185   : > { %v1976_v4 = vadd.f32 %v1968_v23, %v1960_v43  ;;  %v2026_v53 = vmul.f32 %v4971_v40, %v4960_v7  ;;  %v5092_v1 = vadd.f32 %v1989_v52, %v1975_v21  ;;  %v2018_v32 = vadd.f32 %v2010_v42, %v4980_v46 }
 0x186   : > { %v3340_v49 = vmul.f32 -1.442695, %v5074_v36  ;;  %v2033_v35 = vadd.f32 %v2025_v3, %v2017_v63  ;;  %v2047_v20 = vmul.f32 %v5025_v34, %v1912_v9  ;;  %v2048_v39 = vmul.f32 %v5025_v34, %v1924_v47  ;;  %v6875_v3 = vld [vmem:[#allocation18_spill] sm:$0xff] }
 0x187   : > { %v5096_v2 = vadd.f32 %v1990_v6, %v1976_v4  ;;  %v2034_v19 = vadd.f32 %v2026_v53, %v2018_v32  ;;  %v727_v60 = vadd.f32 1.0, %v3984_v12  ;;  %3987 = vpow2.f32 %v3292_v56  ;;  %v6877_v32 = vld [vmem:[#allocation19_spill] sm:$0xff] }
 0x188   : > { %v5100_v0 = vadd.f32 %v2047_v20, %v2033_v35  ;;  %3989 = vpow2.f32 %v3340_v49  ;;  %v5106_v46 = vadd.f32 %v4658_v10, %v4616_v38  ;;  %v5112_v9 = vadd.f32 %v4660_v13, %v4616_v38  ;;  %v5179_v49 = vld [vmem:[%s6730_s5] ss:$0 sm:$0xff] }
 0x189   : > { %v5102_v7 = vadd.f32 %v2048_v39, %v2034_v19  ;;  %3991 = vrcp.f32 %v727_v60  ;;  %v5116_v12 = vadd.f32 %v4616_v38, %v4662_v14  ;;  %v5120_v23 = vadd.f32 %v4616_v38, %v4664_v17  ;;  %v6879_v20 = vld [vmem:[#allocation22_spill] sm:$0xff] }
 0x18a   : > { %v3986_v5 = vpop.eup %3985  ;;  %6864 = vst [vmem:[#allocation49_spill] sm:$0xff] %v5112_v9  ;;  %v5124_v10 = vadd.f32 %v4672_v22, %v4616_v38  ;;  %v5128_v43 = vadd.f32 %v4677_v24, %v4616_v38  ;;  %v5132_v13 = vadd.f32 %v4616_v38, %v4679_v25  ;;  %v3295_v15 = vmul.f32 -1.442695, %v5106_v46 }
 0x18b   : > { %v1066_v47 = vadd.f32 1.0, %v3986_v5  ;;  %6865 = vst [vmem:[#allocation50_spill] sm:$0xff] %v5120_v23  ;;  %v5137_v14 = vadd.f32 %v4616_v38, %v4684_v27  ;;  %v3343_v17 = vmul.f32 -1.442695, %v5112_v9  ;;  %v3294_v22 = vmul.f32 -1.442695, %v5116_v12 }
 0x18c   : > { %6866 = vst [vmem:[#allocation51_spill] sm:$0xff] %v5124_v10  ;;  %6867 = vst [vmem:[#allocation52_spill] sm:$0xff] %v5128_v43  ;;  %v5142_v21 = vmul.f32 -1.442695, %v5120_v23  ;;  %v5145_v24 = vmul.f32 -1.442695, %v5124_v10  ;;  %v5155_v27 = vmul.f32 %v4817_v11, %v4701_v50  ;;  %v5159_v56 = vmul.f32 %v4971_v40, %v4718_v62 }
 0x18d   : > { %6868 = vst [vmem:[#allocation53_spill] sm:$0xff] %v5132_v13  ;;  %6869 = vst [vmem:[#allocation54_spill] sm:$0xff] %v5137_v14  ;;  %3993 = vrcp.f32 %v1066_v47  ;;  %v5148_v25 = vmul.f32 -1.442695, %v5128_v43  ;;  %v5151_v52 = vmul.f32 -1.442695, %v5132_v13  ;;  %v5166_v63 = vmul.f32 %v4817_v11, %v4718_v62 }
 0x18e   : > { %6871 = vst [vmem:[#allocation56_spill] sm:$0xff] %v5155_v27  ;;  %6872 = vst [vmem:[#allocation57_spill] sm:$0xff] %v5159_v56  ;;  %3995 = vpow2.f32 %v3295_v15  ;;  %v5162_v4 = vmul.f32 -1.442695, %v5137_v14  ;;  %v5170_v53 = vmul.f32 %v4817_v11, %v6875_v3  ;;  %v5174_v50 = vmul.f32 %v4971_v40, %v6877_v32  ;;  %v6881_v62 = vld [vmem:[#allocation20_spill] sm:$0xff]  ;;  %v6884_v5 = vld [vmem:[#allocation21_spill] sm:$0xff] }
 0x18f   : > { %6870 = vst [vmem:[#allocation55_spill] sm:$0xff] %v5148_v25  ;;  %6874 = vst [vmem:[#allocation59_spill] sm:$0xff] %v5166_v63  ;;  %v5183_v19 = vmul.f32 %v4814_v48, %v6879_v20  ;;  %v5187_v39 = vmul.f32 %v4814_v48, %v6881_v62  ;;  %v5191_v60 = vadd.f32 %v5179_v49, %v5036_v29  ;;  %3997 = vpow2.f32 %v3343_v17  ;;  %v6887_v20 = vld [vmem:[#allocation23_spill] sm:$0xff]  ;;  %v6889_v63 = vld [vmem:[#allocation24_spill] sm:$0xff] }
 0x190   : > { %6873 = vst [vmem:[#allocation58_spill] sm:$0xff] %v5162_v4  ;;  %6876 = vst [vmem:[#allocation18_spill] sm:$0xff] %v5170_v53  ;;  %v5195_v47 = vmul.f32 %v4823_v55, %v6884_v5  ;;  %v5199_v15 = vadd.f32 %v5179_v49, %v5044_v16  ;;  %v5203_v62 = vmul.f32 %v4823_v55, %v6887_v20  ;;  %v6891_v17 = vld [vmem:[#allocation25_spill] sm:$0xff]  ;;  %v6893_v5 = vld [vmem:[#allocation26_spill] sm:$0xff] }
 0x191   : > { %v3988_v42 = vpop.eup %3987  ;;  %6878 = vst [vmem:[#allocation19_spill] sm:$0xff] %v5174_v50  ;;  %6880 = vst [vmem:[#allocation22_spill] sm:$0xff] %v5183_v19  ;;  %v5207_v29 = vmul.f32 %v6889_v63, %v4966_v31  ;;  %v5211_v50 = vmul.f32 %v5025_v34, %v6891_v17  ;;  %v5215_v16 = vmul.f32 %v6893_v5, %v4966_v31 }
 0x192   : > { %v3990_v6 = vpop.eup %3989  ;;  %v726_v35 = vadd.f32 1.0, %v3988_v42  ;;  %6882 = vst [vmem:[#allocation20_spill] sm:$0xff] %v5187_v39  ;;  %6883 = vst [vmem:[#allocation60_spill] sm:$0xff] %v5191_v60  ;;  %v5223_v20 = vmul.f32 %v6893_v5, %v4814_v48  ;;  %v5227_v56 = vmul.f32 %v6889_v63, %v4814_v48  ;;  %v6902_v5 = vld [vmem:[#allocation28_spill] sm:$0xff]  ;;  %v3355_v63 = vmul.f32 -1.442695, %v5199_v15 }
 0x193   : > { %6885 = vst [vmem:[#allocation21_spill] sm:$0xff] %v5195_v47  ;;  %6886 = vst [vmem:[#allocation61_spill] sm:$0xff] %v5199_v15  ;;  %v1065_v42 = vadd.f32 1.0, %v3990_v6  ;;  %v3992_v3 = vpop.eup %3991  ;;  %v6913_v15 = vld [vmem:[#allocation36_spill] sm:$0xff] }
 0x194   : > { %3999 = vrcp.f32 %v726_v35  ;;  %6888 = vst [vmem:[#allocation23_spill] sm:$0xff] %v5203_v62  ;;  %6890 = vst [vmem:[#allocation24_spill] sm:$0xff] %v5207_v29  ;;  %v6895_v35 = vld [vmem:[#allocation27_spill] sm:$0xff] }
 0x195   : > { %6892 = vst [vmem:[#allocation25_spill] sm:$0xff] %v5211_v50  ;;  %4001 = vpow2.f32 %v3294_v22  ;;  %6894 = vst [vmem:[#allocation26_spill] sm:$0xff] %v5215_v16  ;;  %v5219_v6 = vmul.f32 %v5025_v34, %v6895_v35  ;;  %v5231_v50 = vmul.f32 %v4817_v11, %v6877_v32  ;;  %v5235_v22 = vmul.f32 %v6891_v17, %v4823_v55 }
 0x196   : > { %6897 = vst [vmem:[#allocation62_spill] sm:$0xff] %v5223_v20  ;;  %6898 = vst [vmem:[#allocation63_spill] sm:$0xff] %v5227_v56  ;;  %v5239_v16 = vmul.f32 %v6895_v35, %v4823_v55  ;;  %v5244_v20 = vmul.f32 %v4971_v40, %v6902_v5  ;;  %v6904_v56 = vld [vmem:[#allocation34_spill] sm:$0xff]  ;;  %4003 = vrcp.f32 %v1065_v42  ;;  %v6911_v5 = vld [vmem:[#allocation32_spill] sm:$0xff] }
 0x197   : > { %6896 = vst [vmem:[#allocation27_spill] sm:$0xff] %v5219_v6  ;;  %6899 = vst [vmem:[#allocation64_spill] sm:$0xff] %v5231_v50  ;;  %v3354_v6 = vmul.f32 -1.442695, %v5191_v60  ;;  %v775_v29 = vmul.f32 %v3992_v3, %v6904_v56  ;;  %v3994_v32 = vpop.eup %3993  ;;  %v6905_v50 = vld [vmem:[#allocation30_spill] sm:$0xff]  ;;  %v5266_v56 = vmul.f32 %v5025_v34, %v6913_v15  ;;  %v6917_v3 = vld [vmem:[#allocation29_spill] sm:$0xff]  ;;  %v5286_v15 = vadd.f32 %v5179_v49, %v5100_v0 }
 0x198   : > { %6900 = vst [vmem:[#allocation65_spill] sm:$0xff] %v5235_v22  ;;  %6901 = vst [vmem:[#allocation66_spill] sm:$0xff] %v5239_v16  ;;  %v5250_v17 = vmul.f32 %v4971_v40, %v6905_v50  ;;  %v6907_v22 = vld [vmem:[#allocation37_spill] sm:$0xff]  ;;  %v6909_v16 = vld [vmem:[#allocation35_spill] sm:$0xff] }
 0x199   : > { %6903 = vst [vmem:[#allocation28_spill] sm:$0xff] %v5244_v20  ;;  %v5254_v35 = vmul.f32 %v4966_v31, %v6907_v22  ;;  %v5258_v60 = vmul.f32 %v4966_v31, %v6909_v16  ;;  %v5262_v20 = vmul.f32 %v4971_v40, %v6911_v5  ;;  %6914 = vst [vmem:[#allocation32_spill] sm:$0xff] %v5266_v56  ;;  %v6915_v42 = vld [vmem:[#allocation38_spill] sm:$0xff]  ;;  %v6921_v5 = vld [vmem:[#allocation40_spill] sm:$0xff]  ;;  %4005 = vpow2.f32 %v3354_v6 }
 0x19a   : > { %6906 = vst [vmem:[#allocation34_spill] sm:$0xff] %v5250_v17  ;;  %v5270_v50 = vmul.f32 %v5025_v34, %v6915_v42  ;;  %v5274_v22 = vadd.f32 %v6917_v3, %v4616_v38  ;;  %v6919_v17 = vld [vmem:[#allocation31_spill] sm:$0xff]  ;;  %6923 = vst [vmem:[#allocation40_spill] sm:$0xff] %v5286_v15  ;;  %v6924_v42 = vld [vmem:[#allocation44_spill] sm:$0xff]  ;;  %4007 = vpow2.f32 %v3355_v63  ;;  %v1281_v3 = vrot.slane %v775_v29, 7 }
 0x19b   : > { %6908 = vst [vmem:[#allocation30_spill] sm:$0xff] %v5254_v35  ;;  %6910 = vst [vmem:[#allocation37_spill] sm:$0xff] %v5258_v60  ;;  %v5278_v16 = vadd.f32 %v6919_v17, %v4616_v38  ;;  %v3996_v60 = vpop.eup %3995  ;;  %v6926_v56 = vld [vmem:[#allocation43_spill] sm:$0xff]  ;;  %v1317_v62 = vmul.f32 %v4817_v11, %v775_v29  ;;  %v1327_v47 = vrot.slane %v775_v29, 1  ;;  %v1570_v6 = vmul.f32 %v4712_v61, %v775_v29 }
 0x19c   : > { %6912 = vst [vmem:[#allocation35_spill] sm:$0xff] %v5262_v20  ;;  %6916 = vst [vmem:[#allocation36_spill] sm:$0xff] %v5270_v50  ;;  %v5282_v20 = vmul.f32 %v6921_v5, %v4966_v31  ;;  %v5290_v50 = vadd.f32 %v4616_v38, %v6924_v42  ;;  %v5293_v35 = vmul.f32 %v3994_v32, %v6926_v56  ;;  %v3998_v17 = vpop.eup %3997  ;;  %v729_v27 = vadd.f32 1.0, %v3996_v60  ;;  %v6929_v32 = vld [vmem:[#allocation45_spill] sm:$0xff] }
 0x19d   : > { %6918 = vst [vmem:[#allocation38_spill] sm:$0xff] %v5274_v22  ;;  %6920 = vst [vmem:[#allocation29_spill] sm:$0xff] %v5278_v16  ;;  %v1387_v5 = vmul.f32 %v4971_v40, %v775_v29  ;;  %v5300_v42 = vmul.f32 -1.442695, %v5274_v22  ;;  %v5303_v63 = vmul.f32 -1.442695, %v5278_v16  ;;  %v5307_v56 = vadd.f32 %v4616_v38, %v6929_v32 }
 0x19e   : > { %6922 = vst [vmem:[#allocation31_spill] sm:$0xff] %v5282_v20  ;;  %6925 = vst [vmem:[#allocation44_spill] sm:$0xff] %v5290_v50  ;;  %v6778_v20 = vmov 0.0   ;;  %v4000_v0 = vpop.eup %3999  ;;  %v5310_v39 = vmul.f32 -1.442695, %v5286_v15  ;;  %4009 = vpow2.f32 %v5142_v21  ;;  %v5320_v16 = vmul.f32 %v4817_v11, %v5293_v35 }
 0x19f   : > { %3650 = vmatprep.subr.mxu1 %v6778_v20  ;;  %6927 = vst [vmem:[#allocation43_spill] sm:$0xff] %v5300_v42  ;;  %6928 = vst [vmem:[#allocation67_spill] sm:$0xff] %v5303_v63  ;;  %v4002_v53 = vpop.eup %4001  ;;  %v774_v29 = vmul.f32 %v4000_v0, %v5057_v57  ;;  %v5315_v60 = vmul.f32 -1.442695, %v5290_v50  ;;  %v1942_v20 = vrot.slane %v5293_v35, 7  ;;  %4011 = vpow2.f32 %v5145_v24 }
 0x1a0   : > { %6930 = vst [vmem:[#allocation45_spill] sm:$0xff] %v5307_v56  ;;  %v1068_v22 = vadd.f32 1.0, %v3998_v17  ;;  %4013 = vpow2.f32 %v5151_v52  ;;  %v4004_v57 = vpop.eup %4003  ;;  %v728_v50 = vadd.f32 1.0, %v4002_v53 }
 0x1a1   : > { %6931 = vst [vmem:[#allocation68_spill] sm:$0xff] %v5315_v60  ;;  %v1280_v32 = vrot.slane %v774_v29, 7  ;;  %v1326_v15 = vrot.slane %v774_v29, 1  ;;  %v1316_v21 = vmul.f32 %v4817_v11, %v774_v29  ;;  %v1386_v0 = vmul.f32 %v4971_v40, %v774_v29 }
 0x1a2   : > { %4015 = vrcp.f32 %v729_v27  ;;  %v1569_v53 = vmul.f32 %v4712_v61, %v774_v29 }
 0x1a3   : > { %v1282_v19 = vsel %vm1166_vm1, %v1280_v32, %v1281_v3  ;;  %v1283_v38 = vsel %vm1166_vm1, %v1281_v3, %v1280_v32  ;;  %v1328_v24 = vsel %vm1237_vm3, %v1326_v15, %v1327_v47  ;;  %v1329_v17 = vsel %vm1237_vm3, %v1327_v47, %v1326_v15  ;;  %v5341_v60 = vpop.eup %4005 }
 0x1a4   : > { %v1284_v52 = vsel %vm1175_vm2, %v1283_v38, 0.0  ;;  %v1297_v14 = vmul.f32 %v4814_v48, %v1282_v19  ;;  %v1331_v27 = vsel %vm1247_vm4, %v1329_v17, 0.0  ;;  %v1342_v32 = vmul.f32 %v4823_v55, %v1328_v24  ;;  %v5349_v15 = vpop.eup %4007 }
 0x1a5   : > { %v1296_v3 = vmul.f32 %v4814_v48, %v1284_v52  ;;  %v1366_v63 = vmul.f32 %v4966_v31, %v1284_v52  ;;  %v5347_v47 = vmul.f32 %v4004_v57, %v5074_v36  ;;  %v1343_v43 = vmul.f32 %v4823_v55, %v1331_v27 }
 0x1a6   : > { %v1305_v38 = vadd.f32 %v1297_v14, %v5017_v30  ;;  %v1367_v17 = vmul.f32 %v4966_v31, %v1282_v19  ;;  %v1412_v29 = vmul.f32 %v5025_v34, %v1328_v24  ;;  %v1553_v10 = vmul.f32 %v1284_v52, %v4706_v54 }
 0x1a7   : > { %v1304_v42 = vadd.f32 %v1296_v3, %v5027_v26  ;;  %v1374_v13 = vadd.f32 %v1366_v63, %v5031_v45  ;;  %v1554_v4 = vmul.f32 %v1282_v19, %v4706_v54  ;;  %v1413_v51 = vmul.f32 %v5025_v34, %v1331_v27 }
 0x1a8   : > { %v1325_v36 = vadd.f32 %v1317_v62, %v1305_v38  ;;  %v1375_v57 = vadd.f32 %v1367_v17, %v5033_v59  ;;  %v1609_v30 = vmul.f32 %v1328_v24, %v4715_v41  ;;  %v4010_v14 = vpop.eup %4009  ;;  %v1577_v9 = vadd.f32 %v1569_v53, %v1553_v10 }
 0x1a9   : > { %v1324_v23 = vadd.f32 %v1316_v21, %v1304_v42  ;;  %v1394_v25 = vadd.f32 %v1386_v0, %v1374_v13  ;;  %v1578_v18 = vadd.f32 %v1570_v6, %v1554_v4  ;;  %v5362_v44 = vpop.eup %4011  ;;  %v1610_v63 = vmul.f32 %v1331_v27, %v4715_v41 }
 0x1aa   : > { %v5364_v26 = vadd.f32 %v1343_v43, %v1325_v36  ;;  %v1395_v45 = vadd.f32 %v1387_v5, %v1375_v57  ;;  %v1941_v19 = vrot.slane %v5347_v47, 7  ;;  %v5368_v62 = vpop.eup %4013  ;;  %v5374_v24 = vadd.f32 %v1609_v30, %v1577_v9 }
 0x1ab   : > { %v5370_v59 = vadd.f32 %v1342_v32, %v1324_v23  ;;  %v5372_v52 = vadd.f32 %v1412_v29, %v1394_v25  ;;  %4017 = vrcp.f32 %v728_v50  ;;  %v5378_v4 = vadd.f32 %v1610_v63, %v1578_v18 }
 0x1ac   : > { %v4016_v10 = vpop.eup %4015  ;;  %v5376_v13 = vadd.f32 %v1413_v51, %v1395_v45  ;;  %v1943_v43 = vsel %vm1166_vm1, %v1941_v19, %v1942_v20  ;;  %v1944_v5 = vsel %vm1166_vm1, %v1942_v20, %v1941_v19  ;;  %v1979_v9 = vrot.slane %v5347_v47, 1 }
 0x1ad   : > { %v1945_v23 = vsel %vm1175_vm2, %v1944_v5, 0.0  ;;  %v1954_v25 = vmul.f32 %v1943_v43, %v4814_v48  ;;  %v1067_v6 = vadd.f32 1.0, %v4010_v14  ;;  %v2028_v51 = vmul.f32 %v4971_v40, %v5293_v35 }
 0x1ae   : > { %v2202_v18 = vmul.f32 %v4712_v61, %v5293_v35  ;;  %v1953_v50 = vmul.f32 %v1945_v23, %v4814_v48  ;;  %4019 = vrcp.f32 %v1068_v22  ;;  %v6932_v20 = vrot.slane %v5293_v35, 1 }
 0x1af   : > { %v1962_v42 = vadd.f32 %v1954_v25, %v5068_v37  ;;  %v2011_v53 = vmul.f32 %v1945_v23, %v4966_v31  ;;  %v1969_v32 = vmul.f32 %v4817_v11, %v5347_v47  ;;  %v2012_v22 = vmul.f32 %v1943_v43, %v4966_v31 }
 0x1b0   : > { %v1981_v21 = vsel %vm1237_vm3, %v1979_v9, %v6932_v20  ;;  %v6933_v0 = vmov %v6932_v20  ;;  %v1961_v3 = vadd.f32 %v1953_v50, %v5078_v33  ;;  %4021 = vrcp.f32 %v1067_v6 }
 0x1b1   : > { %v1982_v27 = vsel %vm1237_vm3, %v6933_v0, %v1979_v9  ;;  %v1978_v38 = vadd.f32 %v5320_v16, %v1962_v42  ;;  %v2019_v35 = vadd.f32 %v2011_v53, %v5092_v1  ;;  %v1991_v36 = vmul.f32 %v1981_v21, %v4823_v55 }
 0x1b2   : > { %v1984_v37 = vsel %vm1247_vm4, %v1982_v27, 0.0  ;;  %v1977_v29 = vadd.f32 %v1969_v32, %v1961_v3  ;;  %v2020_v33 = vadd.f32 %v2012_v22, %v5096_v2  ;;  %v2027_v57 = vmul.f32 %v4971_v40, %v5347_v47  ;;  %v6938_v32 = vld [vmem:[#allocation47_spill] sm:$0xff] }
 0x1b3   : > { %v1992_v17 = vmul.f32 %v1984_v37, %v4823_v55  ;;  %v2049_v14 = vmul.f32 %v5025_v34, %v1981_v21  ;;  %v2050_v45 = vmul.f32 %v5025_v34, %v1984_v37  ;;  %v2185_v16 = vmul.f32 %v1945_v23, %v4706_v54 }
 0x1b4   : > { %v5421_v63 = vadd.f32 %v1991_v36, %v1977_v29  ;;  %v2035_v1 = vadd.f32 %v2027_v57, %v2019_v35  ;;  %v2036_v19 = vadd.f32 %v2028_v51, %v2020_v33  ;;  %v2186_v5 = vmul.f32 %v1943_v43, %v4706_v54  ;;  %v6941_v29 = vld [vmem:[#allocation55_spill] sm:$0xff] }
 0x1b5   : > { %v5416_v30 = vadd.f32 %v1992_v17, %v1978_v38  ;;  %v4018_v25 = vpop.eup %4017  ;;  %v1464_v2 = vadd.f32 1.0, %v5341_v60  ;;  %v2201_v9 = vmul.f32 %v4712_v61, %v5347_v47  ;;  %v2242_v6 = vmul.f32 %v1984_v37, %v4715_v41  ;;  %v6940_v38 = vld [vmem:[#allocation49_spill] sm:$0xff] }
 0x1b6   : > { %v5429_v50 = vmul.f32 %v4016_v10, %v5106_v46  ;;  %v1465_v42 = vadd.f32 1.0, %v5349_v15  ;;  %v5432_v23 = vadd.f32 %v2049_v14, %v2035_v1  ;;  %v5434_v20 = vadd.f32 %v2050_v45, %v2036_v19  ;;  %v5451_v10 = vld [vmem:[%s6728_s3] ss:$0 sm:$0xff] }
 0x1b7   : > { %v2210_v51 = vadd.f32 %v2202_v18, %v2186_v5  ;;  %v5438_v43 = vadd.f32 %v5179_v49, %v5102_v7  ;;  %v2209_v60 = vadd.f32 %v2201_v9, %v2185_v16  ;;  %v2241_v0 = vmul.f32 %v1981_v21, %v4715_v41  ;;  %v6942_v5 = vld [vmem:[#allocation50_spill] sm:$0xff] }
 0x1b8   : > { %v5442_v47 = vmul.f32 -1.442695, %v5307_v56  ;;  %v4020_v27 = vpop.eup %4019  ;;  %4023 = vpow2.f32 %v5310_v39  ;;  %v731_v15 = vadd.f32 1.0, %v5362_v44  ;;  %v5455_v7 = vadd.f32 %v5451_v10, %v5064_v8  ;;  %v6936_v44 = vld [vmem:[#allocation46_spill] sm:$0xff] }
 0x1b9   : > { %6934 = vst [vmem:[#allocation69_spill] sm:$0xff] %v5438_v43  ;;  %v5445_v46 = vadd.f32 %v2242_v6, %v2210_v51  ;;  %4025 = vrcp.f32 %v1464_v2  ;;  %v5457_v18 = vadd.f32 %v2241_v0, %v2209_v60  ;;  %v1353_v21 = vrot.slane %v5429_v50, 7 }
 0x1ba   : > { %6935 = vst [vmem:[#allocation70_spill] sm:$0xff] %v5455_v7  ;;  %v776_v39 = vmul.f32 %v4018_v25, %v5116_v12  ;;  %4027 = vrcp.f32 %v1465_v42  ;;  %v1399_v53 = vrot.slane %v5429_v50, 1  ;;  %v5464_v3 = vadd.f32 %v5451_v10, %v6936_v44  ;;  %v4022_v8 = vpop.eup %4021 }
 0x1bb   : > { %v5468_v37 = vadd.f32 %v5451_v10, %v6938_v32  ;;  %v3371_v22 = vmul.f32 -1.442695, %v5438_v43  ;;  %v5472_v17 = vmul.f32 %v4020_v27, %v6940_v38  ;;  %4029 = vpow2.f32 %v6941_v29 }
 0x1bc   : > { %6937 = vst [vmem:[#allocation46_spill] sm:$0xff] %v5464_v3  ;;  %v1352_v35 = vrot.slane %v776_v39, 7  ;;  %v1398_v12 = vrot.slane %v776_v39, 1  ;;  %4031 = vrcp.f32 %v731_v15  ;;  %v730_v36 = vadd.f32 1.0, %v5368_v62 }
 0x1bd   : > { %6939 = vst [vmem:[#allocation47_spill] sm:$0xff] %v5468_v37  ;;  %v5477_v33 = vmul.f32 -1.442695, %v5455_v7  ;;  %v1389_v57 = vmul.f32 %v4971_v40, %v5429_v50  ;;  %v1572_v14 = vmul.f32 %v4712_v61, %v5429_v50  ;;  %v5493_v25 = vmul.f32 %v4022_v8, %v6942_v5 }
 0x1be   : > { %v1354_v45 = vsel %vm1166_vm1, %v1352_v35, %v1353_v21  ;;  %v1355_v16 = vsel %vm1166_vm1, %v1353_v21, %v1352_v35  ;;  %v1400_v19 = vsel %vm1237_vm3, %v1398_v12, %v1399_v53  ;;  %v2002_v2 = vrot.slane %v5472_v17, 7 }
 0x1bf   : > { %v1356_v1 = vsel %vm1175_vm2, %v1355_v16, 0.0  ;;  %v1369_v62 = vmul.f32 %v4966_v31, %v1354_v45  ;;  %v1388_v6 = vmul.f32 %v4971_v40, %v776_v39  ;;  %v1401_v42 = vsel %vm1237_vm3, %v1399_v53, %v1398_v12 }
 0x1c0   : > { %v1368_v9 = vmul.f32 %v4966_v31, %v1356_v1  ;;  %v1403_v60 = vsel %vm1247_vm4, %v1401_v42, 0.0  ;;  %v1555_v0 = vmul.f32 %v1356_v1, %v4706_v54  ;;  %v1556_v27 = vmul.f32 %v1354_v45, %v4706_v54 }
 0x1c1   : > { %v1377_v51 = vadd.f32 %v1369_v62, %v5364_v26  ;;  %v1414_v21 = vmul.f32 %v5025_v34, %v1400_v19  ;;  %v1415_v44 = vmul.f32 %v5025_v34, %v1403_v60  ;;  %v1571_v32 = vmul.f32 %v4712_v61, %v776_v39 }
 0x1c2   : > { %v1376_v15 = vadd.f32 %v1368_v9, %v5370_v59  ;;  %v5509_v8 = vpop.eup %4023  ;;  %v1580_v38 = vadd.f32 %v1572_v14, %v1556_v27  ;;  %v1612_v26 = vmul.f32 %v1403_v60, %v4715_v41  ;;  %v1631_v35 = vmul.f32 %v1356_v1, %v4814_v48 }
 0x1c3   : > { %v1397_v53 = vadd.f32 %v1389_v57, %v1377_v51  ;;  %v5513_v29 = vpop.eup %4025  ;;  %v1579_v16 = vadd.f32 %v1571_v32, %v1555_v0  ;;  %v1611_v59 = vmul.f32 %v1400_v19, %v4715_v41  ;;  %v1632_v62 = vmul.f32 %v1354_v45, %v4814_v48 }
 0x1c4   : > { %6943 = vst [vmem:[#allocation49_spill] sm:$0xff] %v5513_v29  ;;  %v1396_v12 = vadd.f32 %v1388_v6, %v1376_v15  ;;  %v5517_v5 = vpop.eup %4027  ;;  %v5521_v42 = vadd.f32 %v1612_v26, %v1580_v38  ;;  %v1639_v57 = vadd.f32 %v1631_v35, %v5374_v24  ;;  %v1647_v14 = vmul.f32 %v4817_v11, %v776_v39 }
 0x1c5   : > { %6944 = vst [vmem:[#allocation55_spill] sm:$0xff] %v5517_v5  ;;  %v5519_v9 = vadd.f32 %v1415_v44, %v1397_v53  ;;  %v4030_v51 = vpop.eup %4029  ;;  %v1648_v1 = vmul.f32 %v4817_v11, %v5429_v50  ;;  %v5529_v0 = vadd.f32 %v1611_v59, %v1579_v16  ;;  %v1640_v45 = vadd.f32 %v1632_v62, %v5378_v4  ;;  %v6945_v4 = vld [vmem:[#allocation48_spill] sm:$0xff] }
 0x1c6   : > { %v5527_v6 = vadd.f32 %v1414_v21, %v1396_v12  ;;  %v4032_v27 = vpop.eup %4031  ;;  %4033 = vpow2.f32 %v3371_v22  ;;  %v1655_v15 = vadd.f32 %v1647_v14, %v1639_v57  ;;  %v1669_v44 = vmul.f32 %v1400_v19, %v4823_v55 }
 0x1c7   : > { %v2001_v32 = vrot.slane %v5493_v25, 7  ;;  %v2040_v24 = vrot.slane %v5472_v17, 1  ;;  %v1656_v39 = vadd.f32 %v1648_v1, %v1640_v45  ;;  %v1670_v53 = vmul.f32 %v1403_v60, %v4823_v55  ;;  %v6948_v60 = vld [vmem:[#allocation58_spill] sm:$0xff] }
 0x1c8   : > { %v2039_v50 = vrot.slane %v5493_v25, 1  ;;  %v5537_v21 = vadd.f32 %v1669_v44, %v1655_v15  ;;  %4035 = vrcp.f32 %v730_v36  ;;  %v5543_v22 = vadd.f32 %v5451_v10, %v6945_v4 }
 0x1c9   : > { %v2003_v38 = vsel %vm1166_vm1, %v2001_v32, %v2002_v2  ;;  %v5547_v19 = vadd.f32 %v5179_v49, %v5372_v52  ;;  %v5549_v26 = vadd.f32 %v1670_v53, %v1656_v39  ;;  %v1070_v35 = vadd.f32 1.0, %v4030_v51 }
 0x1ca   : > { %6946 = vst [vmem:[#allocation50_spill] sm:$0xff] %v5543_v22  ;;  %4037 = vpow2.f32 %v6948_v60  ;;  %v5554_v12 = vadd.f32 %v5179_v49, %v5376_v13  ;;  %v2030_v36 = vmul.f32 %v4971_v40, %v5472_v17  ;;  %v2004_v10 = vsel %vm1166_vm1, %v2002_v2, %v2001_v32 }
 0x1cb   : > { %6947 = vst [vmem:[#allocation48_spill] sm:$0xff] %v5547_v19  ;;  %v2014_v16 = vmul.f32 %v2003_v38, %v4966_v31  ;;  %v2204_v52 = vmul.f32 %v4712_v61, %v5472_v17  ;;  %v2005_v59 = vsel %vm1175_vm2, %v2004_v10, 0.0  ;;  %v2041_v62 = vsel %vm1237_vm3, %v2039_v50, %v2040_v24 }
 0x1cc   : > { %6949 = vst [vmem:[#allocation58_spill] sm:$0xff] %v5554_v12  ;;  %v2042_v13 = vsel %vm1237_vm3, %v2040_v24, %v2039_v50  ;;  %v2280_v57 = vmul.f32 %v4817_v11, %v5472_v17  ;;  %v2013_v14 = vmul.f32 %v2005_v59, %v4966_v31  ;;  %v2029_v1 = vmul.f32 %v4971_v40, %v5493_v25 }
 0x1cd   : > { %v2022_v2 = vadd.f32 %v2014_v16, %v5416_v30  ;;  %v2044_v51 = vsel %vm1247_vm4, %v2042_v13, 0.0  ;;  %v2051_v45 = vmul.f32 %v5025_v34, %v2041_v62  ;;  %v2187_v15 = vmul.f32 %v2005_v59, %v4706_v54 }
 0x1ce   : > { %v2188_v44 = vmul.f32 %v2003_v38, %v4706_v54  ;;  %v2021_v32 = vadd.f32 %v2013_v14, %v5421_v63  ;;  %v2052_v17 = vmul.f32 %v5025_v34, %v2044_v51  ;;  %v2203_v30 = vmul.f32 %v4712_v61, %v5493_v25 }
 0x1cf   : > { %v2038_v24 = vadd.f32 %v2030_v36, %v2022_v2  ;;  %v2244_v53 = vmul.f32 %v2044_v51, %v4715_v41  ;;  %v2263_v50 = vmul.f32 %v2005_v59, %v4814_v48  ;;  %v2264_v4 = vmul.f32 %v2003_v38, %v4814_v48 }
 0x1d0   : > { %v2212_v39 = vadd.f32 %v2204_v52, %v2188_v44  ;;  %v4034_v60 = vpop.eup %4033  ;;  %v2037_v10 = vadd.f32 %v2029_v1, %v2021_v32  ;;  %v2211_v13 = vadd.f32 %v2203_v30, %v2187_v15  ;;  %v2243_v63 = vmul.f32 %v2041_v62, %v4715_v41  ;;  %v6950_v32 = vld [vmem:[#allocation51_spill] sm:$0xff] }
 0x1d1   : > { %v5587_v16 = vadd.f32 %v2052_v17, %v2038_v24  ;;  %v2271_v14 = vadd.f32 %v2263_v50, %v5457_v18  ;;  %v2272_v2 = vadd.f32 %v2264_v4, %v5445_v46  ;;  %v2279_v52 = vmul.f32 %v4817_v11, %v5493_v25 }
 0x1d2   : > { %v5590_v36 = vadd.f32 %v2244_v53, %v2212_v39  ;;  %v4036_v44 = vpop.eup %4035  ;;  %v3356_v59 = vmul.f32 -1.442695, %v5547_v19  ;;  %v5597_v38 = vadd.f32 %v2051_v45, %v2037_v10  ;;  %v5599_v1 = vadd.f32 %v2243_v63, %v2211_v13  ;;  %v6954_v10 = vld [vmem:[#allocation43_spill] sm:$0xff] }
 0x1d3   : > { %v779_v15 = vmul.f32 %v4032_v27, %v6950_v32  ;;  %v2287_v17 = vadd.f32 %v2279_v52, %v2271_v14  ;;  %v2288_v30 = vadd.f32 %v2280_v57, %v2272_v2  ;;  %v2301_v39 = vmul.f32 %v2041_v62, %v4823_v55  ;;  %v6953_v62 = vld [vmem:[#allocation53_spill] sm:$0xff] }
 0x1d4   : > { %v4038_v24 = vpop.eup %4037  ;;  %v2302_v18 = vmul.f32 %v2044_v51, %v4823_v55  ;;  %v3357_v46 = vmul.f32 -1.442695, %v5554_v12  ;;  %4039 = vrcp.f32 %v1070_v35  ;;  %v5606_v25 = vmul.f32 -1.442695, %v5464_v3 }
 0x1d5   : > { %v6951_v53 = vmov 0.0   ;;  %v5613_v50 = vadd.f32 %v5179_v49, %v5432_v23  ;;  %v5615_v27 = vadd.f32 %v2301_v39, %v2287_v17  ;;  %v778_v4 = vmul.f32 %v4036_v44, %v6953_v62 }
 0x1d6   : > { %v5609_v45 = vrot.slane %v6951_v53, 7  ;;  %v5617_v57 = vadd.f32 %v2302_v18, %v2288_v30  ;;  %v1535_v51 = vrot.slane %v779_v15, 7  ;;  %4041 = vpow2.f32 %v6954_v10  ;;  %3647 = vmatprep.mubr.msk.f32.mxu0 %vm4325_vm5, %v6951_v53  ;;  %3652 = vmatprep.mubr.msk.f32.mxu1 %vm4325_vm5, %v6951_v53 }
 0x1d7   : > { %6952 = vst [vmem:[#allocation51_spill] sm:$0xff] %v5613_v50  ;;  %v5622_v35 = vmul.f32 -1.442695, %v5468_v37  ;;  %v5625_v13 = vmul.f32 -1.442695, %v5543_v22  ;;  %v2095_v63 = vadd.f32 1.0, %v5509_v8  ;;  %4043 = vpow2.f32 %v3356_v59 }
 0x1d8   : > { %v5628_v14 = vadd.f32 1.0, %v4034_v60  ;;  %v1591_v23 = vrot.slane %v779_v15, 1  ;;  %4045 = vpow2.f32 %v3357_v46  ;;  %v5632_v2 = vadd.f32 %v5179_v49, %v5434_v20 }
 0x1d9   : > { %v1531_v52 = vrot.slane %v778_v4, 7  ;;  %v5637_v44 = vsel %vm1175_vm2, %v5609_v45, 0.0  ;;  %v3372_v32 = vmul.f32 -1.442695, %v5613_v50  ;;  %v1574_v17 = vmul.f32 %v4712_v61, %v779_v15 }
 0x1da   : > { %6955 = vst [vmem:[#allocation53_spill] sm:$0xff] %v5632_v2  ;;  %v1650_v8 = vmul.f32 %v4817_v11, %v779_v15  ;;  %v1587_v60 = vrot.slane %v778_v4, 1  ;;  %v1708_v59 = vmul.f32 %v4971_v40, %v779_v15  ;;  %v1069_v39 = vadd.f32 1.0, %v4038_v24 }
 0x1db   : > { %v1539_v30 = vsel %vm1166_vm1, %v1531_v52, %v1535_v51  ;;  %v1543_v20 = vsel %vm1166_vm1, %v1535_v51, %v1531_v52  ;;  %v1573_v50 = vmul.f32 %v4712_v61, %v778_v4  ;;  %v1649_v43 = vmul.f32 %v4817_v11, %v778_v4 }
 0x1dc   : > { %v1549_v18 = vsel %vm1175_vm2, %v1543_v20, 0.0  ;;  %v1558_v46 = vmul.f32 %v1539_v30, %v4706_v54  ;;  %v1595_v62 = vsel %vm1237_vm3, %v1587_v60, %v1591_v23  ;;  %v1599_v10 = vsel %vm1237_vm3, %v1591_v23, %v1587_v60 }
 0x1dd   : > { %v1557_v15 = vmul.f32 %v1549_v18, %v4706_v54  ;;  %v1606_v12 = vsel %vm1247_vm4, %v1599_v10, 0.0  ;;  %v1633_v24 = vmul.f32 %v1549_v18, %v4814_v48  ;;  %v1634_v20 = vmul.f32 %v1539_v30, %v4814_v48 }
 0x1de   : > { %v1582_v51 = vadd.f32 %v1574_v17, %v1558_v46  ;;  %v1614_v52 = vmul.f32 %v1606_v12, %v4715_v41  ;;  %v4040_v19 = vpop.eup %4039  ;;  %v1613_v23 = vmul.f32 %v1595_v62, %v4715_v41  ;;  %v1691_v29 = vmul.f32 %v1549_v18, %v4966_v31 }
 0x1df   : > { %v1581_v5 = vadd.f32 %v1573_v50, %v1557_v15  ;;  %v1641_v60 = vadd.f32 %v1633_v24, %v5529_v0  ;;  %v1642_v10 = vadd.f32 %v1634_v20, %v5521_v42  ;;  %v1692_v17 = vmul.f32 %v1539_v30, %v4966_v31 }
 0x1e0   : > { %v5665_v22 = vadd.f32 %v1614_v52, %v1582_v51  ;;  %v1707_v46 = vmul.f32 %v4971_v40, %v778_v4  ;;  %v4042_v37 = vpop.eup %4041  ;;  %v1671_v50 = vmul.f32 %v1595_v62, %v4823_v55  ;;  %v1699_v15 = vadd.f32 %v1691_v29, %v5537_v21  ;;  %v2466_v29 = vld [vmem:[%s6731_s6 + $0x8] sm:$0xff] }
 0x1e1   : > { %v5670_v3 = vadd.f32 %v1613_v23, %v1581_v5  ;;  %v1657_v7 = vadd.f32 %v1649_v43, %v1641_v60  ;;  %v4044_v56 = vpop.eup %4043  ;;  %v1658_v0 = vadd.f32 %v1650_v8, %v1642_v10  ;;  %v1672_v18 = vmul.f32 %v1606_v12, %v4823_v55  ;;  %v2465_v43 = vld [vmem:[%s6731_s6] sm:$0xff] }
 0x1e2   : > { %v1700_v24 = vadd.f32 %v1692_v17, %v5549_v26  ;;  %4047 = vrcp.f32 %v1069_v39  ;;  %v4046_v42 = vpop.eup %4045  ;;  %v1715_v30 = vadd.f32 %v1707_v46, %v1699_v15  ;;  %v1729_v4 = vmul.f32 %v5025_v34, %v1595_v62  ;;  %v2467_v39 = vld [vmem:[%s6731_s6 + $0x10] sm:$0xff]  ;;  %v2468_v62 = vld [vmem:[%s6731_s6 + $0x18] sm:$0xff] }
 0x1e3   : > { %v5676_v51 = vadd.f32 %v1671_v50, %v1657_v7  ;;  %v3373_v5 = vmul.f32 -1.442695, %v5632_v2  ;;  %v5686_v21 = vadd.f32 %v1672_v18, %v1658_v0  ;;  %v1730_v8 = vmul.f32 %v5025_v34, %v1606_v12 }
 0x1e4   : > { %v1716_v26 = vadd.f32 %v1708_v59, %v1700_v24  ;;  %v6799_v7 = vmov 0.0|0.0   ;;  %4049 = vrcp.f32 %v2095_v63  ;;  %v1737_v52 = vadd.f32 %v1729_v4, %v1715_v30  ;;  %v6958_v59 = vld [vmem:[#allocation52_spill] sm:$0xff]  ;;  %v6963_v30 = vld [vmem:[#allocation67_spill] sm:$0xff] }
 0x1e5   : > { %6956 = vst [vmem:[#allocation43_spill] sm:$0xff] %v5676_v51  ;;  %6957 = vst [vmem:[#allocation71_spill] sm:$0xff] %v5686_v21  ;;  %3783 = vmatprep.subr.bf16.mxu0 %v6799_v7  ;;  %v733_v20 = vadd.f32 1.0, %v4042_v37  ;;  %v3784_v23 = vpack.c.bf16 %v2466_v29, %v2465_v43  ;;  %4051 = vrcp.f32 %v5628_v14  ;;  %v5698_v60 = vmul.f32 %v4040_v19, %v6958_v59  ;;  %v2469_v19 = vld [vmem:[%s6731_s6 + $0x20] sm:$0xff]  ;;  %v6964_v43 = vld [vmem:[#allocation68_spill] sm:$0xff] }
 0x1e6   : > { %v1738_v34 = vadd.f32 %v1730_v8, %v1716_v26  ;;  %v5701_v12 = vrot.slane %v6951_v53, 1  ;;  %4053 = vpow2.f32 %v3372_v32  ;;  %v3787_v10 = vpack.c.bf16 %v2468_v62, %v2467_v39  ;;  %v2470_v32 = vld [vmem:[%s6731_s6 + $0x28] sm:$0xff]  ;;  %v6965_v59 = vld [vmem:[#allocation54_spill] sm:$0xff] }
 0x1e7   : > { %3785 = vmatpush3.bf16.msra.mxu0 %v3784_v23  ;;  %v1193_v17 = vmul.f32 %v4706_v54, %v5637_v44  ;;  %v1194_v63 = vmul.f32 %v4706_v54, %v5609_v45  ;;  %v5707_v37 = vadd.f32 1.0, %v4044_v56  ;;  %4055 = vpow2.f32 %v3373_v5  ;;  %v5752_v5 = vld [vmem:[%s6731_s6 + $0x40] sm:$0xff]  ;;  %v5757_v26 = vld [vmem:[%s6731_s6 + $0x48] sm:$0xff] }
 0x1e8   : > { %v5710_v14 = vadd.f32 %v5179_v49, %v1737_v52  ;;  %3786 = vmatprep.subr.bf16.mxu0 %v6799_v7  ;;  %v1213_v46 = vmul.f32 0.0, %v4712_v61  ;;  %v5720_v50 = vadd.f32 1.0, %v4046_v42  ;;  %v5724_v56 = vadd.f32 %v5179_v49, %v5527_v6  ;;  %v2471_v6 = vld [vmem:[%s6731_s6 + $0x30] sm:$0xff] }
 0x1e9   : > { %v5728_v15 = vadd.f32 %v5179_v49, %v5519_v9  ;;  %4057 = vrcp.f32 %v733_v20  ;;  %v2167_v0 = vrot.slane %v5698_v60, 7  ;;  %v2206_v18 = vmul.f32 %v4712_v61, %v5698_v60  ;;  %v2472_v9 = vld [vmem:[%s6731_s6 + $0x38] sm:$0xff]  ;;  %v5769_v52 = vld [vmem:[%s6731_s6 + $0x50] sm:$0xff] }
 0x1ea   : > { %6959 = vst [vmem:[#allocation52_spill] sm:$0xff] %v5710_v14  ;;  %6960 = vst [vmem:[#allocation72_spill] sm:$0xff] %v5724_v56  ;;  %v5734_v24 = vadd.f32 %v5179_v49, %v1738_v34  ;;  %4059 = vpow2.f32 %v6963_v30  ;;  %v2223_v42 = vrot.slane %v5698_v60, 1  ;;  %v5746_v4 = vmul.f32 %v4817_v11, %v5698_v60  ;;  %v5774_v20 = vld [vmem:[%s6731_s6 + $0x58] sm:$0xff] }
 0x1eb   : > { %6961 = vst [vmem:[#allocation73_spill] sm:$0xff] %v5728_v15  ;;  %4061 = vpow2.f32 %v6964_v43  ;;  %3788 = vmatpush3.bf16.msra.mxu0 %v3787_v10  ;;  %v3790_v29 = vpack.c.bf16 %v2470_v32, %v2469_v19  ;;  %v5761_v39 = vmul.f32 %v4971_v40, %v5698_v60  ;;  %v3360_v62 = vmul.f32 -1.442695, %v5710_v14 }
 0x1ec   : > { %6962 = vst [vmem:[#allocation74_spill] sm:$0xff] %v5734_v24  ;;  %v4048_v8 = vpop.eup %4047  ;;  %4063 = vpow2.f32 %v5442_v47  ;;  %3789 = vmatprep.subr.bf16.mxu0 %v6799_v7  ;;  %v1221_v23 = vadd.f32 %v1213_v46, %v1193_v17  ;;  %v3793_v34 = vpack.c.bf16 %v2472_v9, %v2471_v6  ;;  %v5781_v47 = vsel %vm1247_vm4, %v5701_v12, 0.0 }
 0x1ed   : > { %v1117_v60 = vmul.f32 %v4048_v8, %v6965_v59  ;;  %4065 = vpow2.f32 %v5477_v33  ;;  %v3361_v10 = vmul.f32 -1.442695, %v5734_v24  ;;  %v3796_v19 = vpack.c.bf16 %v5757_v26, %v5752_v5 }
 0x1ee   : > { %4067 = vpow2.f32 %v5606_v25  ;;  %v5787_v32 = vpop.eup %4049  ;;  %v1222_v25 = vadd.f32 %v1213_v46, %v1194_v63  ;;  %v1264_v9 = vmul.f32 %v4715_v41, %v5701_v12  ;;  %v1265_v43 = vmul.f32 %v4715_v41, %v5781_v47 }
 0x1ef   : > { %6966 = vst [vmem:[#allocation67_spill] sm:$0xff] %v5787_v32  ;;  %v2163_v17 = vrot.slane %v1117_v60, 7  ;;  %v2219_v30 = vrot.slane %v1117_v60, 1  ;;  %4069 = vpow2.f32 %v5622_v35  ;;  %3791 = vmatpush3.bf16.msra.mxu0 %v3790_v29  ;;  %v5793_v6 = vpop.eup %4051  ;;  %v6970_v2 = vmov 0.0|0.0  }
 0x1f0   : > { %6967 = vst [vmem:[#allocation68_spill] sm:$0xff] %v5793_v6  ;;  %4071 = vpow2.f32 %v3360_v62  ;;  %3792 = vmatprep.subr.bf16.mxu0 %v6799_v7  ;;  %v5801_v35 = vpop.eup %4053  ;;  %v2281_v7 = vmul.f32 %v4817_v11, %v1117_v60 }
 0x1f1   : > { %6968 = vst [vmem:[#allocation54_spill] sm:$0xff] %v5801_v35  ;;  %v2171_v29 = vsel %vm1166_vm1, %v2163_v17, %v2167_v0  ;;  %v2175_v5 = vsel %vm1166_vm1, %v2167_v0, %v2163_v17  ;;  %v2227_v26 = vsel %vm1237_vm3, %v2219_v30, %v2223_v42  ;;  %v2231_v63 = vsel %vm1237_vm3, %v2223_v42, %v2219_v30  ;;  %v5811_v46 = vpop.eup %4055 }
 0x1f2   : > { %6969 = vst [vmem:[#allocation75_spill] sm:$0xff] %v5811_v46  ;;  %4073 = vpow2.f32 %v3361_v10  ;;  %v2181_v53 = vsel %vm1175_vm2, %v2175_v5, 0.0  ;;  %v2190_v8 = vmul.f32 %v2171_v29, %v4706_v54  ;;  %v2238_v62 = vsel %vm1247_vm4, %v2231_v63, 0.0 }
 0x1f3   : > { %v5818_v59 = vpop.eup %4057  ;;  %v2189_v0 = vmul.f32 %v2181_v53, %v4706_v54  ;;  %v2205_v17 = vmul.f32 %v4712_v61, %v1117_v60  ;;  %v2246_v33 = vmul.f32 %v2238_v62, %v4715_v41  ;;  %v2265_v42 = vmul.f32 %v2181_v53, %v4814_v48  ;;  %3794 = vmatpush3.bf16.msra.mxu0 %v3793_v34 }
 0x1f4   : > { %v4060_v10 = vpop.eup %4059  ;;  %v2214_v30 = vadd.f32 %v2206_v18, %v2190_v8  ;;  %v2266_v5 = vmul.f32 %v2171_v29, %v4814_v48  ;;  %3795 = vmatprep.subr.bf16.mxu0 %v6970_v2  ;;  %v1272_v63 = vadd.f32 %v1264_v9, %v1221_v23  ;;  %v2245_v46 = vmul.f32 %v2227_v26, %v4715_v41 }
 0x1f5   : > { %v4062_v6 = vpop.eup %4061  ;;  %v2213_v32 = vadd.f32 %v2205_v17, %v2189_v0  ;;  %v2273_v35 = vadd.f32 %v2265_v42, %v5599_v1  ;;  %v2323_v24 = vmul.f32 %v2181_v53, %v4966_v31  ;;  %v2324_v34 = vmul.f32 %v2171_v29, %v4966_v31 }
 0x1f6   : > { %v4064_v14 = vpop.eup %4063  ;;  %v5830_v21 = vadd.f32 %v2246_v33, %v2214_v30  ;;  %v2274_v18 = vadd.f32 %v2266_v5, %v5590_v36  ;;  %v2339_v8 = vmul.f32 %v4971_v40, %v1117_v60  ;;  %v2303_v0 = vmul.f32 %v2227_v26, %v4823_v55  ;;  %v2477_v60 = vld [vmem:[%s6731_s6 + $0x60] sm:$0xff] }
 0x1f7   : > { %v5835_v51 = vpop.eup %4065  ;;  %v5837_v23 = vadd.f32 %v2245_v46, %v2213_v32  ;;  %v2289_v9 = vadd.f32 %v2281_v7, %v2273_v35  ;;  %v2331_v1 = vadd.f32 %v2323_v24, %v5615_v27  ;;  %3797 = vmatpush3.bf16.msra.mxu0 %v3796_v19  ;;  %v2304_v36 = vmul.f32 %v2238_v62, %v4823_v55  ;;  %v2478_v7 = vld [vmem:[%s6731_s6 + $0x68] sm:$0xff]  ;;  %v6971_v35 = vld [vmem:[#allocation22_spill] sm:$0xff] }
 0x1f8   : > { %v5841_v53 = vpop.eup %4067  ;;  %v2290_v33 = vadd.f32 %v5746_v4, %v2274_v18  ;;  %v2332_v29 = vadd.f32 %v2324_v34, %v5617_v57  ;;  %3798 = vmatprep.subr.bf16.mxu0 %v6970_v2  ;;  %v1273_v27 = vadd.f32 %v1265_v43, %v1222_v25  ;;  %v5860_v57 = vld [vmem:[%s6729_s4 + $0x8] ss:$0 sm:$0xff]  ;;  %v1298_v46 = vadd.f32 %v6971_v35, %v1272_v63 }
 0x1f9   : > { %v5853_v24 = vpop.eup %4069  ;;  %v5855_v19 = vadd.f32 %v2303_v0, %v2289_v9  ;;  %v2347_v4 = vadd.f32 %v2339_v8, %v2331_v1  ;;  %v2361_v32 = vmul.f32 %v5860_v57, %v2227_v26  ;;  %v2362_v25 = vmul.f32 %v5860_v57, %v2238_v62 }
 0x1fa   : > { %v4072_v17 = vpop.eup %4071  ;;  %v5864_v42 = vadd.f32 %v2304_v36, %v2290_v33  ;;  %v2348_v30 = vadd.f32 %v5761_v39, %v2332_v29  ;;  %v1072_v43 = vadd.f32 1.0, %v4060_v10  ;;  %4075 = vrcp.f32 %v5707_v37  ;;  %v2479_v37 = vld [vmem:[%s6731_s6 + $0x70] sm:$0xff]  ;;  %v6976_v10 = vld [vmem:[#allocation33_spill] sm:$0xff]  ;;  %v6977_v33 = vld [vmem:[#allocation18_spill] sm:$0xff] }
 0x1fb   : > { %v2369_v5 = vadd.f32 %v2361_v32, %v2347_v4  ;;  %v732_v18 = vadd.f32 1.0, %v4062_v6  ;;  %v6972_v34 = vpack.c.bf16 %v5774_v20, %v5769_v52  ;;  %v3802_v8 = vpack.c.bf16 %v2478_v7, %v2477_v60  ;;  %v2480_v52 = vld [vmem:[%s6731_s6 + $0x78] sm:$0xff]  ;;  %v6974_v20 = vld [vmem:[#allocation39_spill] sm:$0xff]  ;;  %v6979_v4 = vld [vmem:[#allocation56_spill] sm:$0xff] }
 0x1fc   : > { %v4074_v26 = vpop.eup %4073  ;;  %v3358_v63 = vmul.f32 -1.442695, %v5724_v56  ;;  %v5875_v9 = vadd.f32 %v5179_v49, %v5597_v38  ;;  %v2370_v39 = vadd.f32 %v2362_v25, %v2348_v30  ;;  %4077 = vrcp.f32 %v1072_v43  ;;  %v6975_v49 = vld [vmem:[#allocation20_spill] sm:$0xff]  ;;  %v6978_v29 = vld [vmem:[#allocation41_spill] sm:$0xff]  ;;  %v6983_v43 = vld [vmem:[#allocation23_spill] sm:$0xff] }
 0x1fd   : > { %3800 = vmatpush3.bf16.msra.mxu0 %v6972_v34  ;;  %v5886_v6 = vmul.f32 %v6974_v20, %v4966_v31  ;;  %v3359_v62 = vmul.f32 -1.442695, %v5728_v15  ;;  %4079 = vrcp.f32 %v732_v18  ;;  %v1299_v38 = vadd.f32 %v6975_v49, %v1273_v27  ;;  %v6980_v27 = vld [vmem:[#allocation42_spill] sm:$0xff]  ;;  %v6987_v20 = vld [vmem:[#allocation37_spill] sm:$0xff] }
 0x1fe   : > { %6973 = vst [vmem:[#allocation22_spill] sm:$0xff] %v5875_v9  ;;  %3801 = vmatprep.subr.bf16.mxu0 %v6970_v2  ;;  %v5892_v0 = vmul.f32 %v4971_v40, %v6976_v10  ;;  %v1071_v1 = vadd.f32 1.0, %v4064_v14  ;;  %4081 = vpow2.f32 %v5625_v13  ;;  %v1318_v36 = vadd.f32 %v6977_v33, %v1298_v46  ;;  %v6981_v13 = vld [vmem:[#allocation21_spill] sm:$0xff]  ;;  %v6990_v10 = vld [vmem:[#allocation28_spill] sm:$0xff] }
 0x1ff   : > { %v5898_v60 = vmul.f32 %v5860_v57, %v6978_v29  ;;  %4083 = vrcp.f32 %v5720_v50  ;;  %v3805_v7 = vpack.c.bf16 %v2480_v52, %v2479_v37  ;;  %v1319_v32 = vadd.f32 %v6979_v4, %v1299_v38  ;;  %v5912_v50 = vld [vmem:[%s6730_s5] ss:$0 sm:$0xff]  ;;  %v6992_v29 = vld [vmem:[#allocation32_spill] sm:$0xff] }
 0x200   : > { %v5904_v35 = vmul.f32 %v5860_v57, %v6980_v27  ;;  %4085 = vpow2.f32 %v3358_v63  ;;  %v3374_v14 = vmul.f32 -1.442695, %v5875_v9  ;;  %v1344_v46 = vadd.f32 %v6981_v13, %v1318_v36  ;;  %v6986_v37 = vld [vmem:[#allocation38_spill] sm:$0xff]  ;;  %v7005_v9 = vld [vmem:[#allocation45_spill] sm:$0xff] }
 0x201   : > { %3803 = vmatpush3.bf16.msra.mxu0 %v3802_v8  ;;  %4087 = vpow2.f32 %v3359_v62  ;;  %v1777_v30 = vadd.f32 1.0, %v4072_v17  ;;  %v5915_v25 = vadd.f32 %v5912_v50, %v2369_v5  ;;  %v1345_v18 = vadd.f32 %v6983_v43, %v1319_v32  ;;  %v2559_v5 = vld [vmem:[%s6733_s8] sm:$0x1f] }
 0x202   : > { %3804 = vmatprep.subr.bf16.mxu0 %v6970_v2  ;;  %v1778_v34 = vadd.f32 1.0, %v4074_v26  ;;  %v5919_v8 = vadd.f32 %v5912_v50, %v2370_v39  ;;  %4089 = vrcp.f32 %v1071_v1  ;;  %v6985_v2 = vld [vmem:[#allocation30_spill] sm:$0xff]  ;;  %v781_v17 = vmul.f32 %v5818_v59, %v6986_v37  ;;  %v6988_v39 = vld [vmem:[#allocation35_spill] sm:$0xff]  ;;  %3651 = vmatpush3.msk.msra.mxu1 %vm2565_vm6, %v2559_v5 }
 0x203   : > { %6982 = vst [vmem:[#allocation39_spill] sm:$0xff] %v5915_v25  ;;  %v1370_v63 = vadd.f32 %v6985_v2, %v1344_v46  ;;  %v735_v52 = vadd.f32 1.0, %v5835_v51  ;;  %v1371_v62 = vadd.f32 %v6987_v20, %v1345_v18  ;;  %4091 = vpow2.f32 %v3374_v14  ;;  %v6994_v14 = vld [vmem:[#allocation36_spill] sm:$0xff] }
 0x204   : > { %6984 = vst [vmem:[#allocation20_spill] sm:$0xff] %v5919_v8  ;;  %v1074_v26 = vadd.f32 1.0, %v5841_v53  ;;  %v5933_v38 = vmul.f32 %v4966_v31, %v5637_v44  ;;  %v5935_v59 = vpop.eup %4075  ;;  %4093 = vrcp.f32 %v1777_v30  ;;  %v3376_v51 = vmul.f32 -1.442695, %v5915_v25  ;;  %v6995_v30 = vld [vmem:[#allocation29_spill] sm:$0xff]  ;;  %v6996_v18 = vld [vmem:[#allocation44_spill] sm:$0xff] }
 0x205   : > { %3806 = vmatpush3.bf16.msra.mxu0 %v3805_v7  ;;  %v1390_v49 = vadd.f32 %v6988_v39, %v1370_v63  ;;  %6989 = vst [vmem:[#allocation33_spill] sm:$0xff] %v5935_v59  ;;  %v1391_v1 = vadd.f32 %v6990_v10, %v1371_v62  ;;  %v5941_v33 = vmul.f32 %v4966_v31, %v5609_v45  ;;  %4095 = vrcp.f32 %v1778_v34 }
 0x206   : > { %v4078_v36 = vpop.eup %4077  ;;  %v3377_v53 = vmul.f32 -1.442695, %v5919_v8  ;;  %v5948_v44 = vmul.f32 0.0, %v4971_v40  ;;  %v1536_v32 = vrot.slane %v781_v17, 7  ;;  %4097 = vrcp.f32 %v735_v52 }
 0x207   : > { %6991 = vst [vmem:[#allocation18_spill] sm:$0xff] %v5941_v33  ;;  %v5945_v7 = vadd.f32 %v6992_v29, %v1390_v49  ;;  %v4080_v4 = vpop.eup %4079  ;;  %v734_v27 = vadd.f32 1.0, %v5853_v24  ;;  %v5952_v13 = vadd.f32 %v6994_v14, %v1391_v1  ;;  %v1592_v46 = vrot.slane %v781_v17, 1 }
 0x208   : > { %6993 = vst [vmem:[#allocation41_spill] sm:$0xff] %v5948_v44  ;;  %v4082_v45 = vpop.eup %4081  ;;  %v5955_v43 = vmul.f32 %v4078_v36, %v6995_v30  ;;  %v780_v34 = vmul.f32 %v4080_v4, %v6996_v18  ;;  %4099 = vrcp.f32 %v1074_v26  ;;  %v1576_v63 = vmul.f32 %v4712_v61, %v781_v17 }
 0x209   : > { %v5958_v2 = vpop.eup %4083  ;;  %4101 = vpow2.f32 %v3376_v51  ;;  %v5963_v37 = vmul.f32 %v5860_v57, %v5701_v12  ;;  %v5967_v24 = vmul.f32 %v5860_v57, %v5781_v47  ;;  %v1652_v20 = vmul.f32 %v4817_v11, %v781_v17 }
 0x20a   : > { %6997 = vst [vmem:[#allocation56_spill] sm:$0xff] %v5958_v2  ;;  %v5969_v52 = vpop.eup %4085  ;;  %4103 = vpow2.f32 %v3377_v53  ;;  %v1532_v62 = vrot.slane %v780_v34, 7  ;;  %v1588_v5 = vrot.slane %v780_v34, 1  ;;  %v1710_v39 = vmul.f32 %v4971_v40, %v781_v17 }
 0x20b   : > { %6998 = vst [vmem:[#allocation42_spill] sm:$0xff] %v5963_v37  ;;  %6999 = vst [vmem:[#allocation21_spill] sm:$0xff] %v5967_v24  ;;  %v5972_v26 = vpop.eup %4087  ;;  %4105 = vrcp.f32 %v734_v27  ;;  %v1073_v49 = vadd.f32 1.0, %v4082_v45  ;;  %v5977_v12 = vadd.f32 %v5912_v50, %v5587_v16  ;;  %v2168_v47 = vrot.slane %v5955_v43, 7 }
 0x20c   : > { %7000 = vst [vmem:[#allocation23_spill] sm:$0xff] %v5969_v52  ;;  %7001 = vst [vmem:[#allocation30_spill] sm:$0xff] %v5972_v26  ;;  %v4090_v51 = vpop.eup %4089  ;;  %v1540_v10 = vsel %vm1166_vm1, %v1532_v62, %v1536_v32  ;;  %v1544_v1 = vsel %vm1166_vm1, %v1536_v32, %v1532_v62  ;;  %v1596_v36 = vsel %vm1237_vm3, %v1588_v5, %v1592_v46  ;;  %v2224_v17 = vrot.slane %v5955_v43, 1  ;;  %v7007_v52 = vld [vmem:[#allocation43_spill] sm:$0xff] }
 0x20d   : > { %7002 = vst [vmem:[#allocation38_spill] sm:$0xff] %v5977_v12  ;;  %v1551_v53 = vsel %vm1175_vm2, %v1544_v1, 0.0  ;;  %v1560_v16 = vmul.f32 %v1540_v10, %v4706_v54  ;;  %v1600_v29 = vsel %vm1237_vm3, %v1592_v46, %v1588_v5  ;;  %v5992_v4 = vpop.eup %4091  ;;  %v1575_v14 = vmul.f32 %v4712_v61, %v780_v34 }
 0x20e   : > { %7003 = vst [vmem:[#allocation37_spill] sm:$0xff] %v5992_v4  ;;  %v1559_v27 = vmul.f32 %v1551_v53, %v4706_v54  ;;  %v1608_v32 = vsel %vm1247_vm4, %v1600_v29, 0.0  ;;  %v1651_v45 = vmul.f32 %v4817_v11, %v780_v34  ;;  %v5999_v30 = vpop.eup %4093  ;;  %v1635_v1 = vmul.f32 %v1551_v53, %v4814_v48 }
 0x20f   : > { %7004 = vst [vmem:[#allocation35_spill] sm:$0xff] %v5999_v30  ;;  %v1584_v18 = vadd.f32 %v1576_v63, %v1560_v16  ;;  %v1616_v62 = vmul.f32 %v1608_v32, %v4715_v41  ;;  %v1119_v46 = vmul.f32 %v4090_v51, %v7005_v9  ;;  %v6004_v5 = vpop.eup %4095  ;;  %v1615_v56 = vmul.f32 %v1596_v36, %v4715_v41 }
 0x210   : > { %7006 = vst [vmem:[#allocation28_spill] sm:$0xff] %v6004_v5  ;;  %v1583_v15 = vadd.f32 %v1575_v14, %v1559_v27  ;;  %v1636_v2 = vmul.f32 %v1540_v10, %v4814_v48  ;;  %v1709_v29 = vmul.f32 %v4971_v40, %v780_v34  ;;  %v4098_v59 = vpop.eup %4097  ;;  %v1643_v63 = vadd.f32 %v1635_v1, %v5670_v3 }
 0x211   : > { %v6009_v4 = vadd.f32 %v1616_v62, %v1584_v18  ;;  %v1693_v16 = vmul.f32 %v1551_v53, %v4966_v31  ;;  %v1694_v26 = vmul.f32 %v1540_v10, %v4966_v31  ;;  %v1673_v27 = vmul.f32 %v1596_v36, %v4823_v55  ;;  %v7008_v62 = vld [vmem:[#allocation71_spill] sm:$0xff] }
 0x212   : > { %v4100_v8 = vpop.eup %4099  ;;  %v6014_v9 = vadd.f32 %v1615_v56, %v1583_v15  ;;  %v1644_v51 = vadd.f32 %v1636_v2, %v5665_v22  ;;  %v1674_v14 = vmul.f32 %v1608_v32, %v4823_v55  ;;  %v1659_v34 = vadd.f32 %v1651_v45, %v1643_v63 }
 0x213   : > { %v4102_v25 = vpop.eup %4101  ;;  %v1701_v18 = vadd.f32 %v1693_v16, %v7007_v52  ;;  %v1702_v5 = vadd.f32 %v1694_v26, %v7008_v62  ;;  %v2164_v3 = vrot.slane %v1119_v46, 7  ;;  %v1731_v10 = vmul.f32 %v5860_v57, %v1596_v36 }
 0x214   : > { %v4104_v1 = vpop.eup %4103  ;;  %v1660_v53 = vadd.f32 %v1652_v20, %v1644_v51  ;;  %v1732_v56 = vmul.f32 %v5860_v57, %v1608_v32  ;;  %v2220_v15 = vrot.slane %v1119_v46, 1  ;;  %v6023_v22 = vadd.f32 %v1673_v27, %v1659_v34 }
 0x215   : > { %v4106_v30 = vpop.eup %4105  ;;  %v1717_v2 = vadd.f32 %v1709_v29, %v1701_v18  ;;  %v1718_v24 = vadd.f32 %v1710_v39, %v1702_v5  ;;  %v2172_v45 = vsel %vm1166_vm1, %v2164_v3, %v2168_v47  ;;  %v2176_v52 = vsel %vm1166_vm1, %v2168_v47, %v2164_v3 }
 0x216   : > { %v6027_v63 = vadd.f32 %v1674_v14, %v1660_v53  ;;  %v6033_v20 = vsel %vm1237_vm3, %v2220_v15, %v2224_v17  ;;  %4107 = vrcp.f32 %v1073_v49  ;;  %v2183_v32 = vsel %vm1175_vm2, %v2176_v52, 0.0 }
 0x217   : > { %v1739_v26 = vadd.f32 %v1731_v10, %v1717_v2  ;;  %v1740_v36 = vadd.f32 %v1732_v56, %v1718_v24  ;;  %v2232_v39 = vsel %vm1237_vm3, %v2224_v17, %v2220_v15  ;;  %v2191_v5 = vmul.f32 %v2183_v32, %v4706_v54  ;;  %v7011_v10 = vld [vmem:[#allocation70_spill] sm:$0xff] }
 0x218   : > { %v2207_v29 = vmul.f32 %v4712_v61, %v1119_v46  ;;  %v2267_v16 = vmul.f32 %v2183_v32, %v4814_v48  ;;  %v2268_v47 = vmul.f32 %v2172_v45, %v4814_v48  ;;  %v2283_v49 = vmul.f32 %v4817_v11, %v1119_v46 }
 0x219   : > { %v6044_v51 = vadd.f32 %v5912_v50, %v1739_v26  ;;  %v2325_v24 = vmul.f32 %v2183_v32, %v4966_v31  ;;  %v6050_v27 = vadd.f32 %v5912_v50, %v5945_v7  ;;  %v6053_v17 = vadd.f32 %v5912_v50, %v1740_v36 }
 0x21a   : > { %v6055_v14 = vadd.f32 %v2207_v29, %v2191_v5  ;;  %v2275_v34 = vadd.f32 %v2267_v16, %v5837_v23  ;;  %v6059_v18 = vadd.f32 %v2268_v47, %v5830_v21  ;;  %v2409_v62 = vadd.f32 1.0, %v4102_v25  ;;  %v7013_v47 = vld [vmem:[#allocation47_spill] sm:$0xff] }
 0x21b   : > { %7009 = vst [vmem:[#allocation32_spill] sm:$0xff] %v6044_v51  ;;  %7010 = vst [vmem:[#allocation36_spill] sm:$0xff] %v6053_v17  ;;  %v2326_v3 = vmul.f32 %v2172_v45, %v4966_v31  ;;  %v2333_v53 = vadd.f32 %v2325_v24, %v5855_v19  ;;  %v783_v56 = vmul.f32 %v4098_v59, %v7011_v10  ;;  %v6067_v15 = vsel %vm1247_vm4, %v2232_v39, 0.0  ;;  %v7012_v39 = vld [vmem:[#allocation46_spill] sm:$0xff] }
 0x21c   : > { %v2192_v7 = vmul.f32 %v2172_v45, %v4706_v54  ;;  %v6069_v2 = vadd.f32 %v2283_v49, %v2275_v34  ;;  %v2341_v23 = vmul.f32 %v4971_v40, %v1119_v46  ;;  %v2208_v21 = vmul.f32 %v4712_v61, %v5955_v43 }
 0x21d   : > { %v2342_v25 = vmul.f32 %v4971_v40, %v5955_v43  ;;  %v3362_v19 = vmul.f32 -1.442695, %v6044_v51  ;;  %v2334_v59 = vadd.f32 %v2326_v3, %v5864_v42  ;;  %v6080_v45 = vmul.f32 %v4817_v11, %v5955_v43 }
 0x21e   : > { %v3363_v52 = vmul.f32 -1.442695, %v6053_v17  ;;  %v2349_v26 = vadd.f32 %v2341_v23, %v2333_v53  ;;  %v2363_v46 = vmul.f32 %v5860_v57, %v6033_v20  ;;  %4109 = vrcp.f32 %v2409_v62 }
 0x21f   : > { %v2350_v36 = vadd.f32 %v2342_v25, %v2334_v59  ;;  %v2364_v32 = vmul.f32 %v5860_v57, %v6067_v15  ;;  %v6088_v5 = vmul.f32 %v4100_v8, %v7012_v39  ;;  %v1626_v16 = vrot.slane %v783_v56, 7  ;;  %v7014_v59 = vld [vmem:[#allocation50_spill] sm:$0xff] }
 0x220   : > { %v4108_v29 = vpop.eup %4107  ;;  %v2371_v42 = vadd.f32 %v2363_v46, %v2349_v26  ;;  %v782_v43 = vmul.f32 %v4106_v30, %v7013_v47  ;;  %v2216_v49 = vadd.f32 %v2208_v21, %v2192_v7  ;;  %v6091_v24 = vadd.f32 1.0, %v4104_v1 }
 0x221   : > { %4111 = vpow2.f32 %v3362_v19  ;;  %v6093_v34 = vadd.f32 %v2364_v32, %v2350_v36  ;;  %v1664_v3 = vrot.slane %v783_v56, 1  ;;  %v1654_v62 = vmul.f32 %v4817_v11, %v783_v56 }
 0x222   : > { %4113 = vpow2.f32 %v3363_v52  ;;  %v1712_v53 = vmul.f32 %v4971_v40, %v783_v56  ;;  %v1625_v10 = vrot.slane %v782_v43, 7  ;;  %v1886_v8 = vmul.f32 %v4712_v61, %v783_v56 }
 0x223   : > { %v1663_v25 = vrot.slane %v782_v43, 1  ;;  %v6100_v30 = vmul.f32 %v4108_v29, %v7014_v59  ;;  %v6103_v1 = vadd.f32 %v5912_v50, %v2371_v42  ;;  %v1653_v19 = vmul.f32 %v4817_v11, %v782_v43 }
 0x224   : > { %v1627_v7 = vsel %vm1166_vm1, %v1625_v10, %v1626_v16  ;;  %v1628_v21 = vsel %vm1166_vm1, %v1626_v16, %v1625_v10  ;;  %v1711_v39 = vmul.f32 %v4971_v40, %v782_v43  ;;  %v1885_v29 = vmul.f32 %v4712_v61, %v782_v43 }
 0x225   : > { %7015 = vst [vmem:[#allocation29_spill] sm:$0xff] %v6103_v1  ;;  %v1629_v56 = vsel %vm1175_vm2, %v1628_v21, 0.0  ;;  %v1638_v52 = vmul.f32 %v1627_v7, %v4814_v48  ;;  %v1665_v26 = vsel %vm1237_vm3, %v1663_v25, %v1664_v3  ;;  %v1666_v46 = vsel %vm1237_vm3, %v1664_v3, %v1663_v25 }
 0x226   : > { %v1637_v36 = vmul.f32 %v1629_v56, %v4814_v48  ;;  %v1668_v32 = vsel %vm1247_vm4, %v1666_v46, 0.0  ;;  %v1695_v16 = vmul.f32 %v1629_v56, %v4966_v31  ;;  %v1696_v47 = vmul.f32 %v1627_v7, %v4966_v31 }
 0x227   : > { %v1646_v42 = vadd.f32 %v1638_v52, %v6009_v4  ;;  %v2247_v10 = vmul.f32 %v6033_v20, %v4715_v41  ;;  %v3378_v3 = vmul.f32 -1.442695, %v6103_v1  ;;  %v1675_v59 = vmul.f32 %v1665_v26, %v4823_v55 }
 0x228   : > { %v1645_v25 = vadd.f32 %v1637_v36, %v6014_v9  ;;  %v2248_v21 = vmul.f32 %v6067_v15, %v4715_v41  ;;  %v6132_v46 = vpop.eup %4109  ;;  %v1676_v4 = vmul.f32 %v1668_v32, %v4823_v55  ;;  %v1703_v43 = vadd.f32 %v1695_v16, %v6023_v22 }
 0x229   : > { %7016 = vst [vmem:[#allocation44_spill] sm:$0xff] %v6132_v46  ;;  %v1662_v61 = vadd.f32 %v1654_v62, %v1646_v42  ;;  %v1704_v52 = vadd.f32 %v1696_v47, %v6027_v63  ;;  %v1733_v17 = vmul.f32 %v5860_v57, %v1665_v26  ;;  %v1869_v1 = vmul.f32 %v1629_v56, %v4706_v54  ;;  %v7017_v63 = vld [vmem:[#allocation24_spill] sm:$0xff] }
 0x22a   : > { %v1661_v23 = vadd.f32 %v1653_v19, %v1645_v25  ;;  %v1870_v9 = vmul.f32 %v1627_v7, %v4706_v54  ;;  %v1719_v37 = vadd.f32 %v1711_v39, %v1703_v43  ;;  %v1734_v46 = vmul.f32 %v5860_v57, %v1668_v32  ;;  %v7018_v25 = vld [vmem:[#allocation26_spill] sm:$0xff]  ;;  %v7027_v43 = vld [vmem:[#allocation59_spill] sm:$0xff] }
 0x22b   : > { %v4112_v36 = vpop.eup %4111  ;;  %v1684_v51 = vadd.f32 %v1676_v4, %v1662_v61  ;;  %v1720_v44 = vadd.f32 %v1712_v53, %v1704_v52  ;;  %v1893_v33 = vadd.f32 %v1885_v29, %v1869_v1  ;;  %v1925_v22 = vmul.f32 %v1665_v26, %v4715_v41  ;;  %v7019_v61 = vld [vmem:[#allocation57_spill] sm:$0xff]  ;;  %v7020_v1 = vld [vmem:[#allocation19_spill] sm:$0xff]  ;;  %v7024_v29 = vld [vmem:[#allocation64_spill] sm:$0xff] }
 0x22c   : > { %v4114_v62 = vpop.eup %4113  ;;  %v1683_v42 = vadd.f32 %v1675_v59, %v1661_v23  ;;  %v1894_v12 = vadd.f32 %v1886_v8, %v1870_v9  ;;  %v1741_v16 = vadd.f32 %v1733_v17, %v1719_v37  ;;  %v1926_v56 = vmul.f32 %v1668_v32, %v4715_v41  ;;  %v7021_v41 = vld [vmem:[#allocation62_spill] sm:$0xff]  ;;  %v7023_v32 = vld [vmem:[#allocation25_spill] sm:$0xff] }
 0x22d   : > { %v1706_v19 = vadd.f32 %v7017_v63, %v1684_v51  ;;  %v1742_v47 = vadd.f32 %v1734_v46, %v1720_v44  ;;  %v1933_v7 = vadd.f32 %v1925_v22, %v1893_v33  ;;  %v2255_v39 = vadd.f32 %v2247_v10, %v6055_v14  ;;  %v7028_v63 = vld [vmem:[#allocation65_spill] sm:$0xff] }
 0x22e   : > { %v1705_v54 = vadd.f32 %v7018_v25, %v1683_v42  ;;  %v2256_v53 = vadd.f32 %v2248_v21, %v2216_v49  ;;  %4115 = vpow2.f32 %v3378_v3  ;;  %v6150_v8 = vadd.f32 %v5912_v50, %v1741_v16  ;;  %v7022_v49 = vld [vmem:[#allocation63_spill] sm:$0xff]  ;;  %v7029_v25 = vld [vmem:[#allocation66_spill] sm:$0xff] }
 0x22f   : > { %v6147_v4 = vadd.f32 %v7019_v61, %v1706_v19  ;;  %v1934_v23 = vadd.f32 %v1926_v56, %v1894_v12  ;;  %v6154_v44 = vadd.f32 %v5912_v50, %v1742_v47  ;;  %v1955_v37 = vadd.f32 %v7021_v41, %v1933_v7 }
 0x230   : > { %v1721_v51 = vadd.f32 %v7020_v1, %v1705_v54  ;;  %v2257_v33 = vrot.slane %v6100_v30, 7  ;;  %4117 = vrcp.f32 %v6091_v24  ;;  %v2286_v17 = vmul.f32 %v4817_v11, %v6088_v5 }
 0x231   : > { %v3364_v14 = vmul.f32 -1.442695, %v6150_v8  ;;  %v1956_v26 = vadd.f32 %v7022_v49, %v1934_v23  ;;  %v1971_v10 = vadd.f32 %v7024_v29, %v1955_v37  ;;  %v7025_v3 = vrot.slane %v6088_v5, 7  ;;  %v7030_v23 = vld [vmem:[#allocation31_spill] sm:$0xff] }
 0x232   : > { %v1743_v12 = vadd.f32 %v7023_v32, %v1721_v51  ;;  %v2296_v46 = vrot.slane %v6088_v5, 1  ;;  %v3365_v22 = vmul.f32 -1.442695, %v6154_v44  ;;  %v2344_v47 = vmul.f32 %v4971_v40, %v6088_v5 }
 0x233   : > { %v2259_v59 = vsel %vm1166_vm1, %v2257_v33, %v7025_v3  ;;  %v7026_v21 = vmov %v7025_v3  ;;  %v1972_v52 = vadd.f32 %v7027_v43, %v1956_v26  ;;  %4119 = vpow2.f32 %v3364_v14 }
 0x234   : > { %v2260_v24 = vsel %vm1166_vm1, %v7026_v21, %v2257_v33  ;;  %v2270_v42 = vmul.f32 %v2259_v59, %v4814_v48  ;;  %v1993_v19 = vadd.f32 %v7028_v63, %v1971_v10  ;;  %v6184_v56 = vadd.f32 %v5912_v50, %v1743_v12 }
 0x235   : > { %v2261_v9 = vsel %vm1175_vm2, %v2260_v24, 0.0  ;;  %v1994_v54 = vadd.f32 %v7029_v25, %v1972_v52  ;;  %v1779_v61 = vadd.f32 1.0, %v4112_v36  ;;  %v2285_v41 = vmul.f32 %v4817_v11, %v6100_v30 }
 0x236   : > { %v2269_v16 = vmul.f32 %v2261_v9, %v4814_v48  ;;  %v2278_v7 = vadd.f32 %v2270_v42, %v2256_v53  ;;  %v2015_v1 = vadd.f32 %v7030_v23, %v1993_v19  ;;  %v1780_v37 = vadd.f32 1.0, %v4114_v62 }
 0x237   : > { %v2016_v33 = vadd.f32 %v5886_v6, %v1994_v54  ;;  %v2292_v48 = vadd.f32 %v6080_v45, %v6059_v18  ;;  %4121 = vpow2.f32 %v3365_v22  ;;  %v2295_v53 = vrot.slane %v6100_v30, 1 }
 0x238   : > { %v2277_v51 = vadd.f32 %v2269_v16, %v2255_v39  ;;  %v2294_v5 = vadd.f32 %v2286_v17, %v2278_v7  ;;  %v2031_v14 = vadd.f32 %v5892_v0, %v2015_v1  ;;  %v4116_v36 = vpop.eup %4115  ;;  %v3366_v26 = vmul.f32 -1.442695, %v6184_v56  ;;  %v7031_v39 = vld [vmem:[#allocation34_spill] sm:$0xff] }
 0x239   : > { %v2032_v32 = vadd.f32 %v7031_v39, %v2016_v33  ;;  %v2305_v11 = vmul.f32 %v6033_v20, %v4823_v55  ;;  %v2306_v6 = vmul.f32 %v6067_v15, %v4823_v55  ;;  %v2297_v45 = vsel %vm1237_vm3, %v2295_v53, %v2296_v46 }
 0x23a   : > { %v2293_v49 = vadd.f32 %v2285_v41, %v2277_v51  ;;  %v2053_v18 = vadd.f32 %v5898_v60, %v2031_v14  ;;  %v2298_v0 = vsel %vm1237_vm3, %v2296_v46, %v2295_v53  ;;  %v2327_v62 = vmul.f32 %v2261_v9, %v4966_v31  ;;  %v6207_v17 = vpop.eup %4117  ;;  %v7034_v51 = vld [vmem:[#allocation41_spill] sm:$0xff] }
 0x23b   : > { %v2054_v12 = vadd.f32 %v5904_v35, %v2032_v32  ;;  %v2300_v20 = vsel %vm1247_vm4, %v2298_v0, 0.0  ;;  %v2307_v29 = vmul.f32 %v2297_v45, %v4823_v55  ;;  %v2313_v15 = vadd.f32 %v2305_v11, %v6069_v2  ;;  %v7037_v32 = vld [vmem:[#allocation21_spill] sm:$0xff] }
 0x23c   : > { %v6215_v60 = vadd.f32 %v5912_v50, %v2053_v18  ;;  %v2308_v10 = vmul.f32 %v2300_v20, %v4823_v55  ;;  %v2314_v3 = vadd.f32 %v2306_v6, %v2292_v48  ;;  %v2328_v21 = vmul.f32 %v2259_v59, %v4966_v31 }
 0x23d   : > { %v2411_v24 = vadd.f32 1.0, %v4116_v36  ;;  %v2315_v46 = vadd.f32 %v2307_v29, %v2293_v49  ;;  %v2335_v43 = vadd.f32 %v2327_v62, %v2313_v15  ;;  %v2343_v35 = vmul.f32 %v4971_v40, %v6100_v30  ;;  %v4120_v58 = vpop.eup %4119  ;;  %v7036_v49 = vld [vmem:[#allocation42_spill] sm:$0xff]  ;;  %v7038_v29 = vld [vmem:[#allocation52_spill] sm:$0xff]  ;;  %v7039_v15 = vld [vmem:[#allocation35_spill] sm:$0xff] }
 0x23e   : > { %4123 = vpow2.f32 %v3366_v26  ;;  %v3368_v52 = vmul.f32 -1.442695, %v6215_v60  ;;  %v2316_v9 = vadd.f32 %v2308_v10, %v2294_v5  ;;  %v2336_v2 = vadd.f32 %v2328_v21, %v2314_v3  ;;  %v7040_v3 = vld [vmem:[#allocation74_spill] sm:$0xff]  ;;  %v7041_v21 = vld [vmem:[#allocation28_spill] sm:$0xff] }
 0x23f   : > { %4125 = vrcp.f32 %v1779_v61  ;;  %v2351_v42 = vadd.f32 %v2343_v35, %v2335_v43  ;;  %v2365_v22 = vmul.f32 %v5860_v57, %v2297_v45  ;;  %v6225_v55 = vadd.f32 %v5912_v50, %v6093_v34 }
 0x240   : > { %4127 = vrcp.f32 %v1780_v37  ;;  %v1781_v31 = vadd.f32 1.0, %v4120_v58  ;;  %v2352_v59 = vadd.f32 %v2344_v47, %v2336_v2  ;;  %v2366_v63 = vmul.f32 %v5860_v57, %v2300_v20  ;;  %v7032_v47 = vld [vmem:[#allocation38_spill] sm:$0xff]  ;;  %v7042_v58 = vld [vmem:[#allocation32_spill] sm:$0xff] }
 0x241   : > { %4129 = vpow2.f32 %v3368_v52  ;;  %v2373_v40 = vadd.f32 %v2365_v22, %v2351_v42  ;;  %v3379_v30 = vmul.f32 -1.442695, %v6225_v55  ;;  %v6231_v19 = vadd.f32 %v5912_v50, %v5952_v13  ;;  %v4122_v16 = vpop.eup %4121  ;;  %v7033_v13 = vld [vmem:[#allocation18_spill] sm:$0xff] }
 0x242   : > { %4131 = vrcp.f32 %v2411_v24  ;;  %v2374_v25 = vadd.f32 %v2366_v63, %v2352_v59  ;;  %v3352_v54 = vmul.f32 -1.442695, %v6050_v27  ;;  %v2337_v34 = vadd.f32 %v5933_v38, %v2315_v46  ;;  %v7035_v38 = vld [vmem:[#allocation27_spill] sm:$0xff] }
 0x243   : > { %v6236_v7 = vadd.f32 %v5912_v50, %v2373_v40  ;;  %4133 = vpow2.f32 %v3379_v30  ;;  %v3353_v57 = vmul.f32 -1.442695, %v6231_v19  ;;  %v3375_v61 = vmul.f32 -1.442695, %v7032_v47 }
 0x244   : > { %v6241_v23 = vadd.f32 %v5912_v50, %v2374_v25  ;;  %4135 = vpow2.f32 %v3352_v54  ;;  %v2338_v1 = vadd.f32 %v7033_v13, %v2316_v9  ;;  %v2353_v41 = vadd.f32 %v7034_v51, %v2337_v34  ;;  %v7043_v54 = vld [vmem:[#allocation23_spill] sm:$0xff] }
 0x245   : > { %4137 = vrcp.f32 %v1781_v31  ;;  %v3380_v37 = vmul.f32 -1.442695, %v6236_v7  ;;  %v1744_v33 = vadd.f32 %v7035_v38, %v6147_v4  ;;  %v6249_v48 = vadd.f32 %v5912_v50, %v2054_v12  ;;  %v7047_v38 = vld [vmem:[#allocation36_spill] sm:$0xff] }
 0x246   : > { %v3381_v5 = vmul.f32 -1.442695, %v6241_v23  ;;  %4139 = vpow2.f32 %v3353_v57  ;;  %v2354_v14 = vadd.f32 %v7034_v51, %v2338_v1  ;;  %v2375_v53 = vadd.f32 %v7036_v49, %v2353_v41  ;;  %v7044_v57 = vld [vmem:[#allocation39_spill] sm:$0xff]  ;;  %v7046_v41 = vld [vmem:[#allocation20_spill] sm:$0xff] }
 0x247   : > { %4141 = vpow2.f32 %v3380_v37  ;;  %v6255_v36 = vadd.f32 %v5912_v50, %v1744_v33  ;;  %v3369_v26 = vmul.f32 -1.442695, %v6249_v48  ;;  %v1782_v18 = vadd.f32 1.0, %v4122_v16 }
 0x248   : > { %v4124_v39 = vpop.eup %4123  ;;  %4143 = vpow2.f32 %v3381_v5  ;;  %v2376_v4 = vadd.f32 %v7037_v32, %v2354_v14  ;;  %v6260_v11 = vadd.f32 %v5912_v50, %v2375_v53  ;;  %v6269_v10 = vmul.f32 %v7039_v15, %v7038_v29  ;;  %v7050_v15 = vld [vmem:[#allocation75_spill] sm:$0xff] }
 0x249   : > { %v4126_v6 = vpop.eup %4125  ;;  %v3367_v45 = vmul.f32 -1.442695, %v6255_v36  ;;  %4145 = vpow2.f32 %v3369_v26  ;;  %v6273_v24 = vmul.f32 %v7041_v21, %v7040_v3  ;;  %v1783_v46 = vadd.f32 1.0, %v4124_v39  ;;  %v7048_v26 = vld [vmem:[#allocation29_spill] sm:$0xff]  ;;  %v7051_v21 = vld [vmem:[#allocation30_spill] sm:$0xff] }
 0x24a   : > { %v4128_v0 = vpop.eup %4127  ;;  %v6264_v62 = vadd.f32 %v5912_v50, %v2376_v4  ;;  %v3382_v12 = vmul.f32 -1.442695, %v6260_v11  ;;  %4147 = vpow2.f32 %v3375_v61  ;;  %v6277_v52 = vmul.f32 %v4126_v6, %v7042_v58  ;;  %v7045_v61 = vld [vmem:[#allocation44_spill] sm:$0xff]  ;;  %v7049_v6 = vld [vmem:[#allocation54_spill] sm:$0xff] }
 0x24b   : > { %v4130_v20 = vpop.eup %4129  ;;  %4149 = vpow2.f32 %v3367_v45  ;;  %v1818_v31 = vadd.f32 %v6273_v24, %v6269_v10  ;;  %v1468_v34 = vadd.f32 1.0, %v7043_v54  ;;  %v6285_v13 = vmul.f32 %v7045_v61, %v7044_v57 }
 0x24c   : > { %v4132_v43 = vpop.eup %4131  ;;  %4151 = vpow2.f32 %v3382_v12  ;;  %v3383_v35 = vmul.f32 -1.442695, %v6264_v62  ;;  %v2093_v2 = vadd.f32 1.0, %v4130_v20  ;;  %v6289_v37 = vmul.f32 %v6207_v17, %v7046_v41 }
 0x24d   : > { %v4134_v50 = vpop.eup %4133  ;;  %4153 = vrcp.f32 %v1782_v18  ;;  %v1819_v30 = vadd.f32 %v1818_v31, %v6277_v52  ;;  %v6292_v33 = vmul.f32 %v4128_v0, %v7047_v38  ;;  %v6295_v39 = vmul.f32 %v4132_v43, %v7048_v26 }
 0x24e   : > { %v4136_v9 = vpop.eup %4135  ;;  %v2412_v42 = vadd.f32 1.0, %v4134_v50  ;;  %4155 = vpow2.f32 %v3383_v35  ;;  %v2097_v18 = vadd.f32 1.0, %v7049_v6  ;;  %v2450_v12 = vadd.f32 %v6289_v37, %v6285_v13 }
 0x24f   : > { %v4138_v22 = vpop.eup %4137  ;;  %4157 = vrcp.f32 %v1783_v46  ;;  %v1462_v59 = vadd.f32 1.0, %v4136_v9  ;;  %v1820_v4 = vadd.f32 %v1819_v30, %v6292_v33  ;;  %v2098_v3 = vadd.f32 1.0, %v7050_v15  ;;  %v7052_v9 = vld [vmem:[#allocation37_spill] sm:$0xff] }
 0x250   : > { %v4140_v63 = vpop.eup %4139  ;;  %4159 = vrcp.f32 %v2412_v42  ;;  %v6298_v32 = vmul.f32 %v4138_v22, %v6150_v8  ;;  %v1469_v8 = vadd.f32 1.0, %v7051_v21  ;;  %v2451_v35 = vadd.f32 %v2450_v12, %v6295_v39 }
 0x251   : > { %v4142_v40 = vpop.eup %4141  ;;  %v1463_v16 = vadd.f32 1.0, %v4140_v63  ;;  %4161 = vrcp.f32 %v1462_v59 }
 0x252   : > { %v4144_v25 = vpop.eup %4143  ;;  %4163 = vrcp.f32 %v2093_v2  ;;  %v2413_v1 = vadd.f32 1.0, %v4142_v40  ;;  %v1821_v43 = vadd.f32 %v1820_v4, %v6298_v32  ;;  %v2099_v2 = vadd.f32 1.0, %v7052_v9  ;;  %v7057_v4 = vld [vmem:[#allocation48_spill] sm:$0xff] }
 0x253   : > { %v4146_v51 = vpop.eup %4145  ;;  %v2414_v5 = vadd.f32 1.0, %v4144_v25  ;;  %4165 = vrcp.f32 %v1463_v16 }
 0x254   : > { %v4148_v14 = vpop.eup %4147  ;;  %4167 = vrcp.f32 %v2413_v1  ;;  %v2094_v49 = vadd.f32 1.0, %v4146_v51 }
 0x255   : > { %v4150_v53 = vpop.eup %4149  ;;  %4169 = vrcp.f32 %v2414_v5  ;;  %v2100_v40 = vadd.f32 1.0, %v4148_v14 }
 0x256   : > { %v4152_v17 = vpop.eup %4151  ;;  %v1784_v45 = vadd.f32 1.0, %v4150_v53  ;;  %4171 = vrcp.f32 %v2094_v49  ;;  %v7055_v53 = vld [vmem:[#allocation61_spill] sm:$0xff] }
 0x257   : > { %v4154_v0 = vpop.eup %4153  ;;  %4173 = vrcp.f32 %v1468_v34  ;;  %v2415_v20 = vadd.f32 1.0, %v4152_v17  ;;  %v7053_v34 = vld [vmem:[#allocation60_spill] sm:$0xff]  ;;  %v7058_v17 = vld [vmem:[#allocation33_spill] sm:$0xff] }
 0x258   : > { %v4156_v29 = vpop.eup %4155  ;;  %4175 = vrcp.f32 %v1784_v45  ;;  %v6310_v22 = vmul.f32 %v4154_v0, %v6154_v44  ;;  %v6352_v6 = vmul.f32 %v7058_v17, %v7057_v4  ;;  %v7059_v45 = vld [vmem:[#allocation40_spill] sm:$0xff]  ;;  %v7060_v0 = vld [vmem:[#allocation67_spill] sm:$0xff] }
 0x259   : > { %v4158_v46 = vpop.eup %4157  ;;  %v2416_v50 = vadd.f32 1.0, %v4156_v29  ;;  %4177 = vrcp.f32 %v2415_v20  ;;  %v6357_v12 = vmul.f32 %v7060_v0, %v7059_v45 }
 0x25a   : > { %v4160_v58 = vpop.eup %4159  ;;  %4179 = vrcp.f32 %v2097_v18  ;;  %v1822_v16 = vadd.f32 %v1821_v43, %v6310_v22  ;;  %v6321_v54 = vmul.f32 %v4158_v46, %v6184_v56  ;;  %v7061_v46 = vld [vmem:[#allocation69_spill] sm:$0xff]  ;;  %v7062_v43 = vld [vmem:[#allocation68_spill] sm:$0xff] }
 0x25b   : > { %v4162_v42 = vpop.eup %4161  ;;  %v6313_v31 = vmul.f32 %v4160_v58, %v6225_v55  ;;  %4181 = vrcp.f32 %v2416_v50  ;;  %v7054_v55 = vld [vmem:[#allocation49_spill] sm:$0xff]  ;;  %v7063_v50 = vld [vmem:[#allocation58_spill] sm:$0xff]  ;;  %v7064_v58 = vld [vmem:[#allocation56_spill] sm:$0xff] }
 0x25c   : > { %v4164_v59 = vpop.eup %4163  ;;  %4183 = vrcp.f32 %v2098_v3  ;;  %v6316_v63 = vmul.f32 %v4162_v42, %v6050_v27  ;;  %v6325_v57 = vmul.f32 %v7054_v55, %v7053_v34  ;;  %v6375_v9 = vmul.f32 %v7064_v58, %v7063_v50 }
 0x25d   : > { %v4166_v30 = vpop.eup %4165  ;;  %4185 = vrcp.f32 %v1469_v8  ;;  %v2452_v25 = vadd.f32 %v2451_v35, %v6313_v31  ;;  %v6331_v1 = vmul.f32 %v4164_v59, %v6215_v60  ;;  %v6371_v35 = vmul.f32 %v7062_v43, %v7061_v46  ;;  %v7065_v59 = vld [vmem:[#allocation72_spill] sm:$0xff] }
 0x25e   : > { %v4168_v44 = vpop.eup %4167  ;;  %4187 = vrcp.f32 %v2099_v2  ;;  %v6328_v61 = vmul.f32 %v4166_v30, %v6231_v19  ;;  %v1823_v19 = vadd.f32 %v1822_v16, %v6321_v54 }
 0x25f   : > { %v4170_v27 = vpop.eup %4169  ;;  %v6334_v51 = vmul.f32 %v4168_v44, %v6236_v7  ;;  %4189 = vrcp.f32 %v2100_v40  ;;  %v7056_v7 = vld [vmem:[#allocation55_spill] sm:$0xff] }
 0x260   : > { %v4172_v41 = vpop.eup %4171  ;;  %v1502_v56 = vadd.f32 %v6328_v61, %v6316_v63  ;;  %v6339_v5 = vmul.f32 %v4170_v27, %v6241_v23  ;;  %v6348_v26 = vmul.f32 %v7056_v7, %v7055_v53  ;;  %v7066_v44 = vld [vmem:[#allocation51_spill] sm:$0xff]  ;;  %v7068_v7 = vld [vmem:[#allocation73_spill] sm:$0xff] }
 0x261   : > { %v4174_v38 = vpop.eup %4173  ;;  %v2453_v14 = vadd.f32 %v2452_v25, %v6334_v51  ;;  %v6344_v49 = vmul.f32 %v4172_v41, %v6249_v48 }
 0x262   : > { %v4176_v60 = vpop.eup %4175  ;;  %v1503_v18 = vadd.f32 %v1502_v56, %v6325_v57  ;;  %v6380_v40 = vmul.f32 %v4174_v38, %v7065_v59 }
 0x263   : > { %v4178_v23 = vpop.eup %4177  ;;  %v2454_v20 = vadd.f32 %v2453_v14, %v6339_v5  ;;  %v6361_v48 = vmul.f32 %v4176_v60, %v6255_v36  ;;  %v2134_v29 = vadd.f32 %v6344_v49, %v6331_v1 }
 0x264   : > { %v4180_v15 = vpop.eup %4179  ;;  %v6366_v3 = vmul.f32 %v4178_v23, %v6260_v11  ;;  %v1504_v21 = vadd.f32 %v1503_v18, %v6348_v26  ;;  %v7069_v23 = vld [vmem:[#allocation22_spill] sm:$0xff] }
 0x265   : > { %v4182_v8 = vpop.eup %4181  ;;  %v1824_v36 = vadd.f32 %v1823_v19, %v6361_v48  ;;  %v2135_v2 = vadd.f32 %v2134_v29, %v6357_v12  ;;  %v6388_v34 = vmul.f32 %v4180_v15, %v7066_v44  ;;  %v7067_v19 = vld [vmem:[#allocation53_spill] sm:$0xff] }
 0x266   : > { %v4184_v42 = vpop.eup %4183  ;;  %v1505_v11 = vadd.f32 %v1504_v21, %v6352_v6  ;;  %v6384_v30 = vmul.f32 %v4182_v8, %v6264_v62  ;;  %v2455_v16 = vadd.f32 %v2454_v20, %v6366_v3 }
 0x267   : > { %v4186_v25 = vpop.eup %4185  ;;  %v1825_v55 = vrot.slane %v1824_v36, 4  ;;  %v2136_v27 = vadd.f32 %v2135_v2, %v6371_v35  ;;  %v6394_v60 = vmul.f32 %v4184_v42, %v7067_v19 }
 0x268   : > { %v4188_v41 = vpop.eup %4187  ;;  %v1506_v56 = vadd.f32 %v1505_v11, %v6375_v9  ;;  %v2456_v38 = vadd.f32 %v2455_v16, %v6384_v30  ;;  %v6398_v4 = vmul.f32 %v4186_v25, %v7068_v7 }
 0x269   : > { %v1826_v14 = vadd.f32 %v1825_v55, %v1824_v36  ;;  %v2137_v62 = vadd.f32 %v2136_v27, %v6388_v34  ;;  %v4190_v53 = vpop.eup %4189  ;;  %v6402_v45 = vmul.f32 %v4188_v41, %v7069_v23 }
 0x26a   : > { %v1507_v17 = vadd.f32 %v1506_v56, %v6380_v40  ;;  %v2457_v18 = vrot.slane %v2456_v38, 4  ;;  %v6407_v15 = vmul.f32 %v4190_v53, %v7032_v47 }
 0x26b   : > { %v1827_v0 = vrot.slane %v1826_v14, 2  ;;  %v2138_v20 = vadd.f32 %v2137_v62, %v6394_v60 }
 0x26c   : > { %v1508_v29 = vadd.f32 %v1507_v17, %v6398_v4  ;;  %v2458_v8 = vadd.f32 %v2457_v18, %v2456_v38  ;;  %v2481_v18 = vld [vmem:[%s6732_s7] sm:$0x1] }
 0x26d   : > { %v2139_v21 = vadd.f32 %v2138_v20, %v6402_v45  ;;  %v1828_v43 = vadd.f32 %v1827_v0, %v1826_v14 }
 0x26e   : > { %v1509_v46 = vrot.slane %v1508_v29, 4  ;;  %v2459_v2 = vrot.slane %v2458_v8, 2 }
 0x26f   : > { %v2140_v50 = vadd.f32 %v2139_v21, %v6407_v15  ;;  %v1829_v59 = vrot.slane %v1828_v43, 1 }
 0x270   : > { %v1510_v58 = vadd.f32 %v1509_v46, %v1508_v29  ;;  %v2460_v44 = vadd.f32 %v2459_v2, %v2458_v8 }
 0x271   : > { %v2141_v36 = vrot.slane %v2140_v50, 4  ;;  %v1830_v27 = vadd.f32 %v1829_v59, %v1828_v43 }
 0x272   : > { %v1511_v42 = vrot.slane %v1510_v58, 2  ;;  %v2461_v19 = vrot.slane %v2460_v44, 1 }
 0x273   : > { %v2142_v11 = vadd.f32 %v2141_v36, %v2140_v50  ;;  %v2645_v50 = vld [vmem:[%s6735_s10] sm:$0xff]  ;;  %v2647_v36 = vld [vmem:[%s6735_s10 + $0x10] sm:$0xff] }
 0x274   : > { %v1512_v16 = vadd.f32 %v1511_v42, %v1510_v58  ;;  %v2462_v53 = vadd.f32 %v2461_v19, %v2460_v44  ;;  %v2646_v58 = vld [vmem:[%s6735_s10 + $0x8] sm:$0xff]  ;;  %v2648_v42 = vld [vmem:[%s6735_s10 + $0x18] sm:$0xff]  ;;  %v2651_v44 = vld [vmem:[%s6735_s10 + $0x30] sm:$0xff] }
 0x275   : > { %v2143_v25 = vrot.slane %v2142_v11, 2  ;;  %v3807_v2 = vpack.c.bf16 %v2646_v58, %v2645_v50  ;;  %v3811_v59 = vpack.c.bf16 %v2648_v42, %v2647_v36  ;;  %v2655_v19 = vld [vmem:[%s6735_s10 + $0x50] sm:$0xff]  ;;  %v7070_v58 = vsub.s32 0, %v4686_v28 }
 0x276   : > { %v1513_v55 = vrot.slane %v1512_v16, 1 }
 0x277   : > { %v2144_v47 = vadd.f32 %v2143_v25, %v2142_v11  ;;  %v2649_v11 = vld [vmem:[%s6735_s10 + $0x20] sm:$0xff]  ;;  %3808 = vmatprep.subr.bf16.mxu0 %v3807_v2  ;;  %3840 = vmatprep.subr.bf16.mxu1 %v3807_v2 }
 0x278   : > { %v1514_v41 = vadd.f32 %v1513_v55, %v1512_v16  ;;  %v2650_v16 = vld [vmem:[%s6735_s10 + $0x28] sm:$0xff]  ;;  %v2652_v55 = vld [vmem:[%s6735_s10 + $0x38] sm:$0xff] }
 0x279   : > { %v2145_v56 = vrot.slane %v2144_v47, 1  ;;  %v3815_v25 = vpack.c.bf16 %v2650_v16, %v2649_v11 }
 0x27a   : > { %v1831_v38 = vadd.f32 %v1830_v27, %v1514_v41  ;;  %v3819_v27 = vpack.c.bf16 %v2652_v55, %v2651_v44  ;;  %v2654_v41 = vld [vmem:[%s6735_s10 + $0x48] sm:$0xff] }
 0x27b   : > { %v2146_v62 = vadd.f32 %v2145_v56, %v2144_v47  ;;  %v2653_v47 = vld [vmem:[%s6735_s10 + $0x40] sm:$0xff] }
 0x27c   : > { %v3823_v56 = vpack.c.bf16 %v2654_v41, %v2653_v47  ;;  %v3390_v47 = vld [vmem:[%s4531_s21 + $0x88] sm:$0xff] }
 0x27d   : > { %v2147_v14 = vadd.f32 %v2146_v62, %v1831_v38  ;;  %v2656_v38 = vld [vmem:[%s6735_s10 + $0x58] sm:$0xff] }
 0x27e   : > { %v3827_v62 = vpack.c.bf16 %v2656_v38, %v2655_v19 }
 0x27f   : > { %v2463_v7 = vadd.f32 %v2462_v53, %v2147_v14  ;;  %v2657_v14 = vld [vmem:[%s6735_s10 + $0x60] sm:$0xff]  ;;  %v2658_v53 = vld [vmem:[%s6735_s10 + $0x68] sm:$0xff] }
 0x281   : > { %v2464_v17 = vmul.f32 0.00390625, %v2463_v7  ;;  %v3831_v7 = vpack.c.bf16 %v2658_v53, %v2657_v14  ;;  %v3389_v14 = vld [vmem:[%s4531_s21 + $0x80] sm:$0xff] }
 0x283   : > { %3648 = vmatmul.mubr.f32.vlgmr.msra.gmra.mrb[16].mxu0 %v2464_v17  ;;  %v2659_v17 = vld [vmem:[%s6735_s10 + $0x70] sm:$0xff] }
 0x284   : > { %3810 = vmatpush3.bf16.msra.mxu0 %v3807_v2 }
 0x285   : > { %3812 = vmatprep.subr.bf16.mxu0 %v3811_v59 }
 0x288   : > { %3814 = vmatpush3.bf16.msra.mxu0 %v3811_v59 }
 0x289   : > { %3816 = vmatprep.subr.bf16.mxu0 %v3815_v25 }
 0x28c   : > { %3818 = vmatpush3.bf16.msra.mxu0 %v3815_v25 }
 0x28d   : > { %3820 = vmatprep.subr.bf16.mxu0 %v3819_v27 }
 0x290   : > { %3822 = vmatpush3.bf16.msra.mxu0 %v3819_v27 }
 0x291   : > { %3824 = vmatprep.subr.bf16.mxu0 %v3823_v56 }
 0x294   : > { %3826 = vmatpush3.bf16.msra.mxu0 %v3823_v56 }
 0x295   : > { %3828 = vmatprep.subr.bf16.mxu0 %v3827_v62 }
 0x298   : > { %3830 = vmatpush3.bf16.msra.mxu0 %v3827_v62 }
 0x299   : > { %3832 = vmatprep.subr.bf16.mxu0 %v3831_v7 }
 0x29c   : > { %3834 = vmatpush3.bf16.msra.mxu0 %v3831_v7 }
 0x356   : > { %v2548_v23 = vpop.f32.mrb[16].mxu0 }
 0x357   : > { %v2549_v0 = vadd.f32 %v2548_v23, %v2481_v18  ;;  %v3649_v20 = vpop.f32.mrb[17].mxu0  ;;  %v2660_v18 = vld [vmem:[%s6735_s10 + $0x78] sm:$0xff] }
 0x358   : > { %v3835_v23 = vpack.c.bf16 %v2660_v18, %v2659_v17 }
 0x359   : > { %v3384_v29 = vmul.f32 -1.442695, %v2549_v0 }
 0x35a   : > { %3836 = vmatprep.subr.bf16.mxu0 %v3835_v23 }
 0x35b   : > { %4191 = vpow2.f32 %v3384_v29  ;;  %3838 = vmatpush3.bf16.msra.mxu0 %v3835_v23 }
 0x365   : > { %v4192_v21 = vpop.eup %4191 }
 0x366   : > { %v2555_v8 = vadd.f32 1.0, %v4192_v21 }
 0x368   : > { %4193 = vrcp.f32 %v2555_v8 }
 0x372   : > { %v4194_v46 = vpop.eup %4193 }
 0x373   : > { %v2558_v43 = vmul.f32 %v4194_v46, %v2549_v0  ;;  %v2560_v0 = vld [vmem:[%s6734_s9] sm:$0x1] }
 0x375   : > { %3653 = vmatmul.mubr.msk.f32.vlgmr.msra.gmra.mrb[16].mxu1 %vm2561_vm7, %v2558_v43 }
 0x376   : > { %3842 = vmatpush3.bf16.msra.mxu1 %v3807_v2 }
 0x377   : > { %3844 = vmatprep.subr.bf16.mxu1 %v3811_v59 }
 0x37a   : > { %3846 = vmatpush3.bf16.msra.mxu1 %v3811_v59 }
 0x37b   : > { %3848 = vmatprep.subr.bf16.mxu1 %v3815_v25 }
 0x37e   : > { %3850 = vmatpush3.bf16.msra.mxu1 %v3815_v25 }
 0x37f   : > { %3852 = vmatprep.subr.bf16.mxu1 %v3819_v27 }
 0x382   : > { %3854 = vmatpush3.bf16.msra.mxu1 %v3819_v27  ;;  %v2850_v27 = vld [vmem:[%s4531_s21 + $0x8] sm:$0xff] }
 0x383   : > { %3856 = vmatprep.subr.bf16.mxu1 %v3823_v56 }
 0x386   : > { %3858 = vmatpush3.bf16.msra.mxu1 %v3823_v56 }
 0x387   : > { %3860 = vmatprep.subr.bf16.mxu1 %v3827_v62 }
 0x38a   : > { %3862 = vmatpush3.bf16.msra.mxu1 %v3827_v62  ;;  %v2849_v62 = vld [vmem:[%s4531_s21] sm:$0xff] }
 0x38b   : > { %3864 = vmatprep.subr.bf16.mxu1 %v3831_v7 }
 0x38e   : > { %3866 = vmatpush3.bf16.msra.mxu1 %v3831_v7 }
 0x38f   : > { %3868 = vmatprep.subr.bf16.mxu1 %v3835_v23 }
 0x392   : > { %3870 = vmatpush3.bf16.msra.mxu1 %v3835_v23 }
 0x448   : > { %v2635_v20 = vpop.f32.mrb[16].mxu1 }
 0x449   : > { %v2636_v29 = vadd.f32 %v2635_v20, %v2560_v0  ;;  %v3654_v21 = vpop.f32.mrb[17].mxu1 }
 0x44b   : > { %v3387_v8 = vmul.f32 -1.442695, %v2636_v29 }
 0x44d   : > { %4195 = vpow2.f32 %v3387_v8 }
 0x457   : > { %v4196_v46 = vpop.eup %4195 }
 0x458   : > { %v2642_v43 = vadd.f32 1.0, %v4196_v46 }
 0x45a   : > { %4197 = vrcp.f32 %v2642_v43 }
 0x464   : > { %v4198_v50 = vpop.eup %4197 }
 0x465   : > { %v2681_v36 = vrot.slane %v4198_v50, %v7070_v58  ;;  %v2852_v50 = vld [vmem:[%s4531_s21 + $0x18] sm:$0xff] }
 0x466   : > { %v3392_v58 = vld [vmem:[%s4531_s21 + $0x98] sm:$0xff] }
 0x467   : > { %v2682_v2 = vmul.f32 %v2681_v36, %v6316_v63  ;;  %v2931_v42 = vmul.f32 %v2681_v36, %v6331_v1  ;;  %v2683_v59 = vmul.f32 %v2681_v36, %v6328_v61  ;;  %v2932_v11 = vmul.f32 %v2681_v36, %v6344_v49 }
 0x468   : > { %v2684_v16 = vmul.f32 %v2681_v36, %v6325_v57  ;;  %v2933_v25 = vmul.f32 %v2681_v36, %v6357_v12  ;;  %v2685_v28 = vmul.f32 %v2681_v36, %v6348_v26  ;;  %v2934_v63 = vmul.f32 %v2681_v36, %v6371_v35 }
 0x469   : > { %3687 = vmatprep.mubr.f32.mxu0 %v2682_v2  ;;  %3743 = vmatprep.mubr.f32.mxu1 %v2931_v42  ;;  %v2686_v1 = vmul.f32 %v2681_v36, %v6352_v6  ;;  %v2935_v61 = vmul.f32 %v2681_v36, %v6388_v34  ;;  %v2687_v57 = vmul.f32 %v2681_v36, %v6375_v9 }
 0x46a   : > { %3688 = vmatmul.mubr.f32.vlgmr.msra.gmra.mrb[18].mxu0 %v2683_v59  ;;  %3744 = vmatmul.mubr.f32.vlgmr.msra.gmra.mrb[18].mxu1 %v2932_v11  ;;  %v2936_v49 = vmul.f32 %v2681_v36, %v6394_v60  ;;  %v2688_v12 = vmul.f32 %v2681_v36, %v6380_v40  ;;  %v2937_v44 = vmul.f32 %v2681_v36, %v6402_v45  ;;  %v2851_v11 = vld [vmem:[%s4531_s21 + $0x10] sm:$0xff] }
 0x46b   : > { %3690 = vmatprep.mubr.f32.mxu0 %v2684_v16  ;;  %3746 = vmatprep.mubr.f32.mxu1 %v2933_v25  ;;  %v2689_v26 = vmul.f32 %v2681_v36, %v6398_v4  ;;  %v2938_v6 = vmul.f32 %v2681_v36, %v6407_v15  ;;  %v2690_v35 = vmul.f32 %v2681_v36, %v6269_v10  ;;  %v3391_v16 = vld [vmem:[%s4531_s21 + $0x90] sm:$0xff] }
 0x46c   : > { %v2939_v34 = vmul.f32 %v2681_v36, %v6285_v13  ;;  %v2691_v9 = vmul.f32 %v2681_v36, %v6273_v24  ;;  %v2940_v40 = vmul.f32 %v2681_v36, %v6289_v37  ;;  %v2692_v60 = vmul.f32 %v2681_v36, %v6277_v52 }
 0x46d   : > { %v2941_v45 = vmul.f32 %v2681_v36, %v6295_v39  ;;  %v2693_v10 = vmul.f32 %v2681_v36, %v6292_v33  ;;  %v2942_v13 = vmul.f32 %v2681_v36, %v6313_v31  ;;  %v2694_v4 = vmul.f32 %v2681_v36, %v6298_v32 }
 0x46e   : > { %3691 = vmatmul.mubr.f32.gmra.mrb[20].mxu0 %v2685_v28  ;;  %3747 = vmatmul.mubr.f32.gmra.mrb[20].mxu1 %v2934_v63  ;;  %v2943_v15 = vmul.f32 %v2681_v36, %v6334_v51  ;;  %v2695_v24 = vmul.f32 %v2681_v36, %v6310_v22  ;;  %v2944_v52 = vmul.f32 %v2681_v36, %v6339_v5  ;;  %v6504_v22 = vld [vmem:[%s6736_s11] ss:$0 sm:$0xff]  ;;  %v6508_v5 = vstv %s3108_s26 }
 0x46f   : > { %3693 = vmatprep.mubr.f32.mxu0 %v2686_v1  ;;  %3749 = vmatprep.mubr.f32.mxu1 %v2935_v61  ;;  %v2696_v37 = vmul.f32 %v2681_v36, %v6321_v54  ;;  %v2945_v33 = vmul.f32 %v2681_v36, %v6366_v3  ;;  %v2697_v39 = vmul.f32 %v2681_v36, %v6361_v48  ;;  %v6506_v54 = vstv %s2865_s0 }
 0x470   : > { %v2946_v32 = vmul.f32 %v2681_v36, %v6384_v30 }
 0x472   : > { %3694 = vmatmul.mubr.f32.gmra.mrb[22].mxu0 %v2687_v57  ;;  %3750 = vmatmul.mubr.f32.gmra.mrb[22].mxu1 %v2936_v49 }
 0x473   : > { %3696 = vmatprep.mubr.f32.mxu0 %v2688_v12  ;;  %3752 = vmatprep.mubr.f32.mxu1 %v2937_v44 }
 0x476   : > { %3697 = vmatmul.mubr.f32.gmra.mrb[24].mxu0 %v2689_v26  ;;  %3753 = vmatmul.mubr.f32.gmra.mrb[24].mxu1 %v2938_v6 }
 0x477   : > { %3699 = vmatprep.mubr.f32.mxu0 %v2690_v35  ;;  %3755 = vmatprep.mubr.f32.mxu1 %v2939_v34  ;;  %v2854_v34 = vld [vmem:[%s4531_s21 + $0x28] sm:$0xff] }
 0x47a   : > { %3700 = vmatmul.mubr.f32.gmra.mrb[26].mxu0 %v2691_v9  ;;  %3756 = vmatmul.mubr.f32.gmra.mrb[26].mxu1 %v2940_v40  ;;  %v3394_v9 = vld [vmem:[%s4531_s21 + $0xa8] sm:$0xff] }
 0x47b   : > { %3702 = vmatprep.mubr.f32.mxu0 %v2692_v60  ;;  %3758 = vmatprep.mubr.f32.mxu1 %v2941_v45 }
 0x47e   : > { %3703 = vmatmul.mubr.f32.gmra.mrb[28].mxu0 %v2693_v10  ;;  %3759 = vmatmul.mubr.f32.gmra.mrb[28].mxu1 %v2942_v13  ;;  %v2853_v13 = vld [vmem:[%s4531_s21 + $0x20] sm:$0xff] }
 0x47f   : > { %3705 = vmatprep.mubr.f32.mxu0 %v2694_v4  ;;  %3761 = vmatprep.mubr.f32.mxu1 %v2943_v15  ;;  %v3393_v4 = vld [vmem:[%s4531_s21 + $0xa0] sm:$0xff] }
 0x482   : > { %3706 = vmatmul.mubr.f32.gmra.mrb[30].mxu0 %v2695_v24  ;;  %3762 = vmatmul.mubr.f32.gmra.mrb[30].mxu1 %v2944_v52 }
 0x483   : > { %3708 = vmatprep.mubr.f32.mxu0 %v2696_v37  ;;  %3764 = vmatprep.mubr.f32.mxu1 %v2945_v33 }
 0x486   : > { %3709 = vmatmul.mubr.f32.gmra.mrb[32].mxu0 %v2697_v39  ;;  %3765 = vmatmul.mubr.f32.gmra.mrb[32].mxu1 %v2946_v32 }
 0x53d   : > { %v3689_v31 = vpop.f32.mrb[18].mxu0  ;;  %v3745_v51 = vpop.f32.mrb[18].mxu1 }
 0x53e   : > { %v2776_v48 = vadd.f32 %v3689_v31, %v6504_v22  ;;  %v3019_v3 = vadd.f32 %v3745_v51, %v6504_v22  ;;  %v2770_v30 = vpop.f32.mrb[19].mxu0  ;;  %v3013_v55 = vpop.f32.mrb[19].mxu1 }
 0x53f   : > { %v2771_v41 = vadd.f32 %v6504_v22, %v2770_v30  ;;  %v3014_v56 = vadd.f32 %v6504_v22, %v3013_v55  ;;  %v2856_v55 = vld [vmem:[%s4531_s21 + $0x38] sm:$0xff] }
 0x540   : > { %v2868_v19 = vmul.f32 %v6506_v54, %v2776_v48  ;;  %v3111_v38 = vmul.f32 %v6508_v5, %v3019_v3 }
 0x541   : > { %v2867_v53 = vmul.f32 %v6506_v54, %v2771_v41  ;;  %v3110_v7 = vmul.f32 %v6508_v5, %v3014_v56  ;;  %v3692_v17 = vpop.f32.mrb[20].mxu0  ;;  %v3748_v18 = vpop.f32.mrb[20].mxu1 }
 0x542   : > { %v2884_v23 = vadd.f32 %v2868_v19, %v2850_v27  ;;  %v3127_v0 = vadd.f32 %v3390_v47, %v3111_v38  ;;  %v2786_v20 = vadd.f32 %v3692_v17, %v6504_v22  ;;  %v3029_v29 = vadd.f32 %v3748_v18, %v6504_v22  ;;  %v2780_v21 = vpop.f32.mrb[21].mxu0  ;;  %v3023_v8 = vpop.f32.mrb[21].mxu1  ;;  %v3396_v27 = vld [vmem:[%s4531_s21 + $0xb8] sm:$0xff]  ;;  %v2855_v38 = vld [vmem:[%s4531_s21 + $0x30] sm:$0xff] }
 0x543   : > { %v2883_v46 = vadd.f32 %v2867_v53, %v2849_v62  ;;  %v3126_v43 = vadd.f32 %v3389_v14, %v3110_v7  ;;  %v2781_v36 = vadd.f32 %v6504_v22, %v2780_v21  ;;  %v3024_v2 = vadd.f32 %v6504_v22, %v3023_v8  ;;  %v3395_v62 = vld [vmem:[%s4531_s21 + $0xb0] sm:$0xff] }
 0x544   : > { %2900 = vst.msk [vmem:[%s6530_s23 + $0x8] sm:$0xff] %vm478_vm0, %v2884_v23  ;;  %3406 = vst.msk [vmem:[%s6530_s23 + $0x88] sm:$0xff] %vm478_vm0, %v3127_v0  ;;  %v2870_v42 = vmul.f32 %v6506_v54, %v2786_v20  ;;  %v3113_v59 = vmul.f32 %v6508_v5, %v3029_v29 }
 0x545   : > { %2899 = vst.msk [vmem:[%s6530_s23] sm:$0xff] %vm478_vm0, %v2883_v46  ;;  %3405 = vst.msk [vmem:[%s6530_s23 + $0x80] sm:$0xff] %vm478_vm0, %v3126_v43  ;;  %v2869_v25 = vmul.f32 %v6506_v54, %v2781_v36  ;;  %v3112_v28 = vmul.f32 %v6508_v5, %v3024_v2  ;;  %v3695_v63 = vpop.f32.mrb[22].mxu0  ;;  %v3751_v1 = vpop.f32.mrb[22].mxu1  ;;  %v2858_v43 = vld [vmem:[%s4531_s21 + $0x48] sm:$0xff] }
 0x546   : > { %v2886_v61 = vadd.f32 %v2870_v42, %v2852_v50  ;;  %v3129_v57 = vadd.f32 %v3392_v58, %v3113_v59  ;;  %v2796_v49 = vadd.f32 %v3695_v63, %v6504_v22  ;;  %v3039_v12 = vadd.f32 %v3751_v1, %v6504_v22  ;;  %v2790_v44 = vpop.f32.mrb[23].mxu0  ;;  %v3033_v26 = vpop.f32.mrb[23].mxu1  ;;  %v3398_v50 = vld [vmem:[%s4531_s21 + $0xc8] sm:$0xff]  ;;  %v2857_v59 = vld [vmem:[%s4531_s21 + $0x40] sm:$0xff] }
 0x547   : > { %v2885_v6 = vadd.f32 %v2869_v25, %v2851_v11  ;;  %v3128_v35 = vadd.f32 %v3391_v16, %v3112_v28  ;;  %v2791_v40 = vadd.f32 %v6504_v22, %v2790_v44  ;;  %v3034_v60 = vadd.f32 %v6504_v22, %v3033_v26  ;;  %v3397_v11 = vld [vmem:[%s4531_s21 + $0xc0] sm:$0xff] }
 0x548   : > { %2902 = vst.msk [vmem:[%s6530_s23 + $0x18] sm:$0xff] %vm478_vm0, %v2886_v61  ;;  %3408 = vst.msk [vmem:[%s6530_s23 + $0x98] sm:$0xff] %vm478_vm0, %v3129_v57  ;;  %v2872_v45 = vmul.f32 %v6506_v54, %v2796_v49  ;;  %v3115_v10 = vmul.f32 %v6508_v5, %v3039_v12 }
 0x549   : > { %2901 = vst.msk [vmem:[%s6530_s23 + $0x10] sm:$0xff] %vm478_vm0, %v2885_v6  ;;  %3407 = vst.msk [vmem:[%s6530_s23 + $0x90] sm:$0xff] %vm478_vm0, %v3128_v35  ;;  %v2871_v15 = vmul.f32 %v6506_v54, %v2791_v40  ;;  %v3114_v24 = vmul.f32 %v6508_v5, %v3034_v60  ;;  %v3698_v52 = vpop.f32.mrb[24].mxu0  ;;  %v3754_v37 = vpop.f32.mrb[24].mxu1  ;;  %v2860_v35 = vld [vmem:[%s4531_s21 + $0x58] sm:$0xff] }
 0x54a   : > { %v2888_v33 = vadd.f32 %v2872_v45, %v2854_v34  ;;  %v3131_v39 = vadd.f32 %v3394_v9, %v3115_v10  ;;  %v2806_v32 = vadd.f32 %v3698_v52, %v6504_v22  ;;  %v3049_v31 = vadd.f32 %v3754_v37, %v6504_v22  ;;  %v2800_v51 = vpop.f32.mrb[25].mxu0  ;;  %v3043_v48 = vpop.f32.mrb[25].mxu1  ;;  %v3400_v34 = vld [vmem:[%s4531_s21 + $0xd8] sm:$0xff]  ;;  %v2859_v10 = vld [vmem:[%s4531_s21 + $0x50] sm:$0xff] }
 0x54b   : > { %v2887_v3 = vadd.f32 %v2871_v15, %v2853_v13  ;;  %v3130_v30 = vadd.f32 %v3393_v4, %v3114_v24  ;;  %v2801_v47 = vadd.f32 %v6504_v22, %v2800_v51  ;;  %v3044_v41 = vadd.f32 %v6504_v22, %v3043_v48  ;;  %v3399_v13 = vld [vmem:[%s4531_s21 + $0xd0] sm:$0xff] }
 0x54c   : > { %2904 = vst.msk [vmem:[%s6530_s23 + $0x28] sm:$0xff] %vm478_vm0, %v2888_v33  ;;  %3410 = vst.msk [vmem:[%s6530_s23 + $0xa8] sm:$0xff] %vm478_vm0, %v3131_v39  ;;  %v2874_v56 = vmul.f32 %v6506_v54, %v2806_v32  ;;  %v3117_v19 = vmul.f32 %v6508_v5, %v3049_v31 }
 0x54d   : > { %2903 = vst.msk [vmem:[%s6530_s23 + $0x20] sm:$0xff] %vm478_vm0, %v2887_v3  ;;  %3409 = vst.msk [vmem:[%s6530_s23 + $0xa0] sm:$0xff] %vm478_vm0, %v3130_v30  ;;  %v2873_v14 = vmul.f32 %v6506_v54, %v2801_v47  ;;  %v3116_v53 = vmul.f32 %v6508_v5, %v3044_v41  ;;  %v3701_v7 = vpop.f32.mrb[26].mxu0  ;;  %v3757_v17 = vpop.f32.mrb[26].mxu1  ;;  %v2862_v30 = vld [vmem:[%s4531_s21 + $0x68] sm:$0xff] }
 0x54e   : > { %v2890_v18 = vadd.f32 %v2874_v56, %v2856_v55  ;;  %v3133_v23 = vadd.f32 %v3396_v27, %v3117_v19  ;;  %v2816_v0 = vadd.f32 %v3701_v7, %v6504_v22  ;;  %v3059_v20 = vadd.f32 %v3757_v17, %v6504_v22  ;;  %v2810_v29 = vpop.f32.mrb[27].mxu0  ;;  %v3053_v21 = vpop.f32.mrb[27].mxu1  ;;  %v3402_v55 = vld [vmem:[%s4531_s21 + $0xe8] sm:$0xff]  ;;  %v2861_v19 = vld [vmem:[%s4531_s21 + $0x60] sm:$0xff] }
 0x54f   : > { %v2889_v8 = vadd.f32 %v2873_v14, %v2855_v38  ;;  %v3132_v46 = vadd.f32 %v3395_v62, %v3116_v53  ;;  %v2811_v58 = vadd.f32 %v6504_v22, %v2810_v29  ;;  %v3054_v36 = vadd.f32 %v6504_v22, %v3053_v21  ;;  %v3401_v38 = vld [vmem:[%s4531_s21 + $0xe0] sm:$0xff] }
 0x550   : > { %2906 = vst.msk [vmem:[%s6530_s23 + $0x38] sm:$0xff] %vm478_vm0, %v2890_v18  ;;  %3412 = vst.msk [vmem:[%s6530_s23 + $0xb8] sm:$0xff] %vm478_vm0, %v3133_v23  ;;  %v2876_v2 = vmul.f32 %v6506_v54, %v2816_v0  ;;  %v3119_v42 = vmul.f32 %v6508_v5, %v3059_v20 }
 0x551   : > { %2905 = vst.msk [vmem:[%s6530_s23 + $0x30] sm:$0xff] %vm478_vm0, %v2889_v8  ;;  %3411 = vst.msk [vmem:[%s6530_s23 + $0xb0] sm:$0xff] %vm478_vm0, %v3132_v46  ;;  %v2875_v16 = vmul.f32 %v6506_v54, %v2811_v58  ;;  %v3118_v25 = vmul.f32 %v6508_v5, %v3054_v36  ;;  %v3704_v28 = vpop.f32.mrb[28].mxu0  ;;  %v3760_v63 = vpop.f32.mrb[28].mxu1  ;;  %v2864_v46 = vld [vmem:[%s4531_s21 + $0x78] sm:$0xff] }
 0x552   : > { %v2892_v1 = vadd.f32 %v2876_v2, %v2858_v43  ;;  %v3135_v61 = vadd.f32 %v3398_v50, %v3119_v42  ;;  %v2826_v57 = vadd.f32 %v3704_v28, %v6504_v22  ;;  %v3069_v49 = vadd.f32 %v3760_v63, %v6504_v22  ;;  %v2820_v12 = vpop.f32.mrb[29].mxu0  ;;  %v3063_v44 = vpop.f32.mrb[29].mxu1  ;;  %v3404_v43 = vld [vmem:[%s4531_s21 + $0xf8] sm:$0xff]  ;;  %v2863_v42 = vld [vmem:[%s4531_s21 + $0x70] sm:$0xff] }
 0x553   : > { %v2891_v26 = vadd.f32 %v2875_v16, %v2857_v59  ;;  %v3134_v6 = vadd.f32 %v3397_v11, %v3118_v25  ;;  %v2821_v9 = vadd.f32 %v6504_v22, %v2820_v12  ;;  %v3064_v40 = vadd.f32 %v6504_v22, %v3063_v44  ;;  %v3403_v59 = vld [vmem:[%s4531_s21 + $0xf0] sm:$0xff]  ;;  %s3160_s21 = scalar_lea.sflag [#allocation6], %s4525_s30 }
 0x554   : > { %2908 = vst.msk [vmem:[%s6530_s23 + $0x48] sm:$0xff] %vm478_vm0, %v2892_v1  ;;  %3414 = vst.msk [vmem:[%s6530_s23 + $0xc8] sm:$0xff] %vm478_vm0, %v3135_v61  ;;  %v2878_v60 = vmul.f32 %v6506_v54, %v2826_v57  ;;  %v3121_v45 = vmul.f32 %v6508_v5, %v3069_v49 }
 0x555   : > { %2907 = vst.msk [vmem:[%s6530_s23 + $0x40] sm:$0xff] %vm478_vm0, %v2891_v26  ;;  %3413 = vst.msk [vmem:[%s6530_s23 + $0xc0] sm:$0xff] %vm478_vm0, %v3134_v6  ;;  %v2877_v4 = vmul.f32 %v6506_v54, %v2821_v9  ;;  %v3120_v15 = vmul.f32 %v6508_v5, %v3064_v40  ;;  %v3707_v24 = vpop.f32.mrb[30].mxu0  ;;  %v3763_v52 = vpop.f32.mrb[30].mxu1 }
 0x556   : > { %v2894_v37 = vadd.f32 %v2878_v60, %v2860_v35  ;;  %v3137_v33 = vadd.f32 %v3400_v34, %v3121_v45  ;;  %v2836_v39 = vadd.f32 %v3707_v24, %v6504_v22  ;;  %v3079_v32 = vadd.f32 %v3763_v52, %v6504_v22  ;;  %v2830_v31 = vpop.f32.mrb[31].mxu0  ;;  %v3073_v51 = vpop.f32.mrb[31].mxu1 }
 0x557   : > { %v2893_v48 = vadd.f32 %v2877_v4, %v2859_v10  ;;  %v3136_v3 = vadd.f32 %v3399_v13, %v3120_v15  ;;  %v2831_v27 = vadd.f32 %v6504_v22, %v2830_v31  ;;  %v3074_v47 = vadd.f32 %v6504_v22, %v3073_v51 }
 0x558   : > { %2910 = vst.msk [vmem:[%s6530_s23 + $0x58] sm:$0xff] %vm478_vm0, %v2894_v37  ;;  %3416 = vst.msk [vmem:[%s6530_s23 + $0xd8] sm:$0xff] %vm478_vm0, %v3137_v33  ;;  %v2880_v41 = vmul.f32 %v6506_v54, %v2836_v39  ;;  %v3123_v56 = vmul.f32 %v6508_v5, %v3079_v32 }
 0x559   : > { %2909 = vst.msk [vmem:[%s6530_s23 + $0x50] sm:$0xff] %vm478_vm0, %v2893_v48  ;;  %3415 = vst.msk [vmem:[%s6530_s23 + $0xd0] sm:$0xff] %vm478_vm0, %v3136_v3  ;;  %v2879_v62 = vmul.f32 %v6506_v54, %v2831_v27  ;;  %v3122_v14 = vmul.f32 %v6508_v5, %v3074_v47  ;;  %v3710_v53 = vpop.f32.mrb[32].mxu0  ;;  %v3766_v7 = vpop.f32.mrb[32].mxu1 }
 0x55a   : > { %v2896_v17 = vadd.f32 %v2880_v41, %v2862_v30  ;;  %v3139_v18 = vadd.f32 %v3402_v55, %v3123_v56  ;;  %v2846_v23 = vadd.f32 %v3710_v53, %v6504_v22  ;;  %v3089_v0 = vadd.f32 %v3766_v7, %v6504_v22  ;;  %v2840_v20 = vpop.f32.mrb[33].mxu0  ;;  %v3083_v29 = vpop.f32.mrb[33].mxu1 }
 0x55b   : > { %v2895_v21 = vadd.f32 %v2879_v62, %v2861_v19  ;;  %v3138_v8 = vadd.f32 %v3401_v38, %v3122_v14  ;;  %v2841_v50 = vadd.f32 %v6504_v22, %v2840_v20  ;;  %v3084_v58 = vadd.f32 %v6504_v22, %v3083_v29 }
 0x55c   : > { %2912 = vst.msk [vmem:[%s6530_s23 + $0x68] sm:$0xff] %vm478_vm0, %v2896_v17  ;;  %3418 = vst.msk [vmem:[%s6530_s23 + $0xe8] sm:$0xff] %vm478_vm0, %v3139_v18  ;;  %v2882_v36 = vmul.f32 %v6506_v54, %v2846_v23  ;;  %v3125_v2 = vmul.f32 %v6508_v5, %v3089_v0 }
 0x55d   : > { %2911 = vst.msk [vmem:[%s6530_s23 + $0x60] sm:$0xff] %vm478_vm0, %v2895_v21  ;;  %3417 = vst.msk [vmem:[%s6530_s23 + $0xe0] sm:$0xff] %vm478_vm0, %v3138_v8  ;;  %v2881_v22 = vmul.f32 %v6506_v54, %v2841_v50  ;;  %v3124_v11 = vmul.f32 %v6508_v5, %v3084_v58 }
 0x55e   : > { %v2898_v16 = vadd.f32 %v2882_v36, %v2864_v46  ;;  %v3141_v25 = vadd.f32 %v3404_v43, %v3125_v2 }
 0x55f   : > { %v2897_v28 = vadd.f32 %v2881_v22, %v2863_v42  ;;  %v3140_v63 = vadd.f32 %v3403_v59, %v3124_v11 }
 0x560   : > { %2914 = vst.msk [vmem:[%s6530_s23 + $0x78] sm:$0xff] %vm478_vm0, %v2898_v16  ;;  %3420 = vst.msk [vmem:[%s6530_s23 + $0xf8] sm:$0xff] %vm478_vm0, %v3141_v25 }
 0x561   : > { %2913 = vst.msk [vmem:[%s6530_s23 + $0x70] sm:$0xff] %vm478_vm0, %v2897_v28  ;;  %3419 = vst.msk [vmem:[%s6530_s23 + $0xf0] sm:$0xff] %vm478_vm0, %v3140_v63 }
 0x562   : > { %4260 = shalt.err (!%p4257_p11)
}
 0x563   : > { %s4261_s0 = scalar_lea.hbm %s6671_s19, 4096  ;;  %s4265_s20 = scalar_lea.hbm %s6737_s12, 8192 }
 0x564   : > { %p4262_p0 = scmp.ne.s32.totalorder %s6671_s19, %s4261_s0  ;;  %p4266_p5 = scmp.lt.u32.totalorder %s6671_s19, %s6737_s12 }
 0x565   : > { %p4267_p12 = scmp.lt.u32.totalorder %s4265_s20, %s4261_s0  ;;  %p4269_p13 = scmp.lt.u32.totalorder %s4261_s0, %s6671_s19 }
 0x566   : > { %p4263_p2 = pnand %p4262_p0, %p7071_p3 }
 0x567   : > { %p4268_p6 = por %p4267_p12, %p4266_p5 }
 0x568   : > { %p4264_p7 = pneg %p4263_p2 }
 0x569   : > { %p4270_p8 = por %p4269_p13, %p4268_p6 }
 0x56b   : > { %p4271_p9 = pnand %p4270_p8, %p4264_p7 }
 0x56d   : > { %4274 = shalt.err (!%p4271_p9)
}
 0x56e   : > { %s4327_s25 = smov 128   ;;  %s4328_s29 = smov 8  }
 0x56f   : > { %3877 = dma.vmem_to_hbm [thread:$0]  (%p7071_p3), %s6673_s17, 4096, %s6671_s19, %s3160_s21, %s4327_s25, %s4327_s25, %s4328_s29  }
 0x570 PF: > { %s7072_s28 = sld [smem:[#allocation13_spill]]  ;;  %s7073_s18 = sld [smem:[#allocation17_spill]] }
 0x571   : > { %p7075_p1 = scmp.ge.s32.totalorder %s4317_s24, 2 }
 0x576   : > { %s3188_s14 = sand.u32 1, %s7072_s28   ;;  %p7074_p10 = scmp.ne.s32.totalorder %s7073_s18, 0 }
 0x577   : > { %s3189_s13 = scalar_lea.sflag [#allocation6], %s3188_s14 }
 0x578   : > { %p3888_p4 = pnand %p7075_p1, %p7074_p10 }
 0x57a   : > { %4300 = dma.done.wait (!%p3888_p4), %s3189_s13, 4096  }
 0x57b   : > { %4302 = vsyncadd (!%p3888_p4), %s3189_s13, 4294963200  ;;  %s7076_s24 = sld [smem:[#allocation15_spill]]  ;;  %s7077_s0 = sld [smem:[#allocation14_spill]] }
 0x57c   : > { %s7078_s23 = sld [smem:[#allocation16_spill]]  ;;  %s7079_s21 = smov %s4309_s22 }
 0x581   : > { %p26_p11 = scmp.ge.s32.totalorder %s7076_s24, 4   ;;  %s7080_s22 = smov %s7077_s0 }
 0x583   :  { %28 = sbr.rel (!%p26_p11) target bundleno = 8 (0x8), region = 129 }
 0x58a   :  { %3194 = vsyncpa [#allocation5], 1 }
 0x58b   :  { %3196 = vsyncpa [#allocation5 + $0x1], 1 }
 0x58c   :  { %3197 = vsyncpa [#allocation6], 1 }
 0x58d   :  { %3199 = vsyncpa [#allocation6 + $0x1], 1 }
 0x58e   :  { %3200 = vsyncpa [#allocation7], 1 }
 0x58f   :  { %3202 = vsyncpa [#allocation7 + $0x1], 1 }

</bundles_post_ra>
